<compile_context>
chip_gen: v7x
topology: tpu7x:2x2x1
jax: 0.10.0
libtpu: 0.0.40
codegen_flags: <defaults>
</compile_context>

<pallas_src>
import jax
import jax.numpy as jnp
import numpy as np
from jax.experimental import pallas as pl
from jax.experimental.pallas import tpu as pltpu

# PyTorch module defaults
CONV_DIM_IN = 2
CONV_DIM_OUT = 128
CONV_DIM_LSTM = 1024
N_CONV_CH = 16

KSTEPS = 2                      # grid steps streaming w1 (the 4096->512 dense)


# ---------------------------------------------------------------------------
# Fused kernel.
#   at_ref : (18, 4*N*S) bf16  im2col patches, columns ordered (pool member, n, s)
#   wc_ref : (16, 18) bf16     conv weight; bc_ref: (16, 1) f32
#   w1_ref : (KB, 512)         streamed dense-weight block (int8 or bf16)
#   s1_ref : (1, 512) f32      per-output-channel dequant scale (ones if bf16)
#   flat_ref scratch: (N, 16*S) f32  pooled activations in NCHW-flatten order
#   acc_ref  scratch: (N, 512)  f32  dense-layer accumulator
# ---------------------------------------------------------------------------
def _fused_kernel(at_ref, wc_ref, bc_ref, w1_ref, s1_ref, b1_ref,
                  w2_ref, b2_ref, w3_ref, b3_ref, o_ref, flat_ref, acc_ref):
    k = pl.program_id(0)
    n_batch, feat = flat_ref.shape
    s = feat // N_CONV_CH               # PH * PW
    ns = n_batch * s
    kb = w1_ref.shape[0]                # contraction rows handled this step

    # --- step 0: conv1 + ReLU + 2x2 max-pool, scattered to flatten order ----
    @pl.when(k == 0)
    def _():
        # one bf16 matmul covering all 4 pool-window members (lane-dense)
        y = jnp.dot(wc_ref[...], at_ref[...],
                    preferred_element_type=jnp.float32)          # (16, 4*N*S)
        y = jnp.maximum(y + bc_ref[...], 0.0)                    # bias + ReLU
        pooled = jnp.maximum(                                    # 2x2 max-pool
            jnp.maximum(y[:, 0:ns], y[:, ns:2 * ns]),
            jnp.maximum(y[:, 2 * ns:3 * ns], y[:, 3 * ns:4 * ns]))  # (16, N*S)
        # flat[n, c*S + s] = pooled[c, n*S + s]  == PyTorch .view(N, -1) order.
        # Static, tiny (32 small stores), only at k==0.
        for c_idx in range(N_CONV_CH):
            for nn in range(n_batch):
                flat_ref[nn:nn + 1, c_idx * s:(c_idx + 1) * s] = \
                    pooled[c_idx:c_idx + 1, nn * s:(nn + 1) * s]
        acc_ref[...] = jnp.zeros_like(acc_ref)

    # --- dense Linear(16*S -> 512): ONE matmul per streamed w1 block ---------
    start = pl.multiple_of(k * kb, kb)
    lhs = flat_ref[:, pl.ds(start, kb)].astype(jnp.bfloat16)     # (N, KB)
    rhs = w1_ref[...].astype(jnp.bfloat16)                       # dequant cast
    acc_ref[...] += jnp.dot(lhs, rhs, preferred_element_type=jnp.float32)

    # --- last step: dequant-scale + bias + ReLU, fcn1 + ReLU, fcn2 -----------
    # TODO(synk): nn.Dropout(0.5)/nn.Dropout(0.2) are identity in eval mode;
    # training-mode stochastic masks are not implemented here.
    @pl.when(k == pl.num_programs(0) - 1)
    def _():
        h = jnp.maximum(acc_ref[...] * s1_ref[...] + b1_ref[...], 0.0)
        h = jnp.maximum(
            jnp.dot(h.astype(jnp.bfloat16), w2_ref[...],
                    preferred_element_type=jnp.float32) + b2_ref[...], 0.0)
        o_ref[...] = (jnp.dot(h.astype(jnp.bfloat16), w3_ref[...],
                              preferred_element_type=jnp.float32)
                      + b3_ref[...]).astype(o_ref.dtype)


# ---------------------------------------------------------------------------
# Wrapper-side im2col (single fused pad/slice/transpose pass over the input).
# Columns ordered (pool member j, n, ph, pw); rows ordered (c, kh, kw).
# TODO(synk): a fully in-kernel tap gather would need strided lane loads; the
# input is tiny relative to the MLP weights so this XLA glue is cheap.
# ---------------------------------------------------------------------------
def _im2col_pool_patches(x):
    n, c, h, w = x.shape
    oh, ow = h // 2, w // 2
    ph, pw = oh // 2, ow // 2
    xp = jnp.pad(x, ((0, 0), (0, 0), (1, 1), (1, 1)))
    taps = [xp[:, :, kh:kh + 2 * oh:2, kw:kw + 2 * ow:2]
            for kh in range(3) for kw in range(3)]              # 9 x (N,C,OH,OW)
    pat = jnp.stack(taps, axis=2)                               # (N, C, 9, OH, OW)
    pat = pat.reshape(n, c * 9, ph, 2, pw, 2)
    pat = jnp.transpose(pat, (1, 3, 5, 0, 2, 4))                # (C*9,2,2,N,PH,PW)
    return pat.reshape(c * 9, 4 * n * ph * pw).astype(jnp.bfloat16)


@jax.jit
def classification_hybrid_forward(x, prep):
    n, c, h, w = x.shape
    s = (h // 4) * (w // 4)
    feat = N_CONV_CH * s
    assert feat == CONV_DIM_LSTM * 4, "spatial size must match dense in-features"
    assert feat % KSTEPS == 0

    at = _im2col_pool_patches(x)                                # (18, 4*N*S) bf16
    kb = feat // KSTEPS
    d1, d2, d3 = CONV_DIM_OUT * 4, CONV_DIM_OUT * 2, CONV_DIM_OUT

    return pl.pallas_call(
        _fused_kernel,
        out_shape=jax.ShapeDtypeStruct((n, d3), jnp.float32),
        grid=(KSTEPS,),
        in_specs=[
            pl.BlockSpec((c * 9, 4 * n * s), lambda k: (0, 0)),     # patches
            pl.BlockSpec((N_CONV_CH, c * 9), lambda k: (0, 0)),     # conv W
            pl.BlockSpec((N_CONV_CH, 1), lambda k: (0, 0)),         # conv b
            pl.BlockSpec((kb, d1), lambda k: (k, 0)),               # w1 stream
            pl.BlockSpec((1, d1), lambda k: (0, 0)),                # w1 scale
            pl.BlockSpec((1, d1), lambda k: (0, 0)),                # b1
            pl.BlockSpec((d1, d2), lambda k: (0, 0)),               # w2
            pl.BlockSpec((1, d2), lambda k: (0, 0)),                # b2
            pl.BlockSpec((d2, d3), lambda k: (0, 0)),               # w3
            pl.BlockSpec((1, d3), lambda k: (0, 0)),                # b3
        ],
        out_specs=pl.BlockSpec((n, d3), lambda k: (0, 0)),
        scratch_shapes=[
            pltpu.VMEM((n, feat), jnp.float32),      # flatten-ordered pooled acts
            pltpu.VMEM((n, d1), jnp.float32),        # dense accumulator
        ],
        compiler_params=pltpu.CompilerParams(
            dimension_semantics=("arbitrary",),
            vmem_limit_bytes=8 * 1024 * 1024),
    )(at, prep["wc"], prep["bc"], prep["w1"], prep["s1"], prep["b1"],
      prep["w2"], prep["b2"], prep["w3"], prep["b3"])


# ---------------------------------------------------------------------------
# One-time parameter preparation (done once, outside the hot forward path):
# layout reshapes, bf16 casts, and int8 per-output-channel quantization of the
# dominant dense weight (skipped on v7x, which has no integer MXU path and
# enough HBM bandwidth that the dequant pass would cost more than it saves).
# ---------------------------------------------------------------------------
def prepare_params(params):
    try:
        kind = jax.devices()[0].device_kind.lower().replace(" ", "")
    except Exception:
        kind = ""
    is_v7x = ("v7" in kind) or ("tpu7" in kind)

    w1 = params["w1"].astype(jnp.float32)                       # (4096, 512)
    if is_v7x:
        w1q = w1.astype(jnp.bfloat16)
        s1 = jnp.ones((1, w1.shape[1]), jnp.float32)
    else:
        amax = jnp.maximum(jnp.max(jnp.abs(w1), axis=0, keepdims=True), 1e-12)
        s1 = (amax / 127.0).astype(jnp.float32)                  # per out-chan
        w1q = jnp.clip(jnp.round(w1 / s1), -127.0, 127.0).astype(jnp.int8)

    return {
        "wc": params["w_conv"].reshape(N_CONV_CH, -1).astype(jnp.bfloat16),
        "bc": params["b_conv"].reshape(N_CONV_CH, 1).astype(jnp.float32),
        "w1": w1q,
        "s1": s1,
        "b1": params["b1"].reshape(1, -1).astype(jnp.float32),
        "w2": params["w2"].astype(jnp.bfloat16),
        "b2": params["b2"].reshape(1, -1).astype(jnp.float32),
        "w3": params["w3"].astype(jnp.bfloat16),
        "b3": params["b3"].reshape(1, -1).astype(jnp.float32),
    }


# ---------------------------------------------------------------------------
# Deterministic parameter init (shapes from the module's __init__).
# Linear weights stored transposed, i.e. (in_features, out_features).
# ---------------------------------------------------------------------------
def init_params(key):
    ks = jax.random.split(key, 8)

    def u(k, shape, fan_in):
        bound = 1.0 / np.sqrt(fan_in)
        return jax.random.uniform(k, shape, jnp.float32, -bound, bound)

    return {
        "w_conv": u(ks[0], (N_CONV_CH, CONV_DIM_IN, 3, 3), CONV_DIM_IN * 9),
        "b_conv": u(ks[1], (N_CONV_CH,), CONV_DIM_IN * 9),
        "w1": u(ks[2], (CONV_DIM_LSTM * 4, CONV_DIM_OUT * 4), CONV_DIM_LSTM * 4),
        "b1": u(ks[3], (CONV_DIM_OUT * 4,), CONV_DIM_LSTM * 4),
        "w2": u(ks[4], (CONV_DIM_OUT * 4, CONV_DIM_OUT * 2), CONV_DIM_OUT * 4),
        "b2": u(ks[5], (CONV_DIM_OUT * 2,), CONV_DIM_OUT * 4),
        "w3": u(ks[6], (CONV_DIM_OUT * 2, CONV_DIM_OUT), CONV_DIM_OUT * 2),
        "b3": u(ks[7], (CONV_DIM_OUT,), CONV_DIM_OUT * 2),
    }


# Pure-JAX f32 reference (eval mode) for the correctness check.
def reference_forward(x, p):
    y = jax.lax.conv_general_dilated(
        x, p["w_conv"], window_strides=(2, 2), padding=((1, 1), (1, 1)),
        dimension_numbers=("NCHW", "OIHW", "NCHW"),
        precision=jax.lax.Precision.HIGHEST)
    y = jnp.maximum(y + p["b_conv"][None, :, None, None], 0.0)
    y = jax.lax.reduce_window(y, -jnp.inf, jax.lax.max,
                              (1, 1, 2, 2), (1, 1, 2, 2), "VALID")
    f = y.reshape(y.shape[0], -1)
    hi = jax.lax.Precision.HIGHEST
    h = jnp.maximum(jnp.dot(f, p["w1"], precision=hi) + p["b1"], 0.0)
    h = jnp.maximum(jnp.dot(h, p["w2"], precision=hi) + p["b2"], 0.0)
    return jnp.dot(h, p["w3"], precision=hi) + p["b3"]


if __name__ == "__main__":
    key = jax.random.PRNGKey(0)
    kx, kp = jax.random.split(key)

    # N=2, C=2, H=W=64  ->  16 * (H/4) * (W/4) = 4096 = conv_dim_lstm * 4
    N, H, W = 2, 64, 64
    x = jax.random.normal(kx, (N, CONV_DIM_IN, H, W), jnp.float32)
    params = init_params(kp)
    prep = prepare_params(params)          # one-time: reshape / bf16 / int8

    out = jax.block_until_ready(classification_hybrid_forward(x, prep))
    assert out.shape == (N, CONV_DIM_OUT), out.shape

    ref = reference_forward(x, params)
    np.testing.assert_allclose(np.asarray(out), np.asarray(ref),
                               rtol=5e-2, atol=5e-2)
    print("KERNEL_OK")
</pallas_src>

<mosaic_0001>
module attributes {stable_mosaic.version = 11 : i64} {
  func.func @_fused_kernel(%arg0: i32, %arg1: memref<18x2048xbf16, #tpu.memory_space<vmem>>, %arg2: memref<16x18xbf16, #tpu.memory_space<vmem>>, %arg3: memref<16x1xf32, #tpu.memory_space<vmem>>, %arg4: memref<2048x512xi8, #tpu.memory_space<vmem>>, %arg5: memref<1x512xf32, #tpu.memory_space<vmem>>, %arg6: memref<1x512xf32, #tpu.memory_space<vmem>>, %arg7: memref<512x256xbf16, #tpu.memory_space<vmem>>, %arg8: memref<1x256xf32, #tpu.memory_space<vmem>>, %arg9: memref<256x128xbf16, #tpu.memory_space<vmem>>, %arg10: memref<1x128xf32, #tpu.memory_space<vmem>>, %arg11: memref<2x128xf32, #tpu.memory_space<vmem>>, %arg12: memref<2x4096xf32, #tpu.memory_space<vmem>>, %arg13: memref<2x512xf32, #tpu.memory_space<vmem>>) attributes {dimension_semantics = [#tpu.dimension_semantics<arbitrary>], iteration_bounds = array<i64: 2>, scalar_prefetch = 0 : i64, scratch_operands = 2 : i64, tpu.core_type = #tpu.core_type<tc>, window_params = [{pipeline_mode = #tpu.pipeline_mode<synchronous>, transform_indices = @transform_0, window_bounds = array<i64: 18, 2048>}, {pipeline_mode = #tpu.pipeline_mode<synchronous>, transform_indices = @transform_1, window_bounds = array<i64: 16, 18>}, {pipeline_mode = #tpu.pipeline_mode<synchronous>, transform_indices = @transform_2, window_bounds = array<i64: 16, 1>}, {transform_indices = @transform_3, window_bounds = array<i64: 2048, 512>}, {pipeline_mode = #tpu.pipeline_mode<synchronous>, transform_indices = @transform_4, window_bounds = array<i64: 1, 512>}, {pipeline_mode = #tpu.pipeline_mode<synchronous>, transform_indices = @transform_5, window_bounds = array<i64: 1, 512>}, {pipeline_mode = #tpu.pipeline_mode<synchronous>, transform_indices = @transform_6, window_bounds = array<i64: 512, 256>}, {pipeline_mode = #tpu.pipeline_mode<synchronous>, transform_indices = @transform_7, window_bounds = array<i64: 1, 256>}, {pipeline_mode = #tpu.pipeline_mode<synchronous>, transform_indices = @transform_8, window_bounds = array<i64: 256, 128>}, {pipeline_mode = #tpu.pipeline_mode<synchronous>, transform_indices = @transform_9, window_bounds = array<i64: 1, 128>}, {pipeline_mode = #tpu.pipeline_mode<synchronous>, transform_indices = @transform_10, window_bounds = array<i64: 2, 128>}]} {
    %c0_i32 = arith.constant 0 : i32
    %0 = arith.cmpi eq, %arg0, %c0_i32 : i32
    %1 = arith.extui %0 : i1 to i32
    %c0_i32_0 = arith.constant 0 : i32
    %2 = arith.cmpi ne, %1, %c0_i32_0 : i32
    scf.if %2 {
      %c0_8 = arith.constant 0 : index
      %c0_9 = arith.constant 0 : index
      %17 = vector.load %arg2[%c0_8, %c0_9] : memref<16x18xbf16, #tpu.memory_space<vmem>>, vector<16x18xbf16>
      %c0_10 = arith.constant 0 : index
      %c0_11 = arith.constant 0 : index
      %18 = vector.load %arg1[%c0_10, %c0_11] : memref<18x2048xbf16, #tpu.memory_space<vmem>>, vector<18x2048xbf16>
      %cst_12 = arith.constant dense<0.000000e+00> : vector<16x2048xf32>
      %19 = tpu.matmul %17, %18, %cst_12 {dimension_numbers = #tpu.dot_dimension_numbers<[1], [0], [0], [1], [0, 0, 1, 1], [], []>} : vector<16x18xbf16>, vector<18x2048xbf16>, vector<16x2048xf32> -> vector<16x2048xf32>
      %c0_13 = arith.constant 0 : index
      %c0_14 = arith.constant 0 : index
      %20 = vector.load %arg3[%c0_13, %c0_14] : memref<16x1xf32, #tpu.memory_space<vmem>>, vector<16x1xf32>
      %21 = vector.broadcast %20 : vector<16x1xf32> to vector<16x2048xf32>
      %22 = arith.addf %19, %21 : vector<16x2048xf32>
      %cst_15 = arith.constant 0.000000e+00 : f32
      %23 = vector.broadcast %cst_15 : f32 to vector<16x2048xf32>
      %24 = arith.maximumf %22, %23 : vector<16x2048xf32>
      %25 = vector.extract_strided_slice %24 {offsets = [0, 0], sizes = [16, 512], strides = [1, 1]} : vector<16x2048xf32> to vector<16x512xf32>
      %26 = vector.extract_strided_slice %24 {offsets = [0, 512], sizes = [16, 512], strides = [1, 1]} : vector<16x2048xf32> to vector<16x512xf32>
      %27 = arith.maximumf %25, %26 : vector<16x512xf32>
      %28 = vector.extract_strided_slice %24 {offsets = [0, 1024], sizes = [16, 512], strides = [1, 1]} : vector<16x2048xf32> to vector<16x512xf32>
      %29 = vector.extract_strided_slice %24 {offsets = [0, 1536], sizes = [16, 512], strides = [1, 1]} : vector<16x2048xf32> to vector<16x512xf32>
      %30 = arith.maximumf %28, %29 : vector<16x512xf32>
      %31 = arith.maximumf %27, %30 : vector<16x512xf32>
      %32 = vector.extract_strided_slice %31 {offsets = [0, 0], sizes = [1, 256], strides = [1, 1]} : vector<16x512xf32> to vector<1x256xf32>
      %c0_16 = arith.constant 0 : index
      %c0_17 = arith.constant 0 : index
      %33 = vector.load %arg12[%c0_16, %c0_17] : memref<2x4096xf32, #tpu.memory_space<vmem>>, vector<1x256xf32>
      tpu.vector_store %arg12[%c0_16, %c0_17], %32 {strides = array<i32>} : memref<2x4096xf32, #tpu.memory_space<vmem>>, vector<1x256xf32>,
      %34 = vector.extract_strided_slice %31 {offsets = [0, 256], sizes = [1, 256], strides = [1, 1]} : vector<16x512xf32> to vector<1x256xf32>
      %c1 = arith.constant 1 : index
      %c0_18 = arith.constant 0 : index
      %35 = vector.load %arg12[%c1, %c0_18] : memref<2x4096xf32, #tpu.memory_space<vmem>>, vector<1x256xf32>
      tpu.vector_store %arg12[%c1, %c0_18], %34 {strides = array<i32>} : memref<2x4096xf32, #tpu.memory_space<vmem>>, vector<1x256xf32>,
      %36 = vector.extract_strided_slice %31 {offsets = [1, 0], sizes = [1, 256], strides = [1, 1]} : vector<16x512xf32> to vector<1x256xf32>
      %c0_19 = arith.constant 0 : index
      %c256 = arith.constant 256 : index
      %37 = vector.load %arg12[%c0_19, %c256] : memref<2x4096xf32, #tpu.memory_space<vmem>>, vector<1x256xf32>
      tpu.vector_store %arg12[%c0_19, %c256], %36 {strides = array<i32>} : memref<2x4096xf32, #tpu.memory_space<vmem>>, vector<1x256xf32>,
      %38 = vector.extract_strided_slice %31 {offsets = [1, 256], sizes = [1, 256], strides = [1, 1]} : vector<16x512xf32> to vector<1x256xf32>
      %c1_20 = arith.constant 1 : index
      %c256_21 = arith.constant 256 : index
      %39 = vector.load %arg12[%c1_20, %c256_21] : memref<2x4096xf32, #tpu.memory_space<vmem>>, vector<1x256xf32>
      tpu.vector_store %arg12[%c1_20, %c256_21], %38 {strides = array<i32>} : memref<2x4096xf32, #tpu.memory_space<vmem>>, vector<1x256xf32>,
      %40 = vector.extract_strided_slice %31 {offsets = [2, 0], sizes = [1, 256], strides = [1, 1]} : vector<16x512xf32> to vector<1x256xf32>
      %c0_22 = arith.constant 0 : index
      %c512 = arith.constant 512 : index
      %41 = vector.load %arg12[%c0_22, %c512] : memref<2x4096xf32, #tpu.memory_space<vmem>>, vector<1x256xf32>
      tpu.vector_store %arg12[%c0_22, %c512], %40 {strides = array<i32>} : memref<2x4096xf32, #tpu.memory_space<vmem>>, vector<1x256xf32>,
      %42 = vector.extract_strided_slice %31 {offsets = [2, 256], sizes = [1, 256], strides = [1, 1]} : vector<16x512xf32> to vector<1x256xf32>
      %c1_23 = arith.constant 1 : index
      %c512_24 = arith.constant 512 : index
      %43 = vector.load %arg12[%c1_23, %c512_24] : memref<2x4096xf32, #tpu.memory_space<vmem>>, vector<1x256xf32>
      tpu.vector_store %arg12[%c1_23, %c512_24], %42 {strides = array<i32>} : memref<2x4096xf32, #tpu.memory_space<vmem>>, vector<1x256xf32>,
      %44 = vector.extract_strided_slice %31 {offsets = [3, 0], sizes = [1, 256], strides = [1, 1]} : vector<16x512xf32> to vector<1x256xf32>
      %c0_25 = arith.constant 0 : index
      %c768 = arith.constant 768 : index
      %45 = vector.load %arg12[%c0_25, %c768] : memref<2x4096xf32, #tpu.memory_space<vmem>>, vector<1x256xf32>
      tpu.vector_store %arg12[%c0_25, %c768], %44 {strides = array<i32>} : memref<2x4096xf32, #tpu.memory_space<vmem>>, vector<1x256xf32>,
      %46 = vector.extract_strided_slice %31 {offsets = [3, 256], sizes = [1, 256], strides = [1, 1]} : vector<16x512xf32> to vector<1x256xf32>
      %c1_26 = arith.constant 1 : index
      %c768_27 = arith.constant 768 : index
      %47 = vector.load %arg12[%c1_26, %c768_27] : memref<2x4096xf32, #tpu.memory_space<vmem>>, vector<1x256xf32>
      tpu.vector_store %arg12[%c1_26, %c768_27], %46 {strides = array<i32>} : memref<2x4096xf32, #tpu.memory_space<vmem>>, vector<1x256xf32>,
      %48 = vector.extract_strided_slice %31 {offsets = [4, 0], sizes = [1, 256], strides = [1, 1]} : vector<16x512xf32> to vector<1x256xf32>
      %c0_28 = arith.constant 0 : index
      %c1024 = arith.constant 1024 : index
      %49 = vector.load %arg12[%c0_28, %c1024] : memref<2x4096xf32, #tpu.memory_space<vmem>>, vector<1x256xf32>
      tpu.vector_store %arg12[%c0_28, %c1024], %48 {strides = array<i32>} : memref<2x4096xf32, #tpu.memory_space<vmem>>, vector<1x256xf32>,
      %50 = vector.extract_strided_slice %31 {offsets = [4, 256], sizes = [1, 256], strides = [1, 1]} : vector<16x512xf32> to vector<1x256xf32>
      %c1_29 = arith.constant 1 : index
      %c1024_30 = arith.constant 1024 : index
      %51 = vector.load %arg12[%c1_29, %c1024_30] : memref<2x4096xf32, #tpu.memory_space<vmem>>, vector<1x256xf32>
      tpu.vector_store %arg12[%c1_29, %c1024_30], %50 {strides = array<i32>} : memref<2x4096xf32, #tpu.memory_space<vmem>>, vector<1x256xf32>,
      %52 = vector.extract_strided_slice %31 {offsets = [5, 0], sizes = [1, 256], strides = [1, 1]} : vector<16x512xf32> to vector<1x256xf32>
      %c0_31 = arith.constant 0 : index
      %c1280 = arith.constant 1280 : index
      %53 = vector.load %arg12[%c0_31, %c1280] : memref<2x4096xf32, #tpu.memory_space<vmem>>, vector<1x256xf32>
      tpu.vector_store %arg12[%c0_31, %c1280], %52 {strides = array<i32>} : memref<2x4096xf32, #tpu.memory_space<vmem>>, vector<1x256xf32>,
      %54 = vector.extract_strided_slice %31 {offsets = [5, 256], sizes = [1, 256], strides = [1, 1]} : vector<16x512xf32> to vector<1x256xf32>
      %c1_32 = arith.constant 1 : index
      %c1280_33 = arith.constant 1280 : index
      %55 = vector.load %arg12[%c1_32, %c1280_33] : memref<2x4096xf32, #tpu.memory_space<vmem>>, vector<1x256xf32>
      tpu.vector_store %arg12[%c1_32, %c1280_33], %54 {strides = array<i32>} : memref<2x4096xf32, #tpu.memory_space<vmem>>, vector<1x256xf32>,
      %56 = vector.extract_strided_slice %31 {offsets = [6, 0], sizes = [1, 256], strides = [1, 1]} : vector<16x512xf32> to vector<1x256xf32>
      %c0_34 = arith.constant 0 : index
      %c1536 = arith.constant 1536 : index
      %57 = vector.load %arg12[%c0_34, %c1536] : memref<2x4096xf32, #tpu.memory_space<vmem>>, vector<1x256xf32>
      tpu.vector_store %arg12[%c0_34, %c1536], %56 {strides = array<i32>} : memref<2x4096xf32, #tpu.memory_space<vmem>>, vector<1x256xf32>,
      %58 = vector.extract_strided_slice %31 {offsets = [6, 256], sizes = [1, 256], strides = [1, 1]} : vector<16x512xf32> to vector<1x256xf32>
      %c1_35 = arith.constant 1 : index
      %c1536_36 = arith.constant 1536 : index
      %59 = vector.load %arg12[%c1_35, %c1536_36] : memref<2x4096xf32, #tpu.memory_space<vmem>>, vector<1x256xf32>
      tpu.vector_store %arg12[%c1_35, %c1536_36], %58 {strides = array<i32>} : memref<2x4096xf32, #tpu.memory_space<vmem>>, vector<1x256xf32>,
      %60 = vector.extract_strided_slice %31 {offsets = [7, 0], sizes = [1, 256], strides = [1, 1]} : vector<16x512xf32> to vector<1x256xf32>
      %c0_37 = arith.constant 0 : index
      %c1792 = arith.constant 1792 : index
      %61 = vector.load %arg12[%c0_37, %c1792] : memref<2x4096xf32, #tpu.memory_space<vmem>>, vector<1x256xf32>
      tpu.vector_store %arg12[%c0_37, %c1792], %60 {strides = array<i32>} : memref<2x4096xf32, #tpu.memory_space<vmem>>, vector<1x256xf32>,
      %62 = vector.extract_strided_slice %31 {offsets = [7, 256], sizes = [1, 256], strides = [1, 1]} : vector<16x512xf32> to vector<1x256xf32>
      %c1_38 = arith.constant 1 : index
      %c1792_39 = arith.constant 1792 : index
      %63 = vector.load %arg12[%c1_38, %c1792_39] : memref<2x4096xf32, #tpu.memory_space<vmem>>, vector<1x256xf32>
      tpu.vector_store %arg12[%c1_38, %c1792_39], %62 {strides = array<i32>} : memref<2x4096xf32, #tpu.memory_space<vmem>>, vector<1x256xf32>,
      %64 = vector.extract_strided_slice %31 {offsets = [8, 0], sizes = [1, 256], strides = [1, 1]} : vector<16x512xf32> to vector<1x256xf32>
      %c0_40 = arith.constant 0 : index
      %c2048 = arith.constant 2048 : index
      %65 = vector.load %arg12[%c0_40, %c2048] : memref<2x4096xf32, #tpu.memory_space<vmem>>, vector<1x256xf32>
      tpu.vector_store %arg12[%c0_40, %c2048], %64 {strides = array<i32>} : memref<2x4096xf32, #tpu.memory_space<vmem>>, vector<1x256xf32>,
      %66 = vector.extract_strided_slice %31 {offsets = [8, 256], sizes = [1, 256], strides = [1, 1]} : vector<16x512xf32> to vector<1x256xf32>
      %c1_41 = arith.constant 1 : index
      %c2048_42 = arith.constant 2048 : index
      %67 = vector.load %arg12[%c1_41, %c2048_42] : memref<2x4096xf32, #tpu.memory_space<vmem>>, vector<1x256xf32>
      tpu.vector_store %arg12[%c1_41, %c2048_42], %66 {strides = array<i32>} : memref<2x4096xf32, #tpu.memory_space<vmem>>, vector<1x256xf32>,
      %68 = vector.extract_strided_slice %31 {offsets = [9, 0], sizes = [1, 256], strides = [1, 1]} : vector<16x512xf32> to vector<1x256xf32>
      %c0_43 = arith.constant 0 : index
      %c2304 = arith.constant 2304 : index
      %69 = vector.load %arg12[%c0_43, %c2304] : memref<2x4096xf32, #tpu.memory_space<vmem>>, vector<1x256xf32>
      tpu.vector_store %arg12[%c0_43, %c2304], %68 {strides = array<i32>} : memref<2x4096xf32, #tpu.memory_space<vmem>>, vector<1x256xf32>,
      %70 = vector.extract_strided_slice %31 {offsets = [9, 256], sizes = [1, 256], strides = [1, 1]} : vector<16x512xf32> to vector<1x256xf32>
      %c1_44 = arith.constant 1 : index
      %c2304_45 = arith.constant 2304 : index
      %71 = vector.load %arg12[%c1_44, %c2304_45] : memref<2x4096xf32, #tpu.memory_space<vmem>>, vector<1x256xf32>
      tpu.vector_store %arg12[%c1_44, %c2304_45], %70 {strides = array<i32>} : memref<2x4096xf32, #tpu.memory_space<vmem>>, vector<1x256xf32>,
      %72 = vector.extract_strided_slice %31 {offsets = [10, 0], sizes = [1, 256], strides = [1, 1]} : vector<16x512xf32> to vector<1x256xf32>
      %c0_46 = arith.constant 0 : index
      %c2560 = arith.constant 2560 : index
      %73 = vector.load %arg12[%c0_46, %c2560] : memref<2x4096xf32, #tpu.memory_space<vmem>>, vector<1x256xf32>
      tpu.vector_store %arg12[%c0_46, %c2560], %72 {strides = array<i32>} : memref<2x4096xf32, #tpu.memory_space<vmem>>, vector<1x256xf32>,
      %74 = vector.extract_strided_slice %31 {offsets = [10, 256], sizes = [1, 256], strides = [1, 1]} : vector<16x512xf32> to vector<1x256xf32>
      %c1_47 = arith.constant 1 : index
      %c2560_48 = arith.constant 2560 : index
      %75 = vector.load %arg12[%c1_47, %c2560_48] : memref<2x4096xf32, #tpu.memory_space<vmem>>, vector<1x256xf32>
      tpu.vector_store %arg12[%c1_47, %c2560_48], %74 {strides = array<i32>} : memref<2x4096xf32, #tpu.memory_space<vmem>>, vector<1x256xf32>,
      %76 = vector.extract_strided_slice %31 {offsets = [11, 0], sizes = [1, 256], strides = [1, 1]} : vector<16x512xf32> to vector<1x256xf32>
      %c0_49 = arith.constant 0 : index
      %c2816 = arith.constant 2816 : index
      %77 = vector.load %arg12[%c0_49, %c2816] : memref<2x4096xf32, #tpu.memory_space<vmem>>, vector<1x256xf32>
      tpu.vector_store %arg12[%c0_49, %c2816], %76 {strides = array<i32>} : memref<2x4096xf32, #tpu.memory_space<vmem>>, vector<1x256xf32>,
      %78 = vector.extract_strided_slice %31 {offsets = [11, 256], sizes = [1, 256], strides = [1, 1]} : vector<16x512xf32> to vector<1x256xf32>
      %c1_50 = arith.constant 1 : index
      %c2816_51 = arith.constant 2816 : index
      %79 = vector.load %arg12[%c1_50, %c2816_51] : memref<2x4096xf32, #tpu.memory_space<vmem>>, vector<1x256xf32>
      tpu.vector_store %arg12[%c1_50, %c2816_51], %78 {strides = array<i32>} : memref<2x4096xf32, #tpu.memory_space<vmem>>, vector<1x256xf32>,
      %80 = vector.extract_strided_slice %31 {offsets = [12, 0], sizes = [1, 256], strides = [1, 1]} : vector<16x512xf32> to vector<1x256xf32>
      %c0_52 = arith.constant 0 : index
      %c3072 = arith.constant 3072 : index
      %81 = vector.load %arg12[%c0_52, %c3072] : memref<2x4096xf32, #tpu.memory_space<vmem>>, vector<1x256xf32>
      tpu.vector_store %arg12[%c0_52, %c3072], %80 {strides = array<i32>} : memref<2x4096xf32, #tpu.memory_space<vmem>>, vector<1x256xf32>,
      %82 = vector.extract_strided_slice %31 {offsets = [12, 256], sizes = [1, 256], strides = [1, 1]} : vector<16x512xf32> to vector<1x256xf32>
      %c1_53 = arith.constant 1 : index
      %c3072_54 = arith.constant 3072 : index
      %83 = vector.load %arg12[%c1_53, %c3072_54] : memref<2x4096xf32, #tpu.memory_space<vmem>>, vector<1x256xf32>
      tpu.vector_store %arg12[%c1_53, %c3072_54], %82 {strides = array<i32>} : memref<2x4096xf32, #tpu.memory_space<vmem>>, vector<1x256xf32>,
      %84 = vector.extract_strided_slice %31 {offsets = [13, 0], sizes = [1, 256], strides = [1, 1]} : vector<16x512xf32> to vector<1x256xf32>
      %c0_55 = arith.constant 0 : index
      %c3328 = arith.constant 3328 : index
      %85 = vector.load %arg12[%c0_55, %c3328] : memref<2x4096xf32, #tpu.memory_space<vmem>>, vector<1x256xf32>
      tpu.vector_store %arg12[%c0_55, %c3328], %84 {strides = array<i32>} : memref<2x4096xf32, #tpu.memory_space<vmem>>, vector<1x256xf32>,
      %86 = vector.extract_strided_slice %31 {offsets = [13, 256], sizes = [1, 256], strides = [1, 1]} : vector<16x512xf32> to vector<1x256xf32>
      %c1_56 = arith.constant 1 : index
      %c3328_57 = arith.constant 3328 : index
      %87 = vector.load %arg12[%c1_56, %c3328_57] : memref<2x4096xf32, #tpu.memory_space<vmem>>, vector<1x256xf32>
      tpu.vector_store %arg12[%c1_56, %c3328_57], %86 {strides = array<i32>} : memref<2x4096xf32, #tpu.memory_space<vmem>>, vector<1x256xf32>,
      %88 = vector.extract_strided_slice %31 {offsets = [14, 0], sizes = [1, 256], strides = [1, 1]} : vector<16x512xf32> to vector<1x256xf32>
      %c0_58 = arith.constant 0 : index
      %c3584 = arith.constant 3584 : index
      %89 = vector.load %arg12[%c0_58, %c3584] : memref<2x4096xf32, #tpu.memory_space<vmem>>, vector<1x256xf32>
      tpu.vector_store %arg12[%c0_58, %c3584], %88 {strides = array<i32>} : memref<2x4096xf32, #tpu.memory_space<vmem>>, vector<1x256xf32>,
      %90 = vector.extract_strided_slice %31 {offsets = [14, 256], sizes = [1, 256], strides = [1, 1]} : vector<16x512xf32> to vector<1x256xf32>
      %c1_59 = arith.constant 1 : index
      %c3584_60 = arith.constant 3584 : index
      %91 = vector.load %arg12[%c1_59, %c3584_60] : memref<2x4096xf32, #tpu.memory_space<vmem>>, vector<1x256xf32>
      tpu.vector_store %arg12[%c1_59, %c3584_60], %90 {strides = array<i32>} : memref<2x4096xf32, #tpu.memory_space<vmem>>, vector<1x256xf32>,
      %92 = vector.extract_strided_slice %31 {offsets = [15, 0], sizes = [1, 256], strides = [1, 1]} : vector<16x512xf32> to vector<1x256xf32>
      %c0_61 = arith.constant 0 : index
      %c3840 = arith.constant 3840 : index
      %93 = vector.load %arg12[%c0_61, %c3840] : memref<2x4096xf32, #tpu.memory_space<vmem>>, vector<1x256xf32>
      tpu.vector_store %arg12[%c0_61, %c3840], %92 {strides = array<i32>} : memref<2x4096xf32, #tpu.memory_space<vmem>>, vector<1x256xf32>,
      %94 = vector.extract_strided_slice %31 {offsets = [15, 256], sizes = [1, 256], strides = [1, 1]} : vector<16x512xf32> to vector<1x256xf32>
      %c1_62 = arith.constant 1 : index
      %c3840_63 = arith.constant 3840 : index
      %95 = vector.load %arg12[%c1_62, %c3840_63] : memref<2x4096xf32, #tpu.memory_space<vmem>>, vector<1x256xf32>
      tpu.vector_store %arg12[%c1_62, %c3840_63], %94 {strides = array<i32>} : memref<2x4096xf32, #tpu.memory_space<vmem>>, vector<1x256xf32>,
      %cst_64 = arith.constant 0.000000e+00 : f32
      %96 = vector.broadcast %cst_64 : f32 to vector<2x512xf32>
      %c0_65 = arith.constant 0 : index
      %c0_66 = arith.constant 0 : index
      %97 = vector.load %arg13[%c0_65, %c0_66] : memref<2x512xf32, #tpu.memory_space<vmem>>, vector<2x512xf32>
      tpu.vector_store %arg13[%c0_65, %c0_66], %96 {strides = array<i32>} : memref<2x512xf32, #tpu.memory_space<vmem>>, vector<2x512xf32>,
    } else {
    }
    %c2048_i32 = arith.constant 2048 : i32
    %3 = arith.muli %arg0, %c2048_i32 : i32
    %4 = tpu.assume_multiple %3, 2048 : i32
    %c0 = arith.constant 0 : index
    %5 = arith.index_cast %4 : i32 to index
    %6 = vector.load %arg12[%c0, %5] : memref<2x4096xf32, #tpu.memory_space<vmem>>, vector<2x2048xf32>
    %7 = arith.truncf %6 : vector<2x2048xf32> to vector<2x2048xbf16>
    %c0_1 = arith.constant 0 : index
    %c0_2 = arith.constant 0 : index
    %8 = vector.load %arg4[%c0_1, %c0_2] : memref<2048x512xi8, #tpu.memory_space<vmem>>, vector<2048x512xi8>
    %9 = arith.sitofp %8 : vector<2048x512xi8> to vector<2048x512xbf16>
    %c0_3 = arith.constant 0 : index
    %c0_4 = arith.constant 0 : index
    %10 = vector.load %arg13[%c0_3, %c0_4] : memref<2x512xf32, #tpu.memory_space<vmem>>, vector<2x512xf32>
    %cst = arith.constant dense<0.000000e+00> : vector<2x512xf32>
    %11 = tpu.matmul %7, %9, %cst {dimension_numbers = #tpu.dot_dimension_numbers<[1], [0], [0], [1], [0, 0, 1, 1], [], []>} : vector<2x2048xbf16>, vector<2048x512xbf16>, vector<2x512xf32> -> vector<2x512xf32>
    %12 = arith.addf %10, %11 : vector<2x512xf32>
    %c0_5 = arith.constant 0 : index
    %c0_6 = arith.constant 0 : index
    %13 = vector.load %arg13[%c0_5, %c0_6] : memref<2x512xf32, #tpu.memory_space<vmem>>, vector<2x512xf32>
    tpu.vector_store %arg13[%c0_5, %c0_6], %12 {strides = array<i32>} : memref<2x512xf32, #tpu.memory_space<vmem>>, vector<2x512xf32>,
    %c1_i32 = arith.constant 1 : i32
    %14 = arith.cmpi eq, %arg0, %c1_i32 : i32
    %15 = arith.extui %14 : i1 to i32
    %c0_i32_7 = arith.constant 0 : i32
    %16 = arith.cmpi ne, %15, %c0_i32_7 : i32
    scf.if %16 {
      %c0_8 = arith.constant 0 : index
      %c0_9 = arith.constant 0 : index
      %17 = vector.load %arg13[%c0_8, %c0_9] : memref<2x512xf32, #tpu.memory_space<vmem>>, vector<2x512xf32>
      %c0_10 = arith.constant 0 : index
      %c0_11 = arith.constant 0 : index
      %18 = vector.load %arg5[%c0_10, %c0_11] : memref<1x512xf32, #tpu.memory_space<vmem>>, vector<1x512xf32>
      %19 = vector.broadcast %18 : vector<1x512xf32> to vector<2x512xf32>
      %20 = arith.mulf %17, %19 : vector<2x512xf32>
      %c0_12 = arith.constant 0 : index
      %c0_13 = arith.constant 0 : index
      %21 = vector.load %arg6[%c0_12, %c0_13] : memref<1x512xf32, #tpu.memory_space<vmem>>, vector<1x512xf32>
      %22 = vector.broadcast %21 : vector<1x512xf32> to vector<2x512xf32>
      %23 = arith.addf %20, %22 : vector<2x512xf32>
      %cst_14 = arith.constant 0.000000e+00 : f32
      %24 = vector.broadcast %cst_14 : f32 to vector<2x512xf32>
      %25 = arith.maximumf %23, %24 : vector<2x512xf32>
      %26 = arith.truncf %25 : vector<2x512xf32> to vector<2x512xbf16>
      %c0_15 = arith.constant 0 : index
      %c0_16 = arith.constant 0 : index
      %27 = vector.load %arg7[%c0_15, %c0_16] : memref<512x256xbf16, #tpu.memory_space<vmem>>, vector<512x256xbf16>
      %cst_17 = arith.constant dense<0.000000e+00> : vector<2x256xf32>
      %28 = tpu.matmul %26, %27, %cst_17 {dimension_numbers = #tpu.dot_dimension_numbers<[1], [0], [0], [1], [0, 0, 1, 1], [], []>} : vector<2x512xbf16>, vector<512x256xbf16>, vector<2x256xf32> -> vector<2x256xf32>
      %c0_18 = arith.constant 0 : index
      %c0_19 = arith.constant 0 : index
      %29 = vector.load %arg8[%c0_18, %c0_19] : memref<1x256xf32, #tpu.memory_space<vmem>>, vector<1x256xf32>
      %30 = vector.broadcast %29 : vector<1x256xf32> to vector<2x256xf32>
      %31 = arith.addf %28, %30 : vector<2x256xf32>
      %cst_20 = arith.constant 0.000000e+00 : f32
      %32 = vector.broadcast %cst_20 : f32 to vector<2x256xf32>
      %33 = arith.maximumf %31, %32 : vector<2x256xf32>
      %34 = arith.truncf %33 : vector<2x256xf32> to vector<2x256xbf16>
      %c0_21 = arith.constant 0 : index
      %c0_22 = arith.constant 0 : index
      %35 = vector.load %arg9[%c0_21, %c0_22] : memref<256x128xbf16, #tpu.memory_space<vmem>>, vector<256x128xbf16>
      %cst_23 = arith.constant dense<0.000000e+00> : vector<2x128xf32>
      %36 = tpu.matmul %34, %35, %cst_23 {dimension_numbers = #tpu.dot_dimension_numbers<[1], [0], [0], [1], [0, 0, 1, 1], [], []>} : vector<2x256xbf16>, vector<256x128xbf16>, vector<2x128xf32> -> vector<2x128xf32>
      %c0_24 = arith.constant 0 : index
      %c0_25 = arith.constant 0 : index
      %37 = vector.load %arg10[%c0_24, %c0_25] : memref<1x128xf32, #tpu.memory_space<vmem>>, vector<1x128xf32>
      %38 = vector.broadcast %37 : vector<1x128xf32> to vector<2x128xf32>
      %39 = arith.addf %36, %38 : vector<2x128xf32>
      %c0_26 = arith.constant 0 : index
      %c0_27 = arith.constant 0 : index
      %40 = vector.load %arg11[%c0_26, %c0_27] : memref<2x128xf32, #tpu.memory_space<vmem>>, vector<2x128xf32>
      tpu.vector_store %arg11[%c0_26, %c0_27], %39 {strides = array<i32>} : memref<2x128xf32, #tpu.memory_space<vmem>>, vector<2x128xf32>,
    } else {
    }
    return
  }
  func.func @transform_0(%arg0: i32) -> (i32, i32) {
    %c0_i32 = arith.constant 0 : i32
    %c0_i32_0 = arith.constant 0 : i32
    %c0_i32_1 = arith.constant 0 : i32
    return %c0_i32, %c0_i32_0 : i32, i32
  }
  func.func @transform_1(%arg0: i32) -> (i32, i32) {
    %c0_i32 = arith.constant 0 : i32
    %c0_i32_0 = arith.constant 0 : i32
    %c0_i32_1 = arith.constant 0 : i32
    return %c0_i32, %c0_i32_0 : i32, i32
  }
  func.func @transform_2(%arg0: i32) -> (i32, i32) {
    %c0_i32 = arith.constant 0 : i32
    %c0_i32_0 = arith.constant 0 : i32
    %c0_i32_1 = arith.constant 0 : i32
    return %c0_i32, %c0_i32_0 : i32, i32
  }
  func.func @transform_3(%arg0: i32) -> (i32, i32) {
    %c0_i32 = arith.constant 0 : i32
    %c0_i32_0 = arith.constant 0 : i32
    return %arg0, %c0_i32 : i32, i32
  }
  func.func @transform_4(%arg0: i32) -> (i32, i32) {
    %c0_i32 = arith.constant 0 : i32
    %c0_i32_0 = arith.constant 0 : i32
    %c0_i32_1 = arith.constant 0 : i32
    return %c0_i32, %c0_i32_0 : i32, i32
  }
  func.func @transform_5(%arg0: i32) -> (i32, i32) {
    %c0_i32 = arith.constant 0 : i32
    %c0_i32_0 = arith.constant 0 : i32
    %c0_i32_1 = arith.constant 0 : i32
    return %c0_i32, %c0_i32_0 : i32, i32
  }
  func.func @transform_6(%arg0: i32) -> (i32, i32) {
    %c0_i32 = arith.constant 0 : i32
    %c0_i32_0 = arith.constant 0 : i32
    %c0_i32_1 = arith.constant 0 : i32
    return %c0_i32, %c0_i32_0 : i32, i32
  }
  func.func @transform_7(%arg0: i32) -> (i32, i32) {
    %c0_i32 = arith.constant 0 : i32
    %c0_i32_0 = arith.constant 0 : i32
    %c0_i32_1 = arith.constant 0 : i32
    return %c0_i32, %c0_i32_0 : i32, i32
  }
  func.func @transform_8(%arg0: i32) -> (i32, i32) {
    %c0_i32 = arith.constant 0 : i32
    %c0_i32_0 = arith.constant 0 : i32
    %c0_i32_1 = arith.constant 0 : i32
    return %c0_i32, %c0_i32_0 : i32, i32
  }
  func.func @transform_9(%arg0: i32) -> (i32, i32) {
    %c0_i32 = arith.constant 0 : i32
    %c0_i32_0 = arith.constant 0 : i32
    %c0_i32_1 = arith.constant 0 : i32
    return %c0_i32, %c0_i32_0 : i32, i32
  }
  func.func @transform_10(%arg0: i32) -> (i32, i32) {
    %c0_i32 = arith.constant 0 : i32
    %c0_i32_0 = arith.constant 0 : i32
    %c0_i32_1 = arith.constant 0 : i32
    return %c0_i32, %c0_i32_0 : i32, i32
  }
}

</mosaic_0001>

<bundles_post_ra>
// kernel: classification_hybrid_forward.1
= control target key start
LH: loop header
LB: loop body
LE: loop exit
PB: predicated region body
PF: predicated region fallthrough
CT: control target
= control target key end

     0   :  { %15 = vsyncpa [#allocation5], 0  ;;  %s4133_s13 = smov 0   ;;  %s5078_s0 = inlined_call_operand.vmem [shape: bf16[18,2048], index: 0, kind: input, shape index: {}]   ;;  %s5079_s1 = inlined_call_operand.vmem [shape: bf16[16,18], index: 1, kind: input, shape index: {}]   ;;  %s5080_s2 = inlined_call_operand.vmem [shape: f32[16,1], index: 2, kind: input, shape index: {}]   ;;  %s5081_s3 = inlined_call_operand.vmem [shape: s8[4096,512], index: 3, kind: input, shape index: {}]   ;;  %s5082_s4 = inlined_call_operand.vmem [shape: f32[1,512], index: 4, kind: input, shape index: {}]   ;;  %s5083_s5 = inlined_call_operand.vmem [shape: f32[1,512], index: 5, kind: input, shape index: {}]   ;;  %s5084_s6 = inlined_call_operand.vmem [shape: bf16[512,256], index: 6, kind: input, shape index: {}]   ;;  %s5085_s7 = inlined_call_operand.vmem [shape: f32[1,256], index: 7, kind: input, shape index: {}]   ;;  %s5086_s8 = inlined_call_operand.vmem [shape: bf16[256,128], index: 8, kind: input, shape index: {}]   ;;  %s5087_s9 = inlined_call_operand.vmem [shape: f32[1,128], index: 9, kind: input, shape index: {}]   ;;  %s5088_s10 = inlined_call_operand.hbm [shape: f32[2,128], index: 10, kind: output, shape index: {}]  }
   0x1 LB: > { %s4139_s14 = sadd.s32 4294967295, %s4071_s13   ;;  %p3657_p0 = scmp.ge.s32.totalorder %s4071_s13, 1  ;;  %s4071_s13 = sphi %s4133_s13, %s21_s13  }
   0x2   : > { %p310_p1 = scmp.lt.s32.totalorder %s4071_s13, 3 }
   0x4   : > { %p311_p2 = pnand %p3657_p0, %p310_p1 }
   0x5   : > { %s3658_s15 = sshll.u32 (!%p311_p2), %s4139_s14, 6  ;;  %p3661_p4 = scmp.ne.s32.totalorder (!%p311_p2), %s4139_s14, 0 }
   0x6   : > { %314 = sbr.rel (%p311_p2) target bundleno = 1515 (0x5eb), region = 60  ;;  %p345_p3 = scmp.lt.s32.totalorder (!%p311_p2), %s3658_s15, 127 }
   0xd   : > { %s5092_s15 = smov (!%p345_p3, %s3658_s15), 127  ;;  %355 = sbr.rel (%p3661_p4) target bundleno = 293 (0x125), region = 64 }
   0xe   : > { %s3799_s16 = sshll.u32 %s5092_s15, 5  ;;  %v358_v0 = vld [vmem:[%s5078_s0] sm:$0xff] (!%p3661_p4)  ;;  %v359_v2 = vld [vmem:[%s5078_s0 + $0x8] sm:$0xff] (!%p3661_p4)  ;;  %vm523_vm0 = vcmask (!%p3661_p4), 1040384   ;;  %v4073_v8 = vmov (!%p3661_p4), 0   ;;  %v360_v15 = vld [vmem:[%s5078_s0 + $0x10] sm:$0xff] (!%p3661_p4) }
   0xf   : > { %s4147_s19 = scalar_lea.vmem %s5081_s3, %s3799_s16  ;;  %v366_v1 = vld [vmem:[%s5078_s0 + $0x40] sm:$0xff] (!%p3661_p4)  ;;  %v367_v4 = vld [vmem:[%s5078_s0 + $0x48] sm:$0xff] (!%p3661_p4)  ;;  %604 = vmatprep.mubr.bf16.mxu0 (!%p3661_p4), %v4073_v8  ;;  %647 = vmatprep.mubr.bf16.mxu1 (!%p3661_p4), %v4073_v8  ;;  %v368_v16 = vld [vmem:[%s5078_s0 + $0x50] sm:$0xff] (!%p3661_p4)  ;;  %vm519_vm1 = vcmask (!%p3661_p4), 146432  }
  0x10   : > { %v3664_v3 = vcombine.high (!%p3661_p4), %v358_v0, %v366_v1  ;;  %v3663_v5 = vcombine.low (!%p3661_p4), %v358_v0, %v366_v1  ;;  %v374_v6 = vld [vmem:[%s5078_s0 + $0x80] sm:$0x11] (!%p3661_p4)  ;;  %v375_v7 = vld [vmem:[%s5078_s0 + $0x88] sm:$0x11] (!%p3661_p4)  ;;  %v3666_v9 = vcombine.high (!%p3661_p4), %v359_v2, %v367_v4  ;;  %v3665_v10 = vcombine.low (!%p3661_p4), %v359_v2, %v367_v4  ;;  %3901 = vset.pattern.permute.xlu0 (!%p3661_p4), %v4073_v8  ;;  %v361_v17 = vld [vmem:[%s5078_s0 + $0x18] sm:$0xff] (!%p3661_p4) }
  0x11   : > { %v3680_v11 = vcombine.high (!%p3661_p4), %v374_v6, %v374_v6  ;;  %v3682_v12 = vcombine.high (!%p3661_p4), %v375_v7, %v375_v7  ;;  %v3679_v13 = vcombine.low (!%p3661_p4), %v374_v6, %v374_v6  ;;  %v3681_v14 = vcombine.low (!%p3661_p4), %v375_v7, %v375_v7  ;;  %v369_v18 = vld [vmem:[%s5078_s0 + $0x58] sm:$0xff] (!%p3661_p4)  ;;  %v376_v23 = vld [vmem:[%s5078_s0 + $0x90] sm:$0x11] (!%p3661_p4)  ;;  %v4193_v24 = vld [vmem:[%s5079_s1] sm:$0xff] (!%p3661_p4)  }
  0x12   : > { %572 = vmatprep.subr.bf16.mxu0 (!%p3661_p4), %v3664_v3  ;;  %615 = vmatprep.subr.bf16.mxu1 (!%p3661_p4), %v3666_v9  ;;  %v3668_v20 = vcombine.high (!%p3661_p4), %v360_v15, %v368_v16  ;;  %v3670_v22 = vcombine.high (!%p3661_p4), %v361_v17, %v369_v18  ;;  %v377_v25 = vld [vmem:[%s5078_s0 + $0x98] sm:$0x11] (!%p3661_p4)  ;;  %v3667_v26 = vcombine.low (!%p3661_p4), %v360_v15, %v368_v16  ;;  %v382_v27 = vld [vmem:[%s5080_s2] sm:$0xff] (!%p3661_p4)  ;;  %v363_v35 = vld [vmem:[%s5078_s0 + $0x28] sm:$0xff] (!%p3661_p4)  ;;  %v4074_v4 = vmov (!%p3661_p4), 0.0  }
  0x13   : > { %573 = vmatpush1.bf16.msra.mxu0 (!%p3661_p4), %v3663_v5  ;;  %616 = vmatpush1.bf16.msra.mxu1 (!%p3661_p4), %v3665_v10  ;;  %v525_v19 = vsel (!%p3661_p4), %vm523_vm0, %v3679_v13, 0  ;;  %v531_v21 = vsel (!%p3661_p4), %vm523_vm0, %v3681_v14, 0  ;;  %v3669_v28 = vcombine.low (!%p3661_p4), %v361_v17, %v369_v18  ;;  %v3684_v29 = vcombine.high (!%p3661_p4), %v376_v23, %v376_v23  ;;  %v362_v33 = vld [vmem:[%s5078_s0 + $0x20] sm:$0xff] (!%p3661_p4)  ;;  %v371_v36 = vld [vmem:[%s5078_s0 + $0x68] sm:$0xff] (!%p3661_p4)  ;;  %v364_v50 = vld [vmem:[%s5078_s0 + $0x30] sm:$0xff] (!%p3661_p4)  ;;  %1279 = vst [vmem:[#allocation3] sm:$0xff] (!%p3661_p4), %v4074_v4 }
  0x14   : > { %3695 = vmatprep.subr.msk.bf16.mxu0 %vm523_vm0, %v3680_v11  ;;  %3697 = vmatprep.subr.msk.bf16.mxu1 %vm523_vm0, %v3682_v12  ;;  %v3683_v30 = vcombine.low %v376_v23, %v376_v23  ;;  %v3686_v31 = vcombine.high %v377_v25, %v377_v25  ;;  %v3685_v32 = vcombine.low %v377_v25, %v377_v25  ;;  %v370_v34 = vld [vmem:[%s5078_s0 + $0x60] sm:$0xff]  ;;  %v383_v37 = vld [vmem:[%s5080_s2 + $0x8] sm:$0xff]  ;;  %v372_v51 = vld [vmem:[%s5078_s0 + $0x70] sm:$0xff] }
  0x15   : > { %386 = vperm.xlu0 %3901, %v382_v27   ;;  %v3672_v39 = vcombine.high %v362_v33, %v370_v34  ;;  %v3674_v41 = vcombine.high %v363_v35, %v371_v36  ;;  %v378_v42 = vld [vmem:[%s5078_s0 + $0xa0] sm:$0x11]  ;;  %v379_v43 = vld [vmem:[%s5078_s0 + $0xa8] sm:$0x11]  ;;  %v3671_v44 = vcombine.low %v362_v33, %v370_v34  ;;  %v3673_v45 = vcombine.low %v363_v35, %v371_v36  ;;  %v365_v52 = vld [vmem:[%s5078_s0 + $0x38] sm:$0xff] }
  0x16   : > { %v537_v38 = vsel %vm523_vm0, %v3683_v30, 0  ;;  %v543_v40 = vsel %vm523_vm0, %v3685_v32, 0  ;;  %v3688_v46 = vcombine.high %v378_v42, %v378_v42  ;;  %v3687_v47 = vcombine.low %v378_v42, %v378_v42  ;;  %v373_v53 = vld [vmem:[%s5078_s0 + $0x78] sm:$0xff]  ;;  %v380_v58 = vld [vmem:[%s5078_s0 + $0xb0] sm:$0x11] }
  0x17   : > { %575 = vmatpush1.bf16.msra.mxu0 %v525_v19  ;;  %618 = vmatpush1.bf16.msra.mxu1 %v531_v21  ;;  %v3690_v48 = vcombine.high %v379_v43, %v379_v43  ;;  %v3689_v49 = vcombine.low %v379_v43, %v379_v43  ;;  %v3676_v55 = vcombine.high %v364_v50, %v372_v51  ;;  %v381_v59 = vld [vmem:[%s5078_s0 + $0xb8] sm:$0x11] }
  0x18   : > { %658 = vmatprep.subr.bf16.mxu0 %v3668_v20  ;;  %701 = vmatprep.subr.bf16.mxu1 %v3670_v22  ;;  %v549_v54 = vsel %vm523_vm0, %v3687_v47, 0  ;;  %v3678_v57 = vcombine.high %v365_v52, %v373_v53  ;;  %v3675_v60 = vcombine.low %v364_v50, %v372_v51  ;;  %v3677_v61 = vcombine.low %v365_v52, %v373_v53 }
  0x19   : > { %391 = vperm.xlu0 %3901, %v383_v37   ;;  %v555_v56 = vsel %vm523_vm0, %v3689_v49, 0  ;;  %v3692_v62 = vcombine.high %v380_v58, %v380_v58  ;;  %v3691_v63 = vcombine.low %v380_v58, %v380_v58  ;;  %v3694_v0 = vcombine.high %v381_v59, %v381_v59 }
  0x1a   : > { %3696 = vmatmul.mubr.msk.bf16.vlgmr.msra.gmra.mrb[0].mxu0 %vm519_vm1, %v4193_v24  ;;  %3698 = vmatmul.mubr.msk.bf16.vlgmr.msra.gmra.mrb[0].mxu1 %vm519_vm1, %v4193_v24  ;;  %v3693_v1 = vcombine.low %v381_v59, %v381_v59 }
  0x1b   : > { %659 = vmatpush1.bf16.msra.mxu0 %v3667_v26  ;;  %702 = vmatpush1.bf16.msra.mxu1 %v3669_v28  ;;  %v561_v2 = vsel %vm523_vm0, %v3691_v63, 0  ;;  %v4075_v63 = vmov 1966171168  }
  0x1c   : > { %3699 = vmatprep.subr.msk.bf16.mxu0 %vm523_vm0, %v3684_v29  ;;  %3701 = vmatprep.subr.msk.bf16.mxu1 %vm523_vm0, %v3686_v31  ;;  %v567_v3 = vsel %vm523_vm0, %v3693_v1, 0  ;;  %v978_v1 = vlaneseq }
  0x1d   : > { %690 = vmatprep.mubr.bf16.mxu0 %v4073_v8  ;;  %733 = vmatprep.mubr.bf16.mxu1 %v4073_v8 }
  0x1e   : > { %vm4337_vm2 = vcmp.lt.s32.totalorder %v978_v1, 256 }
  0x1f   : > { %661 = vmatpush1.bf16.msra.mxu0 %v537_v38  ;;  %704 = vmatpush1.bf16.msra.mxu1 %v543_v40 }
  0x20   : > { %744 = vmatprep.subr.bf16.mxu0 %v3672_v39  ;;  %787 = vmatprep.subr.bf16.mxu1 %v3674_v41 }
  0x22   : > { %3700 = vmatmul.mubr.msk.bf16.vlgmr.msra.gmra.mrb[4].mxu0 %vm519_vm1, %v4193_v24  ;;  %3702 = vmatmul.mubr.msk.bf16.vlgmr.msra.gmra.mrb[4].mxu1 %vm519_vm1, %v4193_v24 }
  0x23   : > { %745 = vmatpush1.bf16.msra.mxu0 %v3671_v44  ;;  %788 = vmatpush1.bf16.msra.mxu1 %v3673_v45 }
  0x24   : > { %3703 = vmatprep.subr.msk.bf16.mxu0 %vm523_vm0, %v3688_v46  ;;  %3705 = vmatprep.subr.msk.bf16.mxu1 %vm523_vm0, %v3690_v48 }
  0x25   : > { %776 = vmatprep.mubr.bf16.mxu0 %v4073_v8  ;;  %819 = vmatprep.mubr.bf16.mxu1 %v4073_v8 }
  0x27   : > { %747 = vmatpush1.bf16.msra.mxu0 %v549_v54  ;;  %790 = vmatpush1.bf16.msra.mxu1 %v555_v56 }
  0x28   : > { %830 = vmatprep.subr.bf16.mxu0 %v3676_v55  ;;  %873 = vmatprep.subr.bf16.mxu1 %v3678_v57 }
  0x2a   : > { %3704 = vmatmul.mubr.msk.bf16.vlgmr.msra.gmra.mrb[8].mxu0 %vm519_vm1, %v4193_v24  ;;  %3706 = vmatmul.mubr.msk.bf16.vlgmr.msra.gmra.mrb[8].mxu1 %vm519_vm1, %v4193_v24 }
  0x2b   : > { %831 = vmatpush1.bf16.msra.mxu0 %v3675_v60  ;;  %874 = vmatpush1.bf16.msra.mxu1 %v3677_v61 }
  0x2c   : > { %3707 = vmatprep.subr.msk.bf16.mxu0 %vm523_vm0, %v3692_v62  ;;  %3709 = vmatprep.subr.msk.bf16.mxu1 %vm523_vm0, %v3694_v0  ;;  %v976_v0 = vunpack.c.l.s4 %v4075_v63 }
  0x2d   : > { %862 = vmatprep.mubr.bf16.mxu0 %v4073_v8  ;;  %905 = vmatprep.mubr.bf16.mxu1 %v4073_v8 }
  0x2f   : > { %833 = vmatpush1.bf16.msra.mxu0 %v561_v2  ;;  %876 = vmatpush1.bf16.msra.mxu1 %v567_v3 }
  0x32   : > { %3708 = vmatmul.mubr.msk.bf16.vlgmr.msra.gmra.mrb[12].mxu0 %vm519_vm1, %v4193_v24  ;;  %3710 = vmatmul.mubr.msk.bf16.vlgmr.msra.gmra.mrb[12].mxu1 %vm519_vm1, %v4193_v24 }
  0x94   : > { %v4274_v5 = vpop.permute.xlu0 %386 }
  0x98   : > { %v4276_v7 = vpop.permute.xlu0 %391 }
  0xed   : > { %v606_v6 = vpop.f32.mrb[0].mxu0  ;;  %v649_v9 = vpop.f32.mrb[0].mxu1 }
  0xee   : > { %v608_v10 = vpop.f32.mrb[1].mxu0  ;;  %v651_v11 = vpop.f32.mrb[1].mxu1  ;;  %v607_v14 = vadd.f32 %v606_v6, %v4274_v5  ;;  %v650_v15 = vadd.f32 %v649_v9, %v4274_v5 }
  0xef   : > { %v610_v12 = vpop.f32.mrb[2].mxu0  ;;  %v653_v8 = vpop.f32.mrb[2].mxu1  ;;  %v609_v17 = vadd.f32 %v608_v10, %v4274_v5  ;;  %v652_v18 = vadd.f32 %v651_v11, %v4274_v5 }
  0xf0   : > { %v612_v13 = vpop.f32.mrb[3].mxu0  ;;  %v655_v16 = vpop.f32.mrb[3].mxu1  ;;  %v611_v19 = vadd.f32 %v610_v12, %v4276_v7  ;;  %v654_v20 = vadd.f32 %v653_v8, %v4276_v7  ;;  %v916_v22 = vmax.f32 %v607_v14, 0.0  ;;  %v918_v23 = vmax.f32 %v650_v15, 0.0 }
  0xf1   : > { %v613_v21 = vadd.f32 %v612_v13, %v4276_v7  ;;  %v917_v25 = vmax.f32 %v609_v17, 0.0  ;;  %v919_v26 = vmax.f32 %v652_v18, 0.0  ;;  %v656_v32 = vadd.f32 %v655_v16, %v4276_v7 }
  0xf2   : > { %v932_v27 = vmax.f32 %v611_v19, 0.0  ;;  %v934_v31 = vmax.f32 %v654_v20, 0.0  ;;  %v977_v14 = vunpack.c.0.s8 %v976_v0  ;;  %v979_v15 = vshrl.u32 %v978_v1, 7 }
  0xf3   : > { %v933_v37 = vmax.f32 %v613_v21, 0.0  ;;  %v935_v56 = vmax.f32 %v656_v32, 0.0 }
  0xf5   : > { %v692_v24 = vpop.f32.mrb[4].mxu0  ;;  %v735_v29 = vpop.f32.mrb[4].mxu1 }
  0xf6   : > { %v693_v28 = vadd.f32 %v692_v24, %v4274_v5  ;;  %v694_v30 = vpop.f32.mrb[5].mxu0  ;;  %v736_v33 = vadd.f32 %v735_v29, %v4274_v5  ;;  %v737_v35 = vpop.f32.mrb[5].mxu1 }
  0xf7   : > { %v695_v34 = vadd.f32 %v694_v30, %v4274_v5  ;;  %v696_v36 = vpop.f32.mrb[6].mxu0  ;;  %v738_v39 = vadd.f32 %v737_v35, %v4274_v5  ;;  %v739_v41 = vpop.f32.mrb[6].mxu1 }
  0xf8   : > { %v920_v38 = vmax.f32 %v693_v28, 0.0  ;;  %v697_v40 = vadd.f32 %v696_v36, %v4276_v7  ;;  %v698_v42 = vpop.f32.mrb[7].mxu0  ;;  %v922_v43 = vmax.f32 %v736_v33, 0.0  ;;  %v740_v45 = vadd.f32 %v739_v41, %v4276_v7  ;;  %v741_v47 = vpop.f32.mrb[7].mxu1 }
  0xf9   : > { %v921_v44 = vmax.f32 %v695_v34, 0.0  ;;  %v699_v46 = vadd.f32 %v698_v42, %v4276_v7  ;;  %v923_v49 = vmax.f32 %v738_v39, 0.0  ;;  %v742_v51 = vadd.f32 %v741_v47, %v4276_v7 }
  0xfa   : > { %v4293_v48 = vmax.f32 %v916_v22, %v920_v38  ;;  %v936_v50 = vmax.f32 %v697_v40, 0.0  ;;  %v4296_v52 = vmax.f32 %v918_v23, %v922_v43  ;;  %v938_v54 = vmax.f32 %v740_v45, 0.0 }
  0xfb   : > { %v4298_v53 = vmax.f32 %v917_v25, %v921_v44  ;;  %v937_v55 = vmax.f32 %v699_v46, 0.0  ;;  %v4300_v57 = vmax.f32 %v919_v26, %v923_v49  ;;  %v939_v59 = vmax.f32 %v742_v51, 0.0 }
  0xfc   : > { %v4302_v58 = vmax.f32 %v932_v27, %v936_v50  ;;  %v4304_v60 = vmax.f32 %v934_v31, %v938_v54  ;;  %v4319_v25 = vsub.s32 %v977_v14, %v979_v15 }
  0xfd   : > { %v4306_v61 = vmax.f32 %v933_v37, %v937_v55  ;;  %v778_v62 = vpop.f32.mrb[8].mxu0  ;;  %v4308_v2 = vmax.f32 %v935_v56, %v939_v59  ;;  %v821_v3 = vpop.f32.mrb[8].mxu1 }
  0xfe   : > { %v780_v4 = vpop.f32.mrb[9].mxu0  ;;  %v823_v6 = vpop.f32.mrb[9].mxu1  ;;  %v779_v12 = vadd.f32 %v778_v62, %v4274_v5  ;;  %v822_v8 = vadd.f32 %v821_v3, %v4274_v5 }
  0xff   : > { %v782_v9 = vpop.f32.mrb[10].mxu0  ;;  %v825_v10 = vpop.f32.mrb[10].mxu1  ;;  %v781_v16 = vadd.f32 %v780_v4, %v4274_v5  ;;  %v824_v17 = vadd.f32 %v823_v6, %v4274_v5 }
 0x100   : > { %v784_v11 = vpop.f32.mrb[11].mxu0  ;;  %v827_v13 = vpop.f32.mrb[11].mxu1  ;;  %v783_v18 = vadd.f32 %v782_v9, %v4276_v7  ;;  %v826_v19 = vadd.f32 %v825_v10, %v4276_v7  ;;  %v924_v22 = vmax.f32 %v779_v12, 0.0  ;;  %v926_v23 = vmax.f32 %v822_v8, 0.0 }
 0x101   : > { %v785_v20 = vadd.f32 %v784_v11, %v4276_v7  ;;  %v828_v21 = vadd.f32 %v827_v13, %v4276_v7  ;;  %v925_v26 = vmax.f32 %v781_v16, 0.0  ;;  %v927_v27 = vmax.f32 %v824_v17, 0.0 }
 0x102   : > { %v940_v28 = vmax.f32 %v783_v18, 0.0  ;;  %v942_v32 = vmax.f32 %v826_v19, 0.0 }
 0x103   : > { %v941_v33 = vmax.f32 %v785_v20, 0.0  ;;  %v943_v38 = vmax.f32 %v828_v21, 0.0 }
 0x105   : > { %v864_v24 = vpop.f32.mrb[12].mxu0  ;;  %v907_v30 = vpop.f32.mrb[12].mxu1 }
 0x106   : > { %v865_v29 = vadd.f32 %v864_v24, %v4274_v5  ;;  %v866_v31 = vpop.f32.mrb[13].mxu0  ;;  %v908_v34 = vadd.f32 %v907_v30, %v4274_v5  ;;  %v909_v36 = vpop.f32.mrb[13].mxu1 }
 0x107   : > { %v867_v35 = vadd.f32 %v866_v31, %v4274_v5  ;;  %v868_v37 = vpop.f32.mrb[14].mxu0  ;;  %v910_v40 = vadd.f32 %v909_v36, %v4274_v5  ;;  %v911_v42 = vpop.f32.mrb[14].mxu1 }
 0x108   : > { %v928_v39 = vmax.f32 %v865_v29, 0.0  ;;  %v869_v41 = vadd.f32 %v868_v37, %v4276_v7  ;;  %v870_v43 = vpop.f32.mrb[15].mxu0  ;;  %v930_v44 = vmax.f32 %v908_v34, 0.0  ;;  %v912_v46 = vadd.f32 %v911_v42, %v4276_v7  ;;  %v913_v49 = vpop.f32.mrb[15].mxu1 }
 0x109   : > { %v929_v45 = vmax.f32 %v867_v35, 0.0  ;;  %v871_v47 = vadd.f32 %v870_v43, %v4276_v7  ;;  %v931_v51 = vmax.f32 %v910_v40, 0.0  ;;  %v914_v55 = vadd.f32 %v913_v49, %v4276_v7 }
 0x10a   : > { %v956_v50 = vmax.f32 %v924_v22, %v928_v39  ;;  %v944_v54 = vmax.f32 %v869_v41, 0.0  ;;  %v958_v56 = vmax.f32 %v926_v23, %v930_v44  ;;  %v946_v62 = vmax.f32 %v912_v46, 0.0 }
 0x10b   : > { %v957_v59 = vmax.f32 %v925_v26, %v929_v45  ;;  %v945_v5 = vmax.f32 %v871_v47, 0.0  ;;  %v959_v0 = vmax.f32 %v927_v27, %v931_v51  ;;  %v947_v4 = vmax.f32 %v914_v55, 0.0 }
 0x10c   : > { %v964_v63 = vmax.f32 %v4293_v48, %v956_v50  ;;  %v960_v3 = vmax.f32 %v940_v28, %v944_v54  ;;  %v966_v6 = vmax.f32 %v4296_v52, %v958_v56  ;;  %v962_v10 = vmax.f32 %v942_v32, %v946_v62 }
 0x10d   : > { %v965_v9 = vmax.f32 %v4298_v53, %v957_v59  ;;  %v961_v11 = vmax.f32 %v941_v33, %v945_v5  ;;  %v967_v12 = vmax.f32 %v4300_v57, %v959_v0  ;;  %v963_v7 = vmax.f32 %v943_v38, %v947_v4 }
 0x10e   : > { %v968_v8 = vmax.f32 %v4302_v58, %v960_v3  ;;  %v970_v15 = vmax.f32 %v4304_v60, %v962_v10 }
 0x10f   : > { %v974_v13 = vcombine.low %v964_v63, %v965_v9  ;;  %v1053_v14 = vcombine.high %v964_v63, %v965_v9  ;;  %v969_v48 = vmax.f32 %v4306_v61, %v961_v11  ;;  %v997_v52 = vcombine.low %v966_v6, %v967_v12 }
 0x110   : > { %v1071_v53 = vcombine.high %v966_v6, %v967_v12  ;;  %v971_v17 = vmax.f32 %v4308_v2, %v963_v7 }
 0x111   : > { %v981_v57 = vrot.slane %v974_v13, %v4319_v25  ;;  %v1060_v58 = vrot.slane %v1053_v14, %v4319_v25  ;;  %v1129_v18 = vcombine.low %v968_v8, %v969_v48  ;;  %v1205_v19 = vcombine.high %v968_v8, %v969_v48 }
 0x112   : > { %v1004_v20 = vrot.slane %v997_v52, %v4319_v25  ;;  %v1078_v60 = vrot.slane %v1071_v53, %v4319_v25  ;;  %v1149_v61 = vcombine.low %v970_v15, %v971_v17  ;;  %v1223_v21 = vcombine.high %v970_v15, %v971_v17 }
 0x113   : > { %v988_v1 = vrot.slane %v981_v57, %v4319_v25  ;;  %v1015_v22 = vcombine.high %v981_v57, %v981_v57  ;;  %v1067_v23 = vrot.slane %v1060_v58, %v4319_v25  ;;  %v1089_v24 = vcombine.high %v1060_v58, %v1060_v58 }
 0x114   : > { %v1011_v2 = vrot.slane %v1004_v20, %v4319_v25  ;;  %v1026_v26 = vcombine.high %v1004_v20, %v1004_v20  ;;  %v1085_v27 = vrot.slane %v1078_v60, %v4319_v25  ;;  %v1100_v28 = vcombine.high %v1078_v60, %v1078_v60 }
 0x115   : > { %994 = vst.msk [vmem:[#allocation2] ss:$2 sm:$0x3] %vm4337_vm2, %v988_v1  ;;  %v1022_v29 = vrot.slane %v1015_v22, %v4319_v25  ;;  %v1037_v30 = vcombine.high %v988_v1, %v988_v1  ;;  %1070 = vst.msk [vmem:[#allocation2 + $0x10] ss:$2 sm:$0x3] %vm4337_vm2, %v1067_v23  ;;  %v1096_v31 = vrot.slane %v1089_v24, %v4319_v25 }
 0x116   : > { %v1111_v32 = vcombine.high %v1067_v23, %v1067_v23  ;;  %1014 = vst.msk [vmem:[#allocation2 + $0x1] ss:$2 sm:$0x3] %vm4337_vm2, %v1011_v2  ;;  %v1033_v33 = vrot.slane %v1026_v26, %v4319_v25  ;;  %v1041_v34 = vcombine.high %v1011_v2, %v1011_v2  ;;  %1088 = vst.msk [vmem:[#allocation2 + $0x11] ss:$2 sm:$0x3] %vm4337_vm2, %v1085_v27 }
 0x117   : > { %v1107_v35 = vrot.slane %v1100_v28, %v4319_v25  ;;  %v1115_v36 = vcombine.high %v1085_v27, %v1085_v27  ;;  %1025 = vst.msk [vmem:[#allocation2 + $0x4] ss:$2 sm:$0x3] %vm4337_vm2, %v1022_v29  ;;  %1040 = vst.msk [vmem:[#allocation2 + $0x8] ss:$2 sm:$0x3] %vm4337_vm2, %v1037_v30  ;;  %v1045_v37 = vcombine.high %v1022_v29, %v1022_v29 }
 0x118   : > { %1099 = vst.msk [vmem:[#allocation2 + $0x14] ss:$2 sm:$0x3] %vm4337_vm2, %v1096_v31  ;;  %1114 = vst.msk [vmem:[#allocation2 + $0x18] ss:$2 sm:$0x3] %vm4337_vm2, %v1111_v32  ;;  %v1119_v38 = vcombine.high %v1096_v31, %v1096_v31  ;;  %v1136_v39 = vrot.slane %v1129_v18, %v4319_v25  ;;  %v1212_v40 = vrot.slane %v1205_v19, %v4319_v25 }
 0x119   : > { %1036 = vst.msk [vmem:[#allocation2 + $0x5] ss:$2 sm:$0x3] %vm4337_vm2, %v1033_v33  ;;  %1044 = vst.msk [vmem:[#allocation2 + $0x9] ss:$2 sm:$0x3] %vm4337_vm2, %v1041_v34  ;;  %v1049_v41 = vcombine.high %v1033_v33, %v1033_v33  ;;  %v1123_v42 = vcombine.high %v1107_v35, %v1107_v35  ;;  %v1156_v43 = vrot.slane %v1149_v61, %v4319_v25 }
 0x11a   : > { %1110 = vst.msk [vmem:[#allocation2 + $0x15] ss:$2 sm:$0x3] %vm4337_vm2, %v1107_v35  ;;  %1118 = vst.msk [vmem:[#allocation2 + $0x19] ss:$2 sm:$0x3] %vm4337_vm2, %v1115_v36  ;;  %v1230_v44 = vrot.slane %v1223_v21, %v4319_v25  ;;  %v1143_v45 = vrot.slane %v1136_v39, %v4319_v25  ;;  %v1167_v46 = vcombine.high %v1136_v39, %v1136_v39 }
 0x11b   : > { %1048 = vst.msk [vmem:[#allocation2 + $0xc] ss:$2 sm:$0x3] %vm4337_vm2, %v1045_v37  ;;  %1122 = vst.msk [vmem:[#allocation2 + $0x1c] ss:$2 sm:$0x3] %vm4337_vm2, %v1119_v38  ;;  %v1219_v47 = vrot.slane %v1212_v40, %v4319_v25  ;;  %v1241_v49 = vcombine.high %v1212_v40, %v1212_v40  ;;  %v1163_v50 = vrot.slane %v1156_v43, %v4319_v25 }
 0x11c   : > { %1052 = vst.msk [vmem:[#allocation2 + $0xd] ss:$2 sm:$0x3] %vm4337_vm2, %v1049_v41  ;;  %1126 = vst.msk [vmem:[#allocation2 + $0x1d] ss:$2 sm:$0x3] %vm4337_vm2, %v1123_v42  ;;  %v1178_v51 = vcombine.high %v1156_v43, %v1156_v43  ;;  %v1237_v54 = vrot.slane %v1230_v44, %v4319_v25  ;;  %v1252_v55 = vcombine.high %v1230_v44, %v1230_v44 }
 0x11d   : > { %1146 = vst.msk [vmem:[#allocation2 + $0x20] ss:$2 sm:$0x3] %vm4337_vm2, %v1143_v45  ;;  %v1174_v56 = vrot.slane %v1167_v46, %v4319_v25  ;;  %v1189_v59 = vcombine.high %v1143_v45, %v1143_v45  ;;  %1222 = vst.msk [vmem:[#allocation2 + $0x30] ss:$2 sm:$0x3] %vm4337_vm2, %v1219_v47  ;;  %v1248_v62 = vrot.slane %v1241_v49, %v4319_v25 }
 0x11e   : > { %v1263_v5 = vcombine.high %v1219_v47, %v1219_v47  ;;  %1166 = vst.msk [vmem:[#allocation2 + $0x21] ss:$2 sm:$0x3] %vm4337_vm2, %v1163_v50  ;;  %v1185_v63 = vrot.slane %v1178_v51, %v4319_v25  ;;  %v1193_v0 = vcombine.high %v1163_v50, %v1163_v50  ;;  %1240 = vst.msk [vmem:[#allocation2 + $0x31] ss:$2 sm:$0x3] %vm4337_vm2, %v1237_v54 }
 0x11f   : > { %v1259_v3 = vrot.slane %v1252_v55, %v4319_v25  ;;  %v1267_v4 = vcombine.high %v1237_v54, %v1237_v54  ;;  %1177 = vst.msk [vmem:[#allocation2 + $0x24] ss:$2 sm:$0x3] %vm4337_vm2, %v1174_v56  ;;  %1192 = vst.msk [vmem:[#allocation2 + $0x28] ss:$2 sm:$0x3] %vm4337_vm2, %v1189_v59  ;;  %v1197_v6 = vcombine.high %v1174_v56, %v1174_v56 }
 0x120   : > { %1251 = vst.msk [vmem:[#allocation2 + $0x34] ss:$2 sm:$0x3] %vm4337_vm2, %v1248_v62  ;;  %1266 = vst.msk [vmem:[#allocation2 + $0x38] ss:$2 sm:$0x3] %vm4337_vm2, %v1263_v5  ;;  %v1271_v9 = vcombine.high %v1248_v62, %v1248_v62  ;;  %v1201_v25 = vcombine.high %v1185_v63, %v1185_v63 }
 0x121   : > { %1188 = vst.msk [vmem:[#allocation2 + $0x25] ss:$2 sm:$0x3] %vm4337_vm2, %v1185_v63  ;;  %1196 = vst.msk [vmem:[#allocation2 + $0x29] ss:$2 sm:$0x3] %vm4337_vm2, %v1193_v0  ;;  %v1275_v10 = vcombine.high %v1259_v3, %v1259_v3 }
 0x122   : > { %1262 = vst.msk [vmem:[#allocation2 + $0x35] ss:$2 sm:$0x3] %vm4337_vm2, %v1259_v3  ;;  %1270 = vst.msk [vmem:[#allocation2 + $0x39] ss:$2 sm:$0x3] %vm4337_vm2, %v1267_v4 }
 0x123   : > { %1200 = vst.msk [vmem:[#allocation2 + $0x2c] ss:$2 sm:$0x3] %vm4337_vm2, %v1197_v6  ;;  %1274 = vst.msk [vmem:[#allocation2 + $0x3c] ss:$2 sm:$0x3] %vm4337_vm2, %v1271_v9 }
 0x124   : > { %1204 = vst.msk [vmem:[#allocation2 + $0x2d] ss:$2 sm:$0x3] %vm4337_vm2, %v1201_v25  ;;  %1278 = vst.msk [vmem:[#allocation2 + $0x3d] ss:$2 sm:$0x3] %vm4337_vm2, %v1275_v10 }
 0x125 PF: > { %v1394_v11 = vld [vmem:[%s4147_s19 + $0x8] sm:$0xff]  ;;  %v1396_v12 = vld [vmem:[%s4147_s19 + $0x18] sm:$0xff]  ;;  %v1393_v8 = vld [vmem:[%s4147_s19] sm:$0xff]  ;;  %s3711_s23 = sshll.u32 %s4139_s14, 11  ;;  %v1297_v31 = vlaneseq  ;;  %v4076_v36 = vmov 1983009808  }
 0x126   : > { %v1650_v7 = vunpack.c.l.s8.bf16 %v1394_v11  ;;  %v1654_v13 = vunpack.c.h.s8.bf16 %v1394_v11  ;;  %v1652_v14 = vunpack.c.l.s8.bf16 %v1396_v12  ;;  %v1656_v15 = vunpack.c.h.s8.bf16 %v1396_v12  ;;  %v1395_v48 = vld [vmem:[%s4147_s19 + $0x10] sm:$0xff]  ;;  %v1398_v53 = vld [vmem:[%s4147_s19 + $0x28] sm:$0xff]  ;;  %v1400_v17 = vld [vmem:[%s4147_s19 + $0x38] sm:$0xff]  ;;  %s4441_s24 = sshra.s32 %s3711_s23, 7  ;;  %p3713_p5 = scmp.ne.s32.totalorder %s4139_s14, 1 }
 0x127   : > { %v1649_v52 = vunpack.c.l.s8.bf16 %v1393_v8  ;;  %v1651_v16 = vunpack.c.l.s8.bf16 %v1395_v48  ;;  %v1653_v57 = vunpack.c.h.s8.bf16 %v1393_v8  ;;  %v1655_v58 = vunpack.c.h.s8.bf16 %v1395_v48  ;;  %v1397_v20 = vld [vmem:[%s4147_s19 + $0x20] sm:$0xff]  ;;  %v1399_v60 = vld [vmem:[%s4147_s19 + $0x30] sm:$0xff]  ;;  %v1402_v23 = vld [vmem:[%s4147_s19 + $0x48] sm:$0xff]  ;;  %s3712_s25 = sshll.u32 %s4441_s24, 1 }
 0x128   : > { %2162 = vmatprep.subr.bf16.mxu0 %v1650_v7  ;;  %2490 = vmatprep.subr.bf16.mxu1 %v1652_v14  ;;  %v1658_v18 = vunpack.c.l.s8.bf16 %v1398_v53  ;;  %v1660_v19 = vunpack.c.l.s8.bf16 %v1400_v17  ;;  %v1657_v61 = vunpack.c.l.s8.bf16 %v1397_v20  ;;  %v1659_v21 = vunpack.c.l.s8.bf16 %v1399_v60  ;;  %v1404_v24 = vld [vmem:[%s4147_s19 + $0x58] sm:$0xff]  ;;  %v1401_v29 = vld [vmem:[%s4147_s19 + $0x40] sm:$0xff]  ;;  %v1403_v30 = vld [vmem:[%s4147_s19 + $0x50] sm:$0xff]  ;;  %s4450_s26 = scalar_lea.vmem [#allocation2], %s3712_s25 }
 0x129   : > { %2163 = vmatpush1.bf16.msra.mxu0 %v1649_v52  ;;  %2491 = vmatpush1.bf16.msra.mxu1 %v1651_v16  ;;  %v1662_v1 = vunpack.c.h.s8.bf16 %v1398_v53  ;;  %v1664_v22 = vunpack.c.h.s8.bf16 %v1400_v17  ;;  %v1661_v2 = vunpack.c.h.s8.bf16 %v1397_v20  ;;  %v1663_v26 = vunpack.c.h.s8.bf16 %v1399_v60  ;;  %v1406_v39 = vld [vmem:[%s4147_s19 + $0x68] sm:$0xff]  ;;  %v1408_v40 = vld [vmem:[%s4147_s19 + $0x78] sm:$0xff]  ;;  %v1405_v47 = vld [vmem:[%s4147_s19 + $0x60] sm:$0xff] }
 0x12a   : > { %2164 = vmatprep.subr.bf16.mxu0 %v1654_v13  ;;  %2492 = vmatprep.subr.bf16.mxu1 %v1656_v15  ;;  %v1666_v27 = vunpack.c.l.s8.bf16 %v1402_v23  ;;  %v1668_v28 = vunpack.c.l.s8.bf16 %v1404_v24  ;;  %v1665_v32 = vunpack.c.l.s8.bf16 %v1401_v29  ;;  %v1667_v33 = vunpack.c.l.s8.bf16 %v1403_v30  ;;  %v1407_v49 = vld [vmem:[%s4147_s19 + $0x70] sm:$0xff]  ;;  %v1410_v5 = vld [vmem:[%s4147_s19 + $0x88] sm:$0xff]  ;;  %v1412_v63 = vld [vmem:[%s4147_s19 + $0x98] sm:$0xff] }
 0x12b   : > { %v1670_v34 = vunpack.c.h.s8.bf16 %v1402_v23  ;;  %v1672_v35 = vunpack.c.h.s8.bf16 %v1404_v24  ;;  %v1295_v37 = vunpack.c.l.s4 %v4076_v36  ;;  %v4446_v38 = vshrl.u32 %v1297_v31, 7  ;;  %v4453_v44 = vld [vmem:[%s4450_s26] sm:$0xff]  ;;  %v1411_v10 = vld [vmem:[%s4147_s19 + $0x90] sm:$0xff]  ;;  %v1414_v13 = vld [vmem:[%s4147_s19 + $0xa8] sm:$0xff] }
 0x12c   : > { %v1669_v42 = vunpack.c.h.s8.bf16 %v1401_v29  ;;  %v1671_v43 = vunpack.c.h.s8.bf16 %v1403_v30  ;;  %v1674_v45 = vunpack.c.l.s8.bf16 %v1406_v39  ;;  %v1676_v46 = vunpack.c.l.s8.bf16 %v1408_v40  ;;  %v1409_v25 = vld [vmem:[%s4147_s19 + $0x80] sm:$0xff]  ;;  %v1416_v14 = vld [vmem:[%s4147_s19 + $0xb8] sm:$0xff]  ;;  %v1415_v17 = vld [vmem:[%s4147_s19 + $0xb0] sm:$0xff] }
 0x12d   : > { %2165 = vmatpush1.bf16.msra.mxu0 %v1653_v57  ;;  %2493 = vmatpush1.bf16.msra.mxu1 %v1655_v58  ;;  %v1296_v41 = vunpack.c.0.s8 %v1295_v37  ;;  %v1673_v54 = vunpack.c.l.s8.bf16 %v1405_v47  ;;  %v1675_v55 = vunpack.c.l.s8.bf16 %v1407_v49  ;;  %v1678_v56 = vunpack.c.h.s8.bf16 %v1406_v39  ;;  %v1413_v53 = vld [vmem:[%s4147_s19 + $0xa0] sm:$0xff]  ;;  %v1418_v20 = vld [vmem:[%s4147_s19 + $0xc8] sm:$0xff]  ;;  %v1420_v60 = vld [vmem:[%s4147_s19 + $0xd8] sm:$0xff] }
 0x12e   : > { %2166 = vmatprep.subr.bf16.mxu0 %v1658_v18  ;;  %2494 = vmatprep.subr.bf16.mxu1 %v1660_v19  ;;  %v1680_v59 = vunpack.c.h.s8.bf16 %v1408_v40  ;;  %v1677_v3 = vunpack.c.h.s8.bf16 %v1405_v47  ;;  %v1679_v4 = vunpack.c.h.s8.bf16 %v1407_v49  ;;  %v1682_v6 = vunpack.c.l.s8.bf16 %v1410_v5  ;;  %v1417_v23 = vld [vmem:[%s4147_s19 + $0xc0] sm:$0xff]  ;;  %v1419_v24 = vld [vmem:[%s4147_s19 + $0xd0] sm:$0xff]  ;;  %v1422_v29 = vld [vmem:[%s4147_s19 + $0xe8] sm:$0xff] }
 0x12f   : > { %v4458_v50 = vsub.s32 %v1296_v41, %v4446_v38  ;;  %v1684_v9 = vunpack.c.l.s8.bf16 %v1412_v63  ;;  %v1681_v11 = vunpack.c.l.s8.bf16 %v1409_v25  ;;  %v1683_v12 = vunpack.c.l.s8.bf16 %v1411_v10  ;;  %v1424_v30 = vld [vmem:[%s4147_s19 + $0xf8] sm:$0xff]  ;;  %v1423_v36 = vld [vmem:[%s4147_s19 + $0xf0] sm:$0xff] }
 0x130   : > { %v1686_v8 = vunpack.c.h.s8.bf16 %v1410_v5  ;;  %v1688_v7 = vunpack.c.h.s8.bf16 %v1412_v63  ;;  %v1685_v15 = vunpack.c.h.s8.bf16 %v1409_v25  ;;  %v1687_v48 = vunpack.c.h.s8.bf16 %v1411_v10 }
 0x131   : > { %2167 = vmatpush1.bf16.msra.mxu0 %v1657_v61  ;;  %2495 = vmatpush1.bf16.msra.mxu1 %v1659_v21  ;;  %v4462_v51 = vrot.slane %v4453_v44, %v4458_v50  ;;  %v1690_v52 = vunpack.c.l.s8.bf16 %v1414_v13  ;;  %v1692_v16 = vunpack.c.l.s8.bf16 %v1416_v14  ;;  %v1689_v57 = vunpack.c.l.s8.bf16 %v1413_v53 }
 0x132   : > { %2168 = vmatprep.subr.bf16.mxu0 %v1662_v1  ;;  %2496 = vmatprep.subr.bf16.mxu1 %v1664_v22  ;;  %v1691_v58 = vunpack.c.l.s8.bf16 %v1415_v17  ;;  %v1694_v18 = vunpack.c.h.s8.bf16 %v1414_v13  ;;  %v1696_v19 = vunpack.c.h.s8.bf16 %v1416_v14  ;;  %v1693_v61 = vunpack.c.h.s8.bf16 %v1413_v53 }
 0x133   : > { %v1308_v62 = vcombine.high %v4462_v51, %v4462_v51  ;;  %v1695_v21 = vunpack.c.h.s8.bf16 %v1415_v17  ;;  %v1698_v1 = vunpack.c.l.s8.bf16 %v1418_v20  ;;  %v1700_v22 = vunpack.c.l.s8.bf16 %v1420_v60 }
 0x134   : > { %v1701_v31 = vunpack.c.h.s8.bf16 %v1417_v23  ;;  %v1293_v37 = vcombine.high %v4453_v44, %v4453_v44  ;;  %v1707_v40 = vunpack.c.l.s8.bf16 %v1423_v36  ;;  %v1710_v41 = vunpack.c.h.s8.bf16 %v1422_v29 }
 0x135   : > { %2169 = vmatpush1.bf16.msra.mxu0 %v1661_v2  ;;  %2497 = vmatpush1.bf16.msra.mxu1 %v1663_v26  ;;  %v1378_v0 = vpack.c.bf16 %v1308_v62, %v1308_v62  ;;  %v1697_v2 = vunpack.c.l.s8.bf16 %v1417_v23  ;;  %v1699_v26 = vunpack.c.l.s8.bf16 %v1419_v24  ;;  %v1711_v49 = vunpack.c.h.s8.bf16 %v1423_v36 }
 0x136   : > { %2170 = vmatprep.subr.bf16.mxu0 %v1666_v27  ;;  %2498 = vmatprep.subr.bf16.mxu1 %v1668_v28  ;;  %v1702_v27 = vunpack.c.h.s8.bf16 %v1418_v20  ;;  %v1704_v28 = vunpack.c.h.s8.bf16 %v1420_v60  ;;  %v1377_v62 = vpack.c.bf16 %v4462_v51, %v4462_v51 }
 0x137   : > { %2194 = vmatprep.mubr.bf16.mxu0 %v1378_v0  ;;  %2522 = vmatprep.mubr.bf16.mxu1 %v1378_v0 }
 0x139   : > { %2171 = vmatpush1.bf16.msra.mxu0 %v1665_v32  ;;  %2499 = vmatpush1.bf16.msra.mxu1 %v1667_v33  ;;  %v1703_v32 = vunpack.c.h.s8.bf16 %v1419_v24  ;;  %v1706_v33 = vunpack.c.l.s8.bf16 %v1422_v29 }
 0x13a   : > { %2172 = vmatprep.subr.bf16.mxu0 %v1670_v34  ;;  %2500 = vmatprep.subr.bf16.mxu1 %v1672_v35  ;;  %v1708_v34 = vunpack.c.l.s8.bf16 %v1424_v30  ;;  %v1421_v35 = vld [vmem:[%s4147_s19 + $0xe0] sm:$0xff] }
 0x13b   : > { %v1705_v39 = vunpack.c.l.s8.bf16 %v1421_v35  ;;  %v1709_v47 = vunpack.c.h.s8.bf16 %v1421_v35 }
 0x13d   : > { %2173 = vmatpush1.bf16.msra.mxu0 %v1669_v42  ;;  %2501 = vmatpush1.bf16.msra.mxu1 %v1671_v43  ;;  %v1712_v42 = vunpack.c.h.s8.bf16 %v1424_v30  ;;  %v1426_v43 = vld [vmem:[%s4147_s19 + $0x108] sm:$0xff] }
 0x13e   : > { %2174 = vmatprep.subr.bf16.mxu0 %v1674_v45  ;;  %2502 = vmatprep.subr.bf16.mxu1 %v1676_v46  ;;  %v1428_v45 = vld [vmem:[%s4147_s19 + $0x118] sm:$0xff]  ;;  %v4487_v46 = vrot.slane %v1293_v37, %v4458_v50  ;;  %v1714_v44 = vunpack.c.l.s8.bf16 %v1426_v43  ;;  %v1718_v0 = vunpack.c.h.s8.bf16 %v1426_v43 }
 0x141   : > { %2175 = vmatpush1.bf16.msra.mxu0 %v1673_v54  ;;  %2503 = vmatpush1.bf16.msra.mxu1 %v1675_v55  ;;  %v1716_v54 = vunpack.c.l.s8.bf16 %v1428_v45  ;;  %v1425_v55 = vld [vmem:[%s4147_s19 + $0x100] sm:$0xff] }
 0x142   : > { %2176 = vmatprep.subr.bf16.mxu0 %v1678_v56  ;;  %2504 = vmatprep.subr.bf16.mxu1 %v1680_v59  ;;  %v1427_v56 = vld [vmem:[%s4147_s19 + $0x110] sm:$0xff]  ;;  %v1309_v59 = vcombine.high %v4487_v46, %v4487_v46  ;;  %v1713_v5 = vunpack.c.l.s8.bf16 %v1425_v55  ;;  %v1717_v25 = vunpack.c.h.s8.bf16 %v1425_v55 }
 0x143   : > { %v1715_v63 = vunpack.c.l.s8.bf16 %v1427_v56  ;;  %v1719_v10 = vunpack.c.h.s8.bf16 %v1427_v56 }
 0x145   : > { %2177 = vmatpush1.bf16.msra.mxu0 %v1677_v3  ;;  %2505 = vmatpush1.bf16.msra.mxu1 %v1679_v4  ;;  %v1720_v3 = vunpack.c.h.s8.bf16 %v1428_v45  ;;  %v1430_v4 = vld [vmem:[%s4147_s19 + $0x128] sm:$0xff] }
 0x146   : > { %2178 = vmatprep.subr.bf16.mxu0 %v1682_v6  ;;  %2506 = vmatprep.subr.bf16.mxu1 %v1684_v9  ;;  %v1432_v6 = vld [vmem:[%s4147_s19 + $0x138] sm:$0xff]  ;;  %v1380_v9 = vpack.c.bf16 %v1309_v59, %v1309_v59  ;;  %v1722_v51 = vunpack.c.l.s8.bf16 %v1430_v4  ;;  %v1726_v14 = vunpack.c.h.s8.bf16 %v1430_v4  ;;  %v1445_v59 = vld [vmem:[%s4147_s19 + $0x1a0] sm:$0xff]  ;;  %v1450_v4 = vld [vmem:[%s4147_s19 + $0x1c8] sm:$0xff] }
 0x149   : > { %2179 = vmatpush1.bf16.msra.mxu0 %v1681_v11  ;;  %2507 = vmatpush1.bf16.msra.mxu1 %v1683_v12  ;;  %v1724_v11 = vunpack.c.l.s8.bf16 %v1432_v6  ;;  %v1429_v12 = vld [vmem:[%s4147_s19 + $0x120] sm:$0xff] }
 0x14a   : > { %2180 = vmatprep.subr.bf16.mxu0 %v1686_v8  ;;  %2508 = vmatprep.subr.bf16.mxu1 %v1688_v7  ;;  %v1431_v8 = vld [vmem:[%s4147_s19 + $0x130] sm:$0xff]  ;;  %v1721_v7 = vunpack.c.l.s8.bf16 %v1429_v12 }
 0x14b   : > { %v1723_v13 = vunpack.c.l.s8.bf16 %v1431_v8  ;;  %v1727_v53 = vunpack.c.h.s8.bf16 %v1431_v8 }
 0x14d   : > { %2181 = vmatpush1.bf16.msra.mxu0 %v1685_v15  ;;  %2509 = vmatpush1.bf16.msra.mxu1 %v1687_v48  ;;  %v1728_v15 = vunpack.c.h.s8.bf16 %v1432_v6  ;;  %v1434_v48 = vld [vmem:[%s4147_s19 + $0x148] sm:$0xff]  ;;  %v1452_v6 = vld [vmem:[%s4147_s19 + $0x1d8] sm:$0xff] }
 0x14e   : > { %2182 = vmatprep.subr.bf16.mxu0 %v1690_v52  ;;  %2510 = vmatprep.subr.bf16.mxu1 %v1692_v16  ;;  %v1436_v52 = vld [vmem:[%s4147_s19 + $0x158] sm:$0xff]  ;;  %v1725_v16 = vunpack.c.h.s8.bf16 %v1429_v12  ;;  %v1730_v17 = vunpack.c.l.s8.bf16 %v1434_v48  ;;  %v1734_v60 = vunpack.c.h.s8.bf16 %v1434_v48  ;;  %v1451_v12 = vld [vmem:[%s4147_s19 + $0x1d0] sm:$0xff] }
 0x14f   : > { %v1456_v48 = vld [vmem:[%s4147_s19 + $0x1f8] sm:$0xff] }
 0x151   : > { %2183 = vmatpush1.bf16.msra.mxu0 %v1689_v57  ;;  %2511 = vmatpush1.bf16.msra.mxu1 %v1691_v58  ;;  %v1732_v57 = vunpack.c.l.s8.bf16 %v1436_v52  ;;  %v1433_v58 = vld [vmem:[%s4147_s19 + $0x140] sm:$0xff] }
 0x152   : > { %2184 = vmatprep.subr.bf16.mxu0 %v1694_v18  ;;  %2512 = vmatprep.subr.bf16.mxu1 %v1696_v19  ;;  %v1435_v18 = vld [vmem:[%s4147_s19 + $0x150] sm:$0xff]  ;;  %v1729_v19 = vunpack.c.l.s8.bf16 %v1433_v58 }
 0x153   : > { %v1731_v20 = vunpack.c.l.s8.bf16 %v1435_v18  ;;  %v1735_v23 = vunpack.c.h.s8.bf16 %v1435_v18  ;;  %v4524_v18 = vld [vmem:[%s4450_s26 + $0x8] sm:$0xff] }
 0x155   : > { %2185 = vmatpush1.bf16.msra.mxu0 %v1693_v61  ;;  %2513 = vmatpush1.bf16.msra.mxu1 %v1695_v21  ;;  %v1736_v61 = vunpack.c.h.s8.bf16 %v1436_v52  ;;  %v1438_v21 = vld [vmem:[%s4147_s19 + $0x168] sm:$0xff] }
 0x156   : > { %2186 = vmatprep.subr.bf16.mxu0 %v1698_v1  ;;  %2514 = vmatprep.subr.bf16.mxu1 %v1700_v22  ;;  %v1440_v1 = vld [vmem:[%s4147_s19 + $0x178] sm:$0xff]  ;;  %v1733_v22 = vunpack.c.h.s8.bf16 %v1433_v58  ;;  %v1738_v24 = vunpack.c.l.s8.bf16 %v1438_v21  ;;  %v1742_v30 = vunpack.c.h.s8.bf16 %v1438_v21  ;;  %v1455_v58 = vld [vmem:[%s4147_s19 + $0x1f0] sm:$0xff]  ;;  %v1458_v21 = vld [vmem:[%s4147_s19 + $0x208] sm:$0xff] }
 0x159   : > { %2187 = vmatpush1.bf16.msra.mxu0 %v1697_v2  ;;  %2515 = vmatpush1.bf16.msra.mxu1 %v1699_v26  ;;  %v1740_v2 = vunpack.c.l.s8.bf16 %v1440_v1  ;;  %v1437_v26 = vld [vmem:[%s4147_s19 + $0x160] sm:$0xff] }
 0x15a   : > { %2188 = vmatprep.subr.bf16.mxu0 %v1702_v27  ;;  %2516 = vmatprep.subr.bf16.mxu1 %v1704_v28  ;;  %v1439_v27 = vld [vmem:[%s4147_s19 + $0x170] sm:$0xff]  ;;  %v1737_v28 = vunpack.c.l.s8.bf16 %v1437_v26 }
 0x15b   : > { %v1739_v29 = vunpack.c.l.s8.bf16 %v1439_v27  ;;  %v1743_v35 = vunpack.c.h.s8.bf16 %v1439_v27  ;;  %v1457_v27 = vld [vmem:[%s4147_s19 + $0x200] sm:$0xff] }
 0x15d   : > { %2189 = vmatpush1.bf16.msra.mxu0 %v1701_v31  ;;  %2517 = vmatpush1.bf16.msra.mxu1 %v1703_v32  ;;  %v1744_v31 = vunpack.c.h.s8.bf16 %v1440_v1  ;;  %v1442_v32 = vld [vmem:[%s4147_s19 + $0x188] sm:$0xff]  ;;  %v1460_v1 = vld [vmem:[%s4147_s19 + $0x218] sm:$0xff] }
 0x15e   : > { %2190 = vmatprep.subr.bf16.mxu0 %v1706_v33  ;;  %2518 = vmatprep.subr.bf16.mxu1 %v1708_v34  ;;  %v1444_v33 = vld [vmem:[%s4147_s19 + $0x198] sm:$0xff]  ;;  %v1741_v34 = vunpack.c.h.s8.bf16 %v1437_v26  ;;  %v1746_v36 = vunpack.c.l.s8.bf16 %v1442_v32  ;;  %v1750_v43 = vunpack.c.h.s8.bf16 %v1442_v32  ;;  %v1780_v26 = vunpack.c.l.s8.bf16 %v1460_v1 }
 0x15f   : > { %v1748_v37 = vunpack.c.l.s8.bf16 %v1444_v33  ;;  %v1752_v45 = vunpack.c.h.s8.bf16 %v1444_v33  ;;  %v1782_v33 = vunpack.c.h.s8.bf16 %v1458_v21 }
 0x161   : > { %2191 = vmatpush1.bf16.msra.mxu0 %v1705_v39  ;;  %2519 = vmatpush1.bf16.msra.mxu1 %v1707_v40  ;;  %v1441_v39 = vld [vmem:[%s4147_s19 + $0x180] sm:$0xff]  ;;  %v1443_v40 = vld [vmem:[%s4147_s19 + $0x190] sm:$0xff] }
 0x162   : > { %2192 = vmatprep.subr.bf16.mxu0 %v1710_v41  ;;  %2520 = vmatprep.subr.bf16.mxu1 %v1712_v42  ;;  %v1745_v41 = vunpack.c.l.s8.bf16 %v1441_v39  ;;  %v1747_v42 = vunpack.c.l.s8.bf16 %v1443_v40 }
 0x165   : > { %2193 = vmatpush1.bf16.msra.mxu0 %v1709_v47  ;;  %2521 = vmatpush1.bf16.msra.mxu1 %v1711_v49  ;;  %v1446_v47 = vld [vmem:[%s4147_s19 + $0x1a8] sm:$0xff]  ;;  %v1448_v49 = vld [vmem:[%s4147_s19 + $0x1b8] sm:$0xff] }
 0x166   : > { %2203 = vmatprep.subr.bf16.mxu0 %v1714_v44  ;;  %2531 = vmatprep.subr.bf16.mxu1 %v1716_v54  ;;  %v1749_v44 = vunpack.c.h.s8.bf16 %v1441_v39  ;;  %v1751_v54 = vunpack.c.h.s8.bf16 %v1443_v40  ;;  %v1754_v55 = vunpack.c.l.s8.bf16 %v1446_v47  ;;  %v1756_v56 = vunpack.c.l.s8.bf16 %v1448_v49 }
 0x167   : > { %v1781_v39 = vunpack.c.h.s8.bf16 %v1457_v27 }
 0x168   : > { %2195 = vmatmul.mubr.bf16.vlgmr.msra.gmra.mrb[0].mxu0 %v1377_v62  ;;  %2523 = vmatmul.mubr.bf16.vlgmr.msra.gmra.mrb[0].mxu1 %v1377_v62  ;;  %v1447_v62 = vld [vmem:[%s4147_s19 + $0x1b0] sm:$0xff] }
 0x169   : > { %2204 = vmatpush1.bf16.msra.mxu0 %v1713_v5  ;;  %2532 = vmatpush1.bf16.msra.mxu1 %v1715_v63  ;;  %v1753_v5 = vunpack.c.l.s8.bf16 %v1445_v59  ;;  %v1755_v63 = vunpack.c.l.s8.bf16 %v1447_v62 }
 0x16a   : > { %2205 = vmatprep.subr.bf16.mxu0 %v1718_v0  ;;  %2533 = vmatprep.subr.bf16.mxu1 %v1720_v3  ;;  %v1758_v0 = vunpack.c.h.s8.bf16 %v1446_v47  ;;  %v1760_v3 = vunpack.c.h.s8.bf16 %v1448_v49 }
 0x16b   : > { %2235 = vmatprep.mubr.bf16.mxu0 %v1380_v9  ;;  %2563 = vmatprep.mubr.bf16.mxu1 %v1380_v9  ;;  %v1757_v9 = vunpack.c.h.s8.bf16 %v1445_v59 }
 0x16d   : > { %2206 = vmatpush1.bf16.msra.mxu0 %v1717_v25  ;;  %2534 = vmatpush1.bf16.msra.mxu1 %v1719_v10  ;;  %v1759_v25 = vunpack.c.h.s8.bf16 %v1447_v62  ;;  %v1762_v10 = vunpack.c.l.s8.bf16 %v1450_v4 }
 0x16e   : > { %2207 = vmatprep.subr.bf16.mxu0 %v1722_v51  ;;  %2535 = vmatprep.subr.bf16.mxu1 %v1724_v11  ;;  %v1764_v51 = vunpack.c.l.s8.bf16 %v1452_v6  ;;  %v1449_v11 = vld [vmem:[%s4147_s19 + $0x1c0] sm:$0xff] }
 0x16f   : > { %v1761_v8 = vunpack.c.l.s8.bf16 %v1449_v11  ;;  %v1765_v52 = vunpack.c.h.s8.bf16 %v1449_v11 }
 0x171   : > { %2208 = vmatpush1.bf16.msra.mxu0 %v1721_v7  ;;  %2536 = vmatpush1.bf16.msra.mxu1 %v1723_v13  ;;  %v1763_v7 = vunpack.c.l.s8.bf16 %v1451_v12  ;;  %v1766_v13 = vunpack.c.h.s8.bf16 %v1450_v4 }
 0x172   : > { %2209 = vmatprep.subr.bf16.mxu0 %v1726_v14  ;;  %2537 = vmatprep.subr.bf16.mxu1 %v1728_v15  ;;  %v1768_v14 = vunpack.c.h.s8.bf16 %v1452_v6  ;;  %v1454_v15 = vld [vmem:[%s4147_s19 + $0x1e8] sm:$0xff] }
 0x175   : > { %2210 = vmatpush1.bf16.msra.mxu0 %v1725_v16  ;;  %2538 = vmatpush1.bf16.msra.mxu1 %v1727_v53  ;;  %v1767_v16 = vunpack.c.h.s8.bf16 %v1451_v12  ;;  %v1770_v53 = vunpack.c.l.s8.bf16 %v1454_v15 }
 0x176   : > { %2211 = vmatprep.subr.bf16.mxu0 %v1730_v17  ;;  %2539 = vmatprep.subr.bf16.mxu1 %v1732_v57  ;;  %v1772_v17 = vunpack.c.l.s8.bf16 %v1456_v48  ;;  %v1453_v57 = vld [vmem:[%s4147_s19 + $0x1e0] sm:$0xff] }
 0x179   : > { %2212 = vmatpush1.bf16.msra.mxu0 %v1729_v19  ;;  %2540 = vmatpush1.bf16.msra.mxu1 %v1731_v20  ;;  %v1769_v19 = vunpack.c.l.s8.bf16 %v1453_v57  ;;  %v1771_v20 = vunpack.c.l.s8.bf16 %v1455_v58 }
 0x17a   : > { %2213 = vmatprep.subr.bf16.mxu0 %v1734_v60  ;;  %2541 = vmatprep.subr.bf16.mxu1 %v1736_v61  ;;  %v1774_v60 = vunpack.c.h.s8.bf16 %v1454_v15  ;;  %v1776_v61 = vunpack.c.h.s8.bf16 %v1456_v48 }
 0x17d   : > { %2214 = vmatpush1.bf16.msra.mxu0 %v1733_v22  ;;  %2542 = vmatpush1.bf16.msra.mxu1 %v1735_v23  ;;  %v4530_v22 = vrot.slane %v4524_v18, %v4458_v50  ;;  %v1773_v23 = vunpack.c.h.s8.bf16 %v1453_v57 }
 0x17e   : > { %2215 = vmatprep.subr.bf16.mxu0 %v1738_v24  ;;  %2543 = vmatprep.subr.bf16.mxu1 %v1740_v2  ;;  %v1775_v24 = vunpack.c.h.s8.bf16 %v1455_v58  ;;  %v1778_v2 = vunpack.c.l.s8.bf16 %v1458_v21 }
 0x181   : > { %2216 = vmatpush1.bf16.msra.mxu0 %v1737_v28  ;;  %2544 = vmatpush1.bf16.msra.mxu1 %v1739_v29  ;;  %v1459_v28 = vld [vmem:[%s4147_s19 + $0x210] sm:$0xff]  ;;  %v1325_v29 = vcombine.high %v4530_v22, %v4530_v22 }
 0x182   : > { %2217 = vmatprep.subr.bf16.mxu0 %v1742_v30  ;;  %2545 = vmatprep.subr.bf16.mxu1 %v1744_v31  ;;  %v1379_v30 = vpack.c.bf16 %v4487_v46, %v4487_v46  ;;  %v1777_v31 = vunpack.c.l.s8.bf16 %v1457_v27  ;;  %v1779_v32 = vunpack.c.l.s8.bf16 %v1459_v28  ;;  %v1783_v40 = vunpack.c.h.s8.bf16 %v1459_v28 }
 0x185   : > { %2218 = vmatpush1.bf16.msra.mxu0 %v1741_v34  ;;  %2546 = vmatpush1.bf16.msra.mxu1 %v1743_v35  ;;  %v1784_v34 = vunpack.c.h.s8.bf16 %v1460_v1  ;;  %v1462_v35 = vld [vmem:[%s4147_s19 + $0x228] sm:$0xff] }
 0x186   : > { %2219 = vmatprep.subr.bf16.mxu0 %v1746_v36  ;;  %2547 = vmatprep.subr.bf16.mxu1 %v1748_v37  ;;  %v1464_v36 = vld [vmem:[%s4147_s19 + $0x238] sm:$0xff]  ;;  %v1382_v37 = vpack.c.bf16 %v1325_v29, %v1325_v29  ;;  %v1786_v46 = vunpack.c.l.s8.bf16 %v1462_v35  ;;  %v1790_v49 = vunpack.c.h.s8.bf16 %v1462_v35 }
 0x189   : > { %2220 = vmatpush1.bf16.msra.mxu0 %v1745_v41  ;;  %2548 = vmatpush1.bf16.msra.mxu1 %v1747_v42  ;;  %v1788_v41 = vunpack.c.l.s8.bf16 %v1464_v36  ;;  %v1461_v42 = vld [vmem:[%s4147_s19 + $0x220] sm:$0xff] }
 0x18a   : > { %2221 = vmatprep.subr.bf16.mxu0 %v1750_v43  ;;  %2549 = vmatprep.subr.bf16.mxu1 %v1752_v45  ;;  %v1463_v43 = vld [vmem:[%s4147_s19 + $0x230] sm:$0xff]  ;;  %v1785_v45 = vunpack.c.l.s8.bf16 %v1461_v42 }
 0x18b   : > { %v1787_v47 = vunpack.c.l.s8.bf16 %v1463_v43  ;;  %v1791_v59 = vunpack.c.h.s8.bf16 %v1463_v43  ;;  %v1483_v43 = vld [vmem:[%s4147_s19 + $0x2d0] sm:$0xff] }
 0x18d   : > { %2222 = vmatpush1.bf16.msra.mxu0 %v1749_v44  ;;  %2550 = vmatpush1.bf16.msra.mxu1 %v1751_v54  ;;  %v1792_v44 = vunpack.c.h.s8.bf16 %v1464_v36  ;;  %v1466_v54 = vld [vmem:[%s4147_s19 + $0x248] sm:$0xff] }
 0x18e   : > { %2223 = vmatprep.subr.bf16.mxu0 %v1754_v55  ;;  %2551 = vmatprep.subr.bf16.mxu1 %v1756_v56  ;;  %v1468_v55 = vld [vmem:[%s4147_s19 + $0x258] sm:$0xff]  ;;  %v1789_v56 = vunpack.c.h.s8.bf16 %v1461_v42  ;;  %v1794_v62 = vunpack.c.l.s8.bf16 %v1466_v54  ;;  %v1798_v6 = vunpack.c.h.s8.bf16 %v1466_v54  ;;  %v1482_v36 = vld [vmem:[%s4147_s19 + $0x2c8] sm:$0xff]  ;;  %v1481_v42 = vld [vmem:[%s4147_s19 + $0x2c0] sm:$0xff] }
 0x18f   : > { %v1486_v54 = vld [vmem:[%s4147_s19 + $0x2e8] sm:$0xff] }
 0x191   : > { %2224 = vmatpush1.bf16.msra.mxu0 %v1753_v5  ;;  %2552 = vmatpush1.bf16.msra.mxu1 %v1755_v63  ;;  %v1796_v5 = vunpack.c.l.s8.bf16 %v1468_v55  ;;  %v1465_v63 = vld [vmem:[%s4147_s19 + $0x240] sm:$0xff] }
 0x192   : > { %2225 = vmatprep.subr.bf16.mxu0 %v1758_v0  ;;  %2553 = vmatprep.subr.bf16.mxu1 %v1760_v3  ;;  %v1467_v0 = vld [vmem:[%s4147_s19 + $0x250] sm:$0xff]  ;;  %v1793_v3 = vunpack.c.l.s8.bf16 %v1465_v63 }
 0x193   : > { %v1795_v4 = vunpack.c.l.s8.bf16 %v1467_v0  ;;  %v1799_v11 = vunpack.c.h.s8.bf16 %v1467_v0  ;;  %v1487_v0 = vld [vmem:[%s4147_s19 + $0x2f0] sm:$0xff] }
 0x195   : > { %2226 = vmatpush1.bf16.msra.mxu0 %v1757_v9  ;;  %2554 = vmatpush1.bf16.msra.mxu1 %v1759_v25  ;;  %v1800_v9 = vunpack.c.h.s8.bf16 %v1468_v55  ;;  %v1470_v25 = vld [vmem:[%s4147_s19 + $0x268] sm:$0xff]  ;;  %v1488_v55 = vld [vmem:[%s4147_s19 + $0x2f8] sm:$0xff] }
 0x196   : > { %2227 = vmatprep.subr.bf16.mxu0 %v1762_v10  ;;  %2555 = vmatprep.subr.bf16.mxu1 %v1764_v51  ;;  %v1472_v10 = vld [vmem:[%s4147_s19 + $0x278] sm:$0xff]  ;;  %v1797_v51 = vunpack.c.h.s8.bf16 %v1465_v63  ;;  %v1802_v12 = vunpack.c.l.s8.bf16 %v1470_v25  ;;  %v1806_v48 = vunpack.c.h.s8.bf16 %v1470_v25  ;;  %v1485_v63 = vld [vmem:[%s4147_s19 + $0x2e0] sm:$0xff]  ;;  %v1840_v25 = vunpack.c.h.s8.bf16 %v1488_v55 }
 0x199   : > { %2228 = vmatpush1.bf16.msra.mxu0 %v1761_v8  ;;  %2556 = vmatpush1.bf16.msra.mxu1 %v1763_v7  ;;  %v1804_v8 = vunpack.c.l.s8.bf16 %v1472_v10  ;;  %v1469_v7 = vld [vmem:[%s4147_s19 + $0x260] sm:$0xff] }
 0x19a   : > { %2229 = vmatprep.subr.bf16.mxu0 %v1766_v13  ;;  %2557 = vmatprep.subr.bf16.mxu1 %v1768_v14  ;;  %v1471_v13 = vld [vmem:[%s4147_s19 + $0x270] sm:$0xff]  ;;  %v1801_v14 = vunpack.c.l.s8.bf16 %v1469_v7 }
 0x19b   : > { %v1803_v15 = vunpack.c.l.s8.bf16 %v1471_v13  ;;  %v1807_v57 = vunpack.c.h.s8.bf16 %v1471_v13  ;;  %v1489_v13 = vld [vmem:[%s4147_s19 + $0x300] sm:$0xff] }
 0x19d   : > { %2230 = vmatpush1.bf16.msra.mxu0 %v1765_v52  ;;  %2558 = vmatpush1.bf16.msra.mxu1 %v1767_v16  ;;  %v1808_v52 = vunpack.c.h.s8.bf16 %v1472_v10  ;;  %v1474_v16 = vld [vmem:[%s4147_s19 + $0x288] sm:$0xff] }
 0x19e   : > { %2231 = vmatprep.subr.bf16.mxu0 %v1770_v53  ;;  %2559 = vmatprep.subr.bf16.mxu1 %v1772_v17  ;;  %v1476_v53 = vld [vmem:[%s4147_s19 + $0x298] sm:$0xff]  ;;  %v1805_v17 = vunpack.c.h.s8.bf16 %v1469_v7  ;;  %v1810_v58 = vunpack.c.l.s8.bf16 %v1474_v16  ;;  %v1814_v1 = vunpack.c.h.s8.bf16 %v1474_v16  ;;  %v1490_v10 = vld [vmem:[%s4147_s19 + $0x308] sm:$0xff] }
 0x1a1   : > { %2232 = vmatpush1.bf16.msra.mxu0 %v1769_v19  ;;  %2560 = vmatpush1.bf16.msra.mxu1 %v1771_v20  ;;  %v1812_v19 = vunpack.c.l.s8.bf16 %v1476_v53  ;;  %v1473_v20 = vld [vmem:[%s4147_s19 + $0x280] sm:$0xff] }
 0x1a2   : > { %2233 = vmatprep.subr.bf16.mxu0 %v1774_v60  ;;  %2561 = vmatprep.subr.bf16.mxu1 %v1776_v61  ;;  %v1475_v60 = vld [vmem:[%s4147_s19 + $0x290] sm:$0xff]  ;;  %v1809_v61 = vunpack.c.l.s8.bf16 %v1473_v20 }
 0x1a3   : > { %v1811_v21 = vunpack.c.l.s8.bf16 %v1475_v60  ;;  %v1815_v27 = vunpack.c.h.s8.bf16 %v1475_v60 }
 0x1a5   : > { %2234 = vmatpush1.bf16.msra.mxu0 %v1773_v23  ;;  %2562 = vmatpush1.bf16.msra.mxu1 %v1775_v24  ;;  %v1816_v23 = vunpack.c.h.s8.bf16 %v1476_v53  ;;  %v1478_v24 = vld [vmem:[%s4147_s19 + $0x2a8] sm:$0xff]  ;;  %v1846_v53 = vunpack.c.h.s8.bf16 %v1490_v10 }
 0x1a6   : > { %2244 = vmatprep.subr.bf16.mxu0 %v1778_v2  ;;  %2572 = vmatprep.subr.bf16.mxu1 %v1780_v26  ;;  %v1480_v2 = vld [vmem:[%s4147_s19 + $0x2b8] sm:$0xff]  ;;  %v1813_v26 = vunpack.c.h.s8.bf16 %v1473_v20  ;;  %v1818_v28 = vunpack.c.l.s8.bf16 %v1478_v24  ;;  %v1845_v20 = vunpack.c.h.s8.bf16 %v1489_v13 }
 0x1a7   : > { %v1820_v29 = vunpack.c.l.s8.bf16 %v1480_v2  ;;  %v1824_v35 = vunpack.c.h.s8.bf16 %v1480_v2 }
 0x1a8   : > { %2236 = vmatmul.mubr.bf16.vlgmr.msra.gmra.mrb[0].mxu0 %v1379_v30  ;;  %2564 = vmatmul.mubr.bf16.vlgmr.msra.gmra.mrb[0].mxu1 %v1379_v30  ;;  %v1477_v30 = vld [vmem:[%s4147_s19 + $0x2a0] sm:$0xff] }
 0x1a9   : > { %2245 = vmatpush1.bf16.msra.mxu0 %v1777_v31  ;;  %2573 = vmatpush1.bf16.msra.mxu1 %v1779_v32  ;;  %v1479_v31 = vld [vmem:[%s4147_s19 + $0x2b0] sm:$0xff]  ;;  %v1817_v32 = vunpack.c.l.s8.bf16 %v1477_v30 }
 0x1aa   : > { %2246 = vmatprep.subr.bf16.mxu0 %v1782_v33  ;;  %2574 = vmatprep.subr.bf16.mxu1 %v1784_v34  ;;  %v1819_v33 = vunpack.c.l.s8.bf16 %v1479_v31  ;;  %v1822_v34 = vunpack.c.h.s8.bf16 %v1478_v24 }
 0x1ab   : > { %2276 = vmatprep.mubr.bf16.mxu0 %v1382_v37  ;;  %2604 = vmatprep.mubr.bf16.mxu1 %v1382_v37  ;;  %v1484_v37 = vld [vmem:[%s4147_s19 + $0x2d8] sm:$0xff] }
 0x1ad   : > { %2247 = vmatpush1.bf16.msra.mxu0 %v1781_v39  ;;  %2575 = vmatpush1.bf16.msra.mxu1 %v1783_v40  ;;  %v1821_v39 = vunpack.c.h.s8.bf16 %v1477_v30  ;;  %v1823_v40 = vunpack.c.h.s8.bf16 %v1479_v31 }
 0x1ae   : > { %2248 = vmatprep.subr.bf16.mxu0 %v1786_v46  ;;  %2576 = vmatprep.subr.bf16.mxu1 %v1788_v41  ;;  %v1826_v46 = vunpack.c.l.s8.bf16 %v1482_v36  ;;  %v1828_v41 = vunpack.c.l.s8.bf16 %v1484_v37 }
 0x1b1   : > { %2249 = vmatpush1.bf16.msra.mxu0 %v1785_v45  ;;  %2577 = vmatpush1.bf16.msra.mxu1 %v1787_v47  ;;  %v1825_v45 = vunpack.c.l.s8.bf16 %v1481_v42  ;;  %v1827_v47 = vunpack.c.l.s8.bf16 %v1483_v43 }
 0x1b2   : > { %2250 = vmatprep.subr.bf16.mxu0 %v1790_v49  ;;  %2578 = vmatprep.subr.bf16.mxu1 %v1792_v44  ;;  %v1830_v49 = vunpack.c.h.s8.bf16 %v1482_v36  ;;  %v1832_v44 = vunpack.c.h.s8.bf16 %v1484_v37 }
 0x1b5   : > { %2251 = vmatpush1.bf16.msra.mxu0 %v1789_v56  ;;  %2579 = vmatpush1.bf16.msra.mxu1 %v1791_v59  ;;  %v1829_v56 = vunpack.c.h.s8.bf16 %v1481_v42  ;;  %v1831_v59 = vunpack.c.h.s8.bf16 %v1483_v43 }
 0x1b6   : > { %2252 = vmatprep.subr.bf16.mxu0 %v1794_v62  ;;  %2580 = vmatprep.subr.bf16.mxu1 %v1796_v5  ;;  %v1834_v62 = vunpack.c.l.s8.bf16 %v1486_v54  ;;  %v1836_v5 = vunpack.c.l.s8.bf16 %v1488_v55 }
 0x1b9   : > { %2253 = vmatpush1.bf16.msra.mxu0 %v1793_v3  ;;  %2581 = vmatpush1.bf16.msra.mxu1 %v1795_v4  ;;  %v1310_v3 = vcombine.high %v4524_v18, %v4524_v18  ;;  %v1833_v4 = vunpack.c.l.s8.bf16 %v1485_v63  ;;  %v1842_v18 = vunpack.c.l.s8.bf16 %v1490_v10 }
 0x1ba   : > { %2254 = vmatprep.subr.bf16.mxu0 %v1798_v6  ;;  %2582 = vmatprep.subr.bf16.mxu1 %v1800_v9  ;;  %v1835_v6 = vunpack.c.l.s8.bf16 %v1487_v0  ;;  %v1838_v9 = vunpack.c.h.s8.bf16 %v1486_v54 }
 0x1bd   : > { %2255 = vmatpush1.bf16.msra.mxu0 %v1797_v51  ;;  %2583 = vmatpush1.bf16.msra.mxu1 %v1799_v11  ;;  %v1492_v51 = vld [vmem:[%s4147_s19 + $0x318] sm:$0xff]  ;;  %v4571_v11 = vrot.slane %v1310_v3, %v4458_v50 }
 0x1be   : > { %2256 = vmatprep.subr.bf16.mxu0 %v1802_v12  ;;  %2584 = vmatprep.subr.bf16.mxu1 %v1804_v8  ;;  %v1837_v12 = vunpack.c.h.s8.bf16 %v1485_v63  ;;  %v1839_v8 = vunpack.c.h.s8.bf16 %v1487_v0  ;;  %v1844_v7 = vunpack.c.l.s8.bf16 %v1492_v51 }
 0x1c1   : > { %2257 = vmatpush1.bf16.msra.mxu0 %v1801_v14  ;;  %2585 = vmatpush1.bf16.msra.mxu1 %v1803_v15  ;;  %v1491_v14 = vld [vmem:[%s4147_s19 + $0x310] sm:$0xff]  ;;  %v1326_v15 = vcombine.high %v4571_v11, %v4571_v11 }
 0x1c2   : > { %2258 = vmatprep.subr.bf16.mxu0 %v1806_v48  ;;  %2586 = vmatprep.subr.bf16.mxu1 %v1808_v52  ;;  %v1381_v48 = vpack.c.bf16 %v4530_v22, %v4530_v22  ;;  %v1841_v52 = vunpack.c.l.s8.bf16 %v1489_v13  ;;  %v1843_v16 = vunpack.c.l.s8.bf16 %v1491_v14  ;;  %v1847_v60 = vunpack.c.h.s8.bf16 %v1491_v14 }
 0x1c5   : > { %2259 = vmatpush1.bf16.msra.mxu0 %v1805_v17  ;;  %2587 = vmatpush1.bf16.msra.mxu1 %v1807_v57  ;;  %v1848_v17 = vunpack.c.h.s8.bf16 %v1492_v51  ;;  %v1494_v57 = vld [vmem:[%s4147_s19 + $0x328] sm:$0xff] }
 0x1c6   : > { %2260 = vmatprep.subr.bf16.mxu0 %v1810_v58  ;;  %2588 = vmatprep.subr.bf16.mxu1 %v1812_v19  ;;  %v1496_v58 = vld [vmem:[%s4147_s19 + $0x338] sm:$0xff]  ;;  %v1384_v19 = vpack.c.bf16 %v1326_v15, %v1326_v15  ;;  %v1850_v22 = vunpack.c.l.s8.bf16 %v1494_v57  ;;  %v1854_v2 = vunpack.c.h.s8.bf16 %v1494_v57  ;;  %v1509_v15 = vld [vmem:[%s4147_s19 + $0x3a0] sm:$0xff]  ;;  %v1514_v57 = vld [vmem:[%s4147_s19 + $0x3c8] sm:$0xff] }
 0x1c9   : > { %2261 = vmatpush1.bf16.msra.mxu0 %v1809_v61  ;;  %2589 = vmatpush1.bf16.msra.mxu1 %v1811_v21  ;;  %v1852_v61 = vunpack.c.l.s8.bf16 %v1496_v58  ;;  %v1493_v21 = vld [vmem:[%s4147_s19 + $0x320] sm:$0xff] }
 0x1ca   : > { %2262 = vmatprep.subr.bf16.mxu0 %v1814_v1  ;;  %2590 = vmatprep.subr.bf16.mxu1 %v1816_v23  ;;  %v1495_v1 = vld [vmem:[%s4147_s19 + $0x330] sm:$0xff]  ;;  %v1849_v23 = vunpack.c.l.s8.bf16 %v1493_v21 }
 0x1cb   : > { %v1851_v24 = vunpack.c.l.s8.bf16 %v1495_v1  ;;  %v1855_v30 = vunpack.c.h.s8.bf16 %v1495_v1 }
 0x1cd   : > { %2263 = vmatpush1.bf16.msra.mxu0 %v1813_v26  ;;  %2591 = vmatpush1.bf16.msra.mxu1 %v1815_v27  ;;  %v1856_v26 = vunpack.c.h.s8.bf16 %v1496_v58  ;;  %v1498_v27 = vld [vmem:[%s4147_s19 + $0x348] sm:$0xff]  ;;  %v1516_v58 = vld [vmem:[%s4147_s19 + $0x3d8] sm:$0xff] }
 0x1ce   : > { %2264 = vmatprep.subr.bf16.mxu0 %v1818_v28  ;;  %2592 = vmatprep.subr.bf16.mxu1 %v1820_v29  ;;  %v1500_v28 = vld [vmem:[%s4147_s19 + $0x358] sm:$0xff]  ;;  %v1853_v29 = vunpack.c.h.s8.bf16 %v1493_v21  ;;  %v1858_v31 = vunpack.c.l.s8.bf16 %v1498_v27  ;;  %v1862_v37 = vunpack.c.h.s8.bf16 %v1498_v27  ;;  %v1515_v21 = vld [vmem:[%s4147_s19 + $0x3d0] sm:$0xff] }
 0x1cf   : > { %v1520_v27 = vld [vmem:[%s4147_s19 + $0x3f8] sm:$0xff] }
 0x1d1   : > { %2265 = vmatpush1.bf16.msra.mxu0 %v1817_v32  ;;  %2593 = vmatpush1.bf16.msra.mxu1 %v1819_v33  ;;  %v1860_v32 = vunpack.c.l.s8.bf16 %v1500_v28  ;;  %v1497_v33 = vld [vmem:[%s4147_s19 + $0x340] sm:$0xff] }
 0x1d2   : > { %2266 = vmatprep.subr.bf16.mxu0 %v1822_v34  ;;  %2594 = vmatprep.subr.bf16.mxu1 %v1824_v35  ;;  %v1499_v34 = vld [vmem:[%s4147_s19 + $0x350] sm:$0xff]  ;;  %v1857_v35 = vunpack.c.l.s8.bf16 %v1497_v33 }
 0x1d3   : > { %v1859_v36 = vunpack.c.l.s8.bf16 %v1499_v34  ;;  %v1863_v42 = vunpack.c.h.s8.bf16 %v1499_v34  ;;  %v4608_v34 = vld [vmem:[%s4450_s26 + $0x10] sm:$0xff] }
 0x1d5   : > { %2267 = vmatpush1.bf16.msra.mxu0 %v1821_v39  ;;  %2595 = vmatpush1.bf16.msra.mxu1 %v1823_v40  ;;  %v1864_v39 = vunpack.c.h.s8.bf16 %v1500_v28  ;;  %v1502_v40 = vld [vmem:[%s4147_s19 + $0x368] sm:$0xff] }
 0x1d6   : > { %2268 = vmatprep.subr.bf16.mxu0 %v1826_v46  ;;  %2596 = vmatprep.subr.bf16.mxu1 %v1828_v41  ;;  %v1504_v46 = vld [vmem:[%s4147_s19 + $0x378] sm:$0xff]  ;;  %v1861_v41 = vunpack.c.h.s8.bf16 %v1497_v33  ;;  %v1866_v43 = vunpack.c.l.s8.bf16 %v1502_v40  ;;  %v1870_v55 = vunpack.c.h.s8.bf16 %v1502_v40  ;;  %v1519_v33 = vld [vmem:[%s4147_s19 + $0x3f0] sm:$0xff]  ;;  %v1522_v40 = vld [vmem:[%s4147_s19 + $0x408] sm:$0xff] }
 0x1d9   : > { %2269 = vmatpush1.bf16.msra.mxu0 %v1825_v45  ;;  %2597 = vmatpush1.bf16.msra.mxu1 %v1827_v47  ;;  %v1868_v45 = vunpack.c.l.s8.bf16 %v1504_v46  ;;  %v1501_v47 = vld [vmem:[%s4147_s19 + $0x360] sm:$0xff] }
 0x1da   : > { %2270 = vmatprep.subr.bf16.mxu0 %v1830_v49  ;;  %2598 = vmatprep.subr.bf16.mxu1 %v1832_v44  ;;  %v1503_v49 = vld [vmem:[%s4147_s19 + $0x370] sm:$0xff]  ;;  %v1865_v44 = vunpack.c.l.s8.bf16 %v1501_v47 }
 0x1db   : > { %v1867_v54 = vunpack.c.l.s8.bf16 %v1503_v49  ;;  %v1871_v63 = vunpack.c.h.s8.bf16 %v1503_v49  ;;  %v1521_v49 = vld [vmem:[%s4147_s19 + $0x400] sm:$0xff] }
 0x1dd   : > { %2271 = vmatpush1.bf16.msra.mxu0 %v1829_v56  ;;  %2599 = vmatpush1.bf16.msra.mxu1 %v1831_v59  ;;  %v1872_v56 = vunpack.c.h.s8.bf16 %v1504_v46  ;;  %v1506_v59 = vld [vmem:[%s4147_s19 + $0x388] sm:$0xff]  ;;  %v1524_v46 = vld [vmem:[%s4147_s19 + $0x418] sm:$0xff] }
 0x1de   : > { %2272 = vmatprep.subr.bf16.mxu0 %v1834_v62  ;;  %2600 = vmatprep.subr.bf16.mxu1 %v1836_v5  ;;  %v1508_v62 = vld [vmem:[%s4147_s19 + $0x398] sm:$0xff]  ;;  %v1869_v5 = vunpack.c.h.s8.bf16 %v1501_v47  ;;  %v1874_v0 = vunpack.c.l.s8.bf16 %v1506_v59  ;;  %v1878_v10 = vunpack.c.h.s8.bf16 %v1506_v59  ;;  %v1908_v47 = vunpack.c.l.s8.bf16 %v1524_v46 }
 0x1df   : > { %v1876_v3 = vunpack.c.l.s8.bf16 %v1508_v62  ;;  %v1880_v51 = vunpack.c.h.s8.bf16 %v1508_v62  ;;  %v1910_v62 = vunpack.c.h.s8.bf16 %v1522_v40 }
 0x1e1   : > { %2273 = vmatpush1.bf16.msra.mxu0 %v1833_v4  ;;  %2601 = vmatpush1.bf16.msra.mxu1 %v1835_v6  ;;  %v1505_v4 = vld [vmem:[%s4147_s19 + $0x380] sm:$0xff]  ;;  %v1507_v6 = vld [vmem:[%s4147_s19 + $0x390] sm:$0xff] }
 0x1e2   : > { %2274 = vmatprep.subr.bf16.mxu0 %v1838_v9  ;;  %2602 = vmatprep.subr.bf16.mxu1 %v1840_v25  ;;  %v1873_v9 = vunpack.c.l.s8.bf16 %v1505_v4  ;;  %v1875_v25 = vunpack.c.l.s8.bf16 %v1507_v6 }
 0x1e5   : > { %2275 = vmatpush1.bf16.msra.mxu0 %v1837_v12  ;;  %2603 = vmatpush1.bf16.msra.mxu1 %v1839_v8  ;;  %v1510_v12 = vld [vmem:[%s4147_s19 + $0x3a8] sm:$0xff]  ;;  %v1512_v8 = vld [vmem:[%s4147_s19 + $0x3b8] sm:$0xff] }
 0x1e6   : > { %2285 = vmatprep.subr.bf16.mxu0 %v1842_v18  ;;  %2613 = vmatprep.subr.bf16.mxu1 %v1844_v7  ;;  %v1877_v18 = vunpack.c.h.s8.bf16 %v1505_v4  ;;  %v1879_v7 = vunpack.c.h.s8.bf16 %v1507_v6  ;;  %v1882_v13 = vunpack.c.l.s8.bf16 %v1510_v12  ;;  %v1884_v14 = vunpack.c.l.s8.bf16 %v1512_v8 }
 0x1e7   : > { %v1909_v4 = vunpack.c.h.s8.bf16 %v1521_v49 }
 0x1e8   : > { %2277 = vmatmul.mubr.bf16.vlgmr.msra.gmra.mrb[0].mxu0 %v1381_v48  ;;  %2605 = vmatmul.mubr.bf16.vlgmr.msra.gmra.mrb[0].mxu1 %v1381_v48  ;;  %v1511_v48 = vld [vmem:[%s4147_s19 + $0x3b0] sm:$0xff] }
 0x1e9   : > { %2286 = vmatpush1.bf16.msra.mxu0 %v1841_v52  ;;  %2614 = vmatpush1.bf16.msra.mxu1 %v1843_v16  ;;  %v1881_v52 = vunpack.c.l.s8.bf16 %v1509_v15  ;;  %v1883_v16 = vunpack.c.l.s8.bf16 %v1511_v48 }
 0x1ea   : > { %2287 = vmatprep.subr.bf16.mxu0 %v1846_v53  ;;  %2615 = vmatprep.subr.bf16.mxu1 %v1848_v17  ;;  %v1886_v53 = vunpack.c.h.s8.bf16 %v1510_v12  ;;  %v1888_v17 = vunpack.c.h.s8.bf16 %v1512_v8 }
 0x1eb   : > { %2317 = vmatprep.mubr.bf16.mxu0 %v1384_v19  ;;  %2645 = vmatprep.mubr.bf16.mxu1 %v1384_v19  ;;  %v1885_v19 = vunpack.c.h.s8.bf16 %v1509_v15 }
 0x1ed   : > { %2288 = vmatpush1.bf16.msra.mxu0 %v1845_v20  ;;  %2616 = vmatpush1.bf16.msra.mxu1 %v1847_v60  ;;  %v1887_v20 = vunpack.c.h.s8.bf16 %v1511_v48  ;;  %v1890_v60 = vunpack.c.l.s8.bf16 %v1514_v57 }
 0x1ee   : > { %2289 = vmatprep.subr.bf16.mxu0 %v1850_v22  ;;  %2617 = vmatprep.subr.bf16.mxu1 %v1852_v61  ;;  %v1892_v22 = vunpack.c.l.s8.bf16 %v1516_v58  ;;  %v1513_v61 = vld [vmem:[%s4147_s19 + $0x3c0] sm:$0xff] }
 0x1ef   : > { %v1889_v1 = vunpack.c.l.s8.bf16 %v1513_v61  ;;  %v1893_v28 = vunpack.c.h.s8.bf16 %v1513_v61 }
 0x1f1   : > { %2290 = vmatpush1.bf16.msra.mxu0 %v1849_v23  ;;  %2618 = vmatpush1.bf16.msra.mxu1 %v1851_v24  ;;  %v1891_v23 = vunpack.c.l.s8.bf16 %v1515_v21  ;;  %v1894_v24 = vunpack.c.h.s8.bf16 %v1514_v57 }
 0x1f2   : > { %2291 = vmatprep.subr.bf16.mxu0 %v1854_v2  ;;  %2619 = vmatprep.subr.bf16.mxu1 %v1856_v26  ;;  %v1896_v2 = vunpack.c.h.s8.bf16 %v1516_v58  ;;  %v1518_v26 = vld [vmem:[%s4147_s19 + $0x3e8] sm:$0xff] }
 0x1f5   : > { %2292 = vmatpush1.bf16.msra.mxu0 %v1853_v29  ;;  %2620 = vmatpush1.bf16.msra.mxu1 %v1855_v30  ;;  %v1895_v29 = vunpack.c.h.s8.bf16 %v1515_v21  ;;  %v1898_v30 = vunpack.c.l.s8.bf16 %v1518_v26 }
 0x1f6   : > { %2293 = vmatprep.subr.bf16.mxu0 %v1858_v31  ;;  %2621 = vmatprep.subr.bf16.mxu1 %v1860_v32  ;;  %v1900_v31 = vunpack.c.l.s8.bf16 %v1520_v27  ;;  %v1517_v32 = vld [vmem:[%s4147_s19 + $0x3e0] sm:$0xff] }
 0x1f9   : > { %2294 = vmatpush1.bf16.msra.mxu0 %v1857_v35  ;;  %2622 = vmatpush1.bf16.msra.mxu1 %v1859_v36  ;;  %v1897_v35 = vunpack.c.l.s8.bf16 %v1517_v32  ;;  %v1899_v36 = vunpack.c.l.s8.bf16 %v1519_v33 }
 0x1fa   : > { %2295 = vmatprep.subr.bf16.mxu0 %v1862_v37  ;;  %2623 = vmatprep.subr.bf16.mxu1 %v1864_v39  ;;  %v1902_v37 = vunpack.c.h.s8.bf16 %v1518_v26  ;;  %v1904_v39 = vunpack.c.h.s8.bf16 %v1520_v27 }
 0x1fd   : > { %2296 = vmatpush1.bf16.msra.mxu0 %v1861_v41  ;;  %2624 = vmatpush1.bf16.msra.mxu1 %v1863_v42  ;;  %v4614_v41 = vrot.slane %v4608_v34, %v4458_v50  ;;  %v1901_v42 = vunpack.c.h.s8.bf16 %v1517_v32 }
 0x1fe   : > { %2297 = vmatprep.subr.bf16.mxu0 %v1866_v43  ;;  %2625 = vmatprep.subr.bf16.mxu1 %v1868_v45  ;;  %v1903_v43 = vunpack.c.h.s8.bf16 %v1519_v33  ;;  %v1906_v45 = vunpack.c.l.s8.bf16 %v1522_v40 }
 0x201   : > { %2298 = vmatpush1.bf16.msra.mxu0 %v1865_v44  ;;  %2626 = vmatpush1.bf16.msra.mxu1 %v1867_v54  ;;  %v1523_v44 = vld [vmem:[%s4147_s19 + $0x410] sm:$0xff]  ;;  %v1342_v54 = vcombine.high %v4614_v41, %v4614_v41 }
 0x202   : > { %2299 = vmatprep.subr.bf16.mxu0 %v1870_v55  ;;  %2627 = vmatprep.subr.bf16.mxu1 %v1872_v56  ;;  %v1383_v55 = vpack.c.bf16 %v4571_v11, %v4571_v11  ;;  %v1905_v56 = vunpack.c.l.s8.bf16 %v1521_v49  ;;  %v1907_v59 = vunpack.c.l.s8.bf16 %v1523_v44  ;;  %v1911_v6 = vunpack.c.h.s8.bf16 %v1523_v44 }
 0x205   : > { %2300 = vmatpush1.bf16.msra.mxu0 %v1869_v5  ;;  %2628 = vmatpush1.bf16.msra.mxu1 %v1871_v63  ;;  %v1912_v5 = vunpack.c.h.s8.bf16 %v1524_v46  ;;  %v1526_v63 = vld [vmem:[%s4147_s19 + $0x428] sm:$0xff] }
 0x206   : > { %2301 = vmatprep.subr.bf16.mxu0 %v1874_v0  ;;  %2629 = vmatprep.subr.bf16.mxu1 %v1876_v3  ;;  %v1528_v0 = vld [vmem:[%s4147_s19 + $0x438] sm:$0xff]  ;;  %v1386_v3 = vpack.c.bf16 %v1342_v54, %v1342_v54  ;;  %v1914_v11 = vunpack.c.l.s8.bf16 %v1526_v63  ;;  %v1918_v8 = vunpack.c.h.s8.bf16 %v1526_v63 }
 0x209   : > { %2302 = vmatpush1.bf16.msra.mxu0 %v1873_v9  ;;  %2630 = vmatpush1.bf16.msra.mxu1 %v1875_v25  ;;  %v1916_v9 = vunpack.c.l.s8.bf16 %v1528_v0  ;;  %v1525_v25 = vld [vmem:[%s4147_s19 + $0x420] sm:$0xff] }
 0x20a   : > { %2303 = vmatprep.subr.bf16.mxu0 %v1878_v10  ;;  %2631 = vmatprep.subr.bf16.mxu1 %v1880_v51  ;;  %v1527_v10 = vld [vmem:[%s4147_s19 + $0x430] sm:$0xff]  ;;  %v1913_v51 = vunpack.c.l.s8.bf16 %v1525_v25 }
 0x20b   : > { %v1915_v12 = vunpack.c.l.s8.bf16 %v1527_v10  ;;  %v1919_v15 = vunpack.c.h.s8.bf16 %v1527_v10  ;;  %v1547_v10 = vld [vmem:[%s4147_s19 + $0x4d0] sm:$0xff] }
 0x20d   : > { %2304 = vmatpush1.bf16.msra.mxu0 %v1877_v18  ;;  %2632 = vmatpush1.bf16.msra.mxu1 %v1879_v7  ;;  %v1920_v18 = vunpack.c.h.s8.bf16 %v1528_v0  ;;  %v1530_v7 = vld [vmem:[%s4147_s19 + $0x448] sm:$0xff] }
 0x20e   : > { %2305 = vmatprep.subr.bf16.mxu0 %v1882_v13  ;;  %2633 = vmatprep.subr.bf16.mxu1 %v1884_v14  ;;  %v1532_v13 = vld [vmem:[%s4147_s19 + $0x458] sm:$0xff]  ;;  %v1917_v14 = vunpack.c.h.s8.bf16 %v1525_v25  ;;  %v1922_v48 = vunpack.c.l.s8.bf16 %v1530_v7  ;;  %v1926_v58 = vunpack.c.h.s8.bf16 %v1530_v7  ;;  %v1546_v0 = vld [vmem:[%s4147_s19 + $0x4c8] sm:$0xff]  ;;  %v1545_v25 = vld [vmem:[%s4147_s19 + $0x4c0] sm:$0xff] }
 0x20f   : > { %v1550_v7 = vld [vmem:[%s4147_s19 + $0x4e8] sm:$0xff] }
 0x211   : > { %2306 = vmatpush1.bf16.msra.mxu0 %v1881_v52  ;;  %2634 = vmatpush1.bf16.msra.mxu1 %v1883_v16  ;;  %v1924_v52 = vunpack.c.l.s8.bf16 %v1532_v13  ;;  %v1529_v16 = vld [vmem:[%s4147_s19 + $0x440] sm:$0xff] }
 0x212   : > { %2307 = vmatprep.subr.bf16.mxu0 %v1886_v53  ;;  %2635 = vmatprep.subr.bf16.mxu1 %v1888_v17  ;;  %v1531_v53 = vld [vmem:[%s4147_s19 + $0x450] sm:$0xff]  ;;  %v1921_v17 = vunpack.c.l.s8.bf16 %v1529_v16 }
 0x213   : > { %v1923_v57 = vunpack.c.l.s8.bf16 %v1531_v53  ;;  %v1927_v61 = vunpack.c.h.s8.bf16 %v1531_v53  ;;  %v1551_v53 = vld [vmem:[%s4147_s19 + $0x4f0] sm:$0xff] }
 0x215   : > { %2308 = vmatpush1.bf16.msra.mxu0 %v1885_v19  ;;  %2636 = vmatpush1.bf16.msra.mxu1 %v1887_v20  ;;  %v1928_v19 = vunpack.c.h.s8.bf16 %v1532_v13  ;;  %v1534_v20 = vld [vmem:[%s4147_s19 + $0x468] sm:$0xff]  ;;  %v1552_v13 = vld [vmem:[%s4147_s19 + $0x4f8] sm:$0xff] }
 0x216   : > { %2309 = vmatprep.subr.bf16.mxu0 %v1890_v60  ;;  %2637 = vmatprep.subr.bf16.mxu1 %v1892_v22  ;;  %v1536_v60 = vld [vmem:[%s4147_s19 + $0x478] sm:$0xff]  ;;  %v1925_v22 = vunpack.c.h.s8.bf16 %v1529_v16  ;;  %v1930_v21 = vunpack.c.l.s8.bf16 %v1534_v20  ;;  %v1934_v27 = vunpack.c.h.s8.bf16 %v1534_v20  ;;  %v1549_v16 = vld [vmem:[%s4147_s19 + $0x4e0] sm:$0xff]  ;;  %v1968_v20 = vunpack.c.h.s8.bf16 %v1552_v13 }
 0x219   : > { %2310 = vmatpush1.bf16.msra.mxu0 %v1889_v1  ;;  %2638 = vmatpush1.bf16.msra.mxu1 %v1891_v23  ;;  %v1932_v1 = vunpack.c.l.s8.bf16 %v1536_v60  ;;  %v1533_v23 = vld [vmem:[%s4147_s19 + $0x460] sm:$0xff] }
 0x21a   : > { %2311 = vmatprep.subr.bf16.mxu0 %v1894_v24  ;;  %2639 = vmatprep.subr.bf16.mxu1 %v1896_v2  ;;  %v1535_v24 = vld [vmem:[%s4147_s19 + $0x470] sm:$0xff]  ;;  %v1929_v2 = vunpack.c.l.s8.bf16 %v1533_v23 }
 0x21b   : > { %v1931_v26 = vunpack.c.l.s8.bf16 %v1535_v24  ;;  %v1935_v32 = vunpack.c.h.s8.bf16 %v1535_v24  ;;  %v1553_v24 = vld [vmem:[%s4147_s19 + $0x500] sm:$0xff] }
 0x21d   : > { %2312 = vmatpush1.bf16.msra.mxu0 %v1893_v28  ;;  %2640 = vmatpush1.bf16.msra.mxu1 %v1895_v29  ;;  %v1936_v28 = vunpack.c.h.s8.bf16 %v1536_v60  ;;  %v1538_v29 = vld [vmem:[%s4147_s19 + $0x488] sm:$0xff] }
 0x21e   : > { %2313 = vmatprep.subr.bf16.mxu0 %v1898_v30  ;;  %2641 = vmatprep.subr.bf16.mxu1 %v1900_v31  ;;  %v1540_v30 = vld [vmem:[%s4147_s19 + $0x498] sm:$0xff]  ;;  %v1933_v31 = vunpack.c.h.s8.bf16 %v1533_v23  ;;  %v1938_v33 = vunpack.c.l.s8.bf16 %v1538_v29  ;;  %v1942_v46 = vunpack.c.h.s8.bf16 %v1538_v29  ;;  %v1554_v60 = vld [vmem:[%s4147_s19 + $0x508] sm:$0xff] }
 0x221   : > { %2314 = vmatpush1.bf16.msra.mxu0 %v1897_v35  ;;  %2642 = vmatpush1.bf16.msra.mxu1 %v1899_v36  ;;  %v1940_v35 = vunpack.c.l.s8.bf16 %v1540_v30  ;;  %v1537_v36 = vld [vmem:[%s4147_s19 + $0x480] sm:$0xff] }
 0x222   : > { %2315 = vmatprep.subr.bf16.mxu0 %v1902_v37  ;;  %2643 = vmatprep.subr.bf16.mxu1 %v1904_v39  ;;  %v1539_v37 = vld [vmem:[%s4147_s19 + $0x490] sm:$0xff]  ;;  %v1937_v39 = vunpack.c.l.s8.bf16 %v1537_v36 }
 0x223   : > { %v1939_v40 = vunpack.c.l.s8.bf16 %v1539_v37  ;;  %v1943_v49 = vunpack.c.h.s8.bf16 %v1539_v37 }
 0x225   : > { %2316 = vmatpush1.bf16.msra.mxu0 %v1901_v42  ;;  %2644 = vmatpush1.bf16.msra.mxu1 %v1903_v43  ;;  %v1944_v42 = vunpack.c.h.s8.bf16 %v1540_v30  ;;  %v1542_v43 = vld [vmem:[%s4147_s19 + $0x4a8] sm:$0xff]  ;;  %v1974_v30 = vunpack.c.h.s8.bf16 %v1554_v60 }
 0x226   : > { %2326 = vmatprep.subr.bf16.mxu0 %v1906_v45  ;;  %2654 = vmatprep.subr.bf16.mxu1 %v1908_v47  ;;  %v1544_v45 = vld [vmem:[%s4147_s19 + $0x4b8] sm:$0xff]  ;;  %v1941_v47 = vunpack.c.h.s8.bf16 %v1537_v36  ;;  %v1946_v44 = vunpack.c.l.s8.bf16 %v1542_v43  ;;  %v1973_v36 = vunpack.c.h.s8.bf16 %v1553_v24 }
 0x227   : > { %v1948_v54 = vunpack.c.l.s8.bf16 %v1544_v45  ;;  %v1952_v63 = vunpack.c.h.s8.bf16 %v1544_v45 }
 0x228   : > { %2318 = vmatmul.mubr.bf16.vlgmr.msra.gmra.mrb[0].mxu0 %v1383_v55  ;;  %2646 = vmatmul.mubr.bf16.vlgmr.msra.gmra.mrb[0].mxu1 %v1383_v55  ;;  %v1541_v55 = vld [vmem:[%s4147_s19 + $0x4a0] sm:$0xff] }
 0x229   : > { %2327 = vmatpush1.bf16.msra.mxu0 %v1905_v56  ;;  %2655 = vmatpush1.bf16.msra.mxu1 %v1907_v59  ;;  %v1543_v56 = vld [vmem:[%s4147_s19 + $0x4b0] sm:$0xff]  ;;  %v1945_v59 = vunpack.c.l.s8.bf16 %v1541_v55 }
 0x22a   : > { %2328 = vmatprep.subr.bf16.mxu0 %v1910_v62  ;;  %2656 = vmatprep.subr.bf16.mxu1 %v1912_v5  ;;  %v1947_v62 = vunpack.c.l.s8.bf16 %v1543_v56  ;;  %v1950_v5 = vunpack.c.h.s8.bf16 %v1542_v43 }
 0x22b   : > { %2358 = vmatprep.mubr.bf16.mxu0 %v1386_v3  ;;  %2686 = vmatprep.mubr.bf16.mxu1 %v1386_v3  ;;  %v1548_v3 = vld [vmem:[%s4147_s19 + $0x4d8] sm:$0xff] }
 0x22d   : > { %2329 = vmatpush1.bf16.msra.mxu0 %v1909_v4  ;;  %2657 = vmatpush1.bf16.msra.mxu1 %v1911_v6  ;;  %v1949_v4 = vunpack.c.h.s8.bf16 %v1541_v55  ;;  %v1951_v6 = vunpack.c.h.s8.bf16 %v1543_v56 }
 0x22e   : > { %2330 = vmatprep.subr.bf16.mxu0 %v1914_v11  ;;  %2658 = vmatprep.subr.bf16.mxu1 %v1916_v9  ;;  %v1954_v11 = vunpack.c.l.s8.bf16 %v1546_v0  ;;  %v1956_v9 = vunpack.c.l.s8.bf16 %v1548_v3 }
 0x231   : > { %2331 = vmatpush1.bf16.msra.mxu0 %v1913_v51  ;;  %2659 = vmatpush1.bf16.msra.mxu1 %v1915_v12  ;;  %v1953_v51 = vunpack.c.l.s8.bf16 %v1545_v25  ;;  %v1955_v12 = vunpack.c.l.s8.bf16 %v1547_v10 }
 0x232   : > { %2332 = vmatprep.subr.bf16.mxu0 %v1918_v8  ;;  %2660 = vmatprep.subr.bf16.mxu1 %v1920_v18  ;;  %v1958_v8 = vunpack.c.h.s8.bf16 %v1546_v0  ;;  %v1960_v18 = vunpack.c.h.s8.bf16 %v1548_v3 }
 0x235   : > { %2333 = vmatpush1.bf16.msra.mxu0 %v1917_v14  ;;  %2661 = vmatpush1.bf16.msra.mxu1 %v1919_v15  ;;  %v1957_v14 = vunpack.c.h.s8.bf16 %v1545_v25  ;;  %v1959_v15 = vunpack.c.h.s8.bf16 %v1547_v10 }
 0x236   : > { %2334 = vmatprep.subr.bf16.mxu0 %v1922_v48  ;;  %2662 = vmatprep.subr.bf16.mxu1 %v1924_v52  ;;  %v1962_v48 = vunpack.c.l.s8.bf16 %v1550_v7  ;;  %v1964_v52 = vunpack.c.l.s8.bf16 %v1552_v13 }
 0x239   : > { %2335 = vmatpush1.bf16.msra.mxu0 %v1921_v17  ;;  %2663 = vmatpush1.bf16.msra.mxu1 %v1923_v57  ;;  %v1327_v17 = vcombine.high %v4608_v34, %v4608_v34  ;;  %v1961_v57 = vunpack.c.l.s8.bf16 %v1549_v16  ;;  %v1970_v34 = vunpack.c.l.s8.bf16 %v1554_v60 }
 0x23a   : > { %2336 = vmatprep.subr.bf16.mxu0 %v1926_v58  ;;  %2664 = vmatprep.subr.bf16.mxu1 %v1928_v19  ;;  %v1963_v58 = vunpack.c.l.s8.bf16 %v1551_v53  ;;  %v1966_v19 = vunpack.c.h.s8.bf16 %v1550_v7 }
 0x23d   : > { %2337 = vmatpush1.bf16.msra.mxu0 %v1925_v22  ;;  %2665 = vmatpush1.bf16.msra.mxu1 %v1927_v61  ;;  %v1556_v22 = vld [vmem:[%s4147_s19 + $0x518] sm:$0xff]  ;;  %v4655_v61 = vrot.slane %v1327_v17, %v4458_v50 }
 0x23e   : > { %2338 = vmatprep.subr.bf16.mxu0 %v1930_v21  ;;  %2666 = vmatprep.subr.bf16.mxu1 %v1932_v1  ;;  %v1965_v21 = vunpack.c.h.s8.bf16 %v1549_v16  ;;  %v1967_v1 = vunpack.c.h.s8.bf16 %v1551_v53  ;;  %v1972_v23 = vunpack.c.l.s8.bf16 %v1556_v22 }
 0x241   : > { %2339 = vmatpush1.bf16.msra.mxu0 %v1929_v2  ;;  %2667 = vmatpush1.bf16.msra.mxu1 %v1931_v26  ;;  %v1555_v2 = vld [vmem:[%s4147_s19 + $0x510] sm:$0xff]  ;;  %v1343_v26 = vcombine.high %v4655_v61, %v4655_v61 }
 0x242   : > { %2340 = vmatprep.subr.bf16.mxu0 %v1934_v27  ;;  %2668 = vmatprep.subr.bf16.mxu1 %v1936_v28  ;;  %v1385_v27 = vpack.c.bf16 %v4614_v41, %v4614_v41  ;;  %v1969_v28 = vunpack.c.l.s8.bf16 %v1553_v24  ;;  %v1971_v29 = vunpack.c.l.s8.bf16 %v1555_v2  ;;  %v1975_v37 = vunpack.c.h.s8.bf16 %v1555_v2 }
 0x245   : > { %2341 = vmatpush1.bf16.msra.mxu0 %v1933_v31  ;;  %2669 = vmatpush1.bf16.msra.mxu1 %v1935_v32  ;;  %v1976_v31 = vunpack.c.h.s8.bf16 %v1556_v22  ;;  %v1558_v32 = vld [vmem:[%s4147_s19 + $0x528] sm:$0xff] }
 0x246   : > { %2342 = vmatprep.subr.bf16.mxu0 %v1938_v33  ;;  %2670 = vmatprep.subr.bf16.mxu1 %v1940_v35  ;;  %v1560_v33 = vld [vmem:[%s4147_s19 + $0x538] sm:$0xff]  ;;  %v1388_v35 = vpack.c.bf16 %v1343_v26, %v1343_v26  ;;  %v1978_v41 = vunpack.c.l.s8.bf16 %v1558_v32  ;;  %v1982_v45 = vunpack.c.h.s8.bf16 %v1558_v32  ;;  %v1573_v26 = vld [vmem:[%s4147_s19 + $0x5a0] sm:$0xff]  ;;  %v1578_v32 = vld [vmem:[%s4147_s19 + $0x5c8] sm:$0xff] }
 0x249   : > { %2343 = vmatpush1.bf16.msra.mxu0 %v1937_v39  ;;  %2671 = vmatpush1.bf16.msra.mxu1 %v1939_v40  ;;  %v1980_v39 = vunpack.c.l.s8.bf16 %v1560_v33  ;;  %v1557_v40 = vld [vmem:[%s4147_s19 + $0x520] sm:$0xff] }
 0x24a   : > { %2344 = vmatprep.subr.bf16.mxu0 %v1942_v46  ;;  %2672 = vmatprep.subr.bf16.mxu1 %v1944_v42  ;;  %v1559_v46 = vld [vmem:[%s4147_s19 + $0x530] sm:$0xff]  ;;  %v1977_v42 = vunpack.c.l.s8.bf16 %v1557_v40 }
 0x24b   : > { %v1979_v43 = vunpack.c.l.s8.bf16 %v1559_v46  ;;  %v1983_v55 = vunpack.c.h.s8.bf16 %v1559_v46 }
 0x24d   : > { %2345 = vmatpush1.bf16.msra.mxu0 %v1941_v47  ;;  %2673 = vmatpush1.bf16.msra.mxu1 %v1943_v49  ;;  %v1984_v47 = vunpack.c.h.s8.bf16 %v1560_v33  ;;  %v1562_v49 = vld [vmem:[%s4147_s19 + $0x548] sm:$0xff]  ;;  %v1580_v33 = vld [vmem:[%s4147_s19 + $0x5d8] sm:$0xff] }
 0x24e   : > { %2346 = vmatprep.subr.bf16.mxu0 %v1946_v44  ;;  %2674 = vmatprep.subr.bf16.mxu1 %v1948_v54  ;;  %v1564_v44 = vld [vmem:[%s4147_s19 + $0x558] sm:$0xff]  ;;  %v1981_v54 = vunpack.c.h.s8.bf16 %v1557_v40  ;;  %v1986_v56 = vunpack.c.l.s8.bf16 %v1562_v49  ;;  %v1990_v3 = vunpack.c.h.s8.bf16 %v1562_v49  ;;  %v1579_v40 = vld [vmem:[%s4147_s19 + $0x5d0] sm:$0xff] }
 0x24f   : > { %v1584_v49 = vld [vmem:[%s4147_s19 + $0x5f8] sm:$0xff] }
 0x251   : > { %2347 = vmatpush1.bf16.msra.mxu0 %v1945_v59  ;;  %2675 = vmatpush1.bf16.msra.mxu1 %v1947_v62  ;;  %v1988_v59 = vunpack.c.l.s8.bf16 %v1564_v44  ;;  %v1561_v62 = vld [vmem:[%s4147_s19 + $0x540] sm:$0xff] }
 0x252   : > { %2348 = vmatprep.subr.bf16.mxu0 %v1950_v5  ;;  %2676 = vmatprep.subr.bf16.mxu1 %v1952_v63  ;;  %v1563_v5 = vld [vmem:[%s4147_s19 + $0x550] sm:$0xff]  ;;  %v1985_v63 = vunpack.c.l.s8.bf16 %v1561_v62 }
 0x253   : > { %v1987_v0 = vunpack.c.l.s8.bf16 %v1563_v5  ;;  %v1991_v25 = vunpack.c.h.s8.bf16 %v1563_v5  ;;  %v4692_v5 = vld [vmem:[%s4450_s26 + $0x18] sm:$0xff] }
 0x255   : > { %2349 = vmatpush1.bf16.msra.mxu0 %v1949_v4  ;;  %2677 = vmatpush1.bf16.msra.mxu1 %v1951_v6  ;;  %v1992_v4 = vunpack.c.h.s8.bf16 %v1564_v44  ;;  %v1566_v6 = vld [vmem:[%s4147_s19 + $0x568] sm:$0xff] }
 0x256   : > { %2350 = vmatprep.subr.bf16.mxu0 %v1954_v11  ;;  %2678 = vmatprep.subr.bf16.mxu1 %v1956_v9  ;;  %v1568_v11 = vld [vmem:[%s4147_s19 + $0x578] sm:$0xff]  ;;  %v1989_v9 = vunpack.c.h.s8.bf16 %v1561_v62  ;;  %v1994_v10 = vunpack.c.l.s8.bf16 %v1566_v6  ;;  %v1998_v13 = vunpack.c.h.s8.bf16 %v1566_v6  ;;  %v1583_v62 = vld [vmem:[%s4147_s19 + $0x5f0] sm:$0xff]  ;;  %v1586_v6 = vld [vmem:[%s4147_s19 + $0x608] sm:$0xff] }
 0x259   : > { %2351 = vmatpush1.bf16.msra.mxu0 %v1953_v51  ;;  %2679 = vmatpush1.bf16.msra.mxu1 %v1955_v12  ;;  %v1996_v51 = vunpack.c.l.s8.bf16 %v1568_v11  ;;  %v1565_v12 = vld [vmem:[%s4147_s19 + $0x560] sm:$0xff] }
 0x25a   : > { %2352 = vmatprep.subr.bf16.mxu0 %v1958_v8  ;;  %2680 = vmatprep.subr.bf16.mxu1 %v1960_v18  ;;  %v1567_v8 = vld [vmem:[%s4147_s19 + $0x570] sm:$0xff]  ;;  %v1993_v18 = vunpack.c.l.s8.bf16 %v1565_v12 }
 0x25b   : > { %v1995_v7 = vunpack.c.l.s8.bf16 %v1567_v8  ;;  %v1999_v16 = vunpack.c.h.s8.bf16 %v1567_v8  ;;  %v1585_v8 = vld [vmem:[%s4147_s19 + $0x600] sm:$0xff] }
 0x25d   : > { %2353 = vmatpush1.bf16.msra.mxu0 %v1957_v14  ;;  %2681 = vmatpush1.bf16.msra.mxu1 %v1959_v15  ;;  %v2000_v14 = vunpack.c.h.s8.bf16 %v1568_v11  ;;  %v1570_v15 = vld [vmem:[%s4147_s19 + $0x588] sm:$0xff]  ;;  %v1588_v11 = vld [vmem:[%s4147_s19 + $0x618] sm:$0xff] }
 0x25e   : > { %2354 = vmatprep.subr.bf16.mxu0 %v1962_v48  ;;  %2682 = vmatprep.subr.bf16.mxu1 %v1964_v52  ;;  %v1572_v48 = vld [vmem:[%s4147_s19 + $0x598] sm:$0xff]  ;;  %v1997_v52 = vunpack.c.h.s8.bf16 %v1565_v12  ;;  %v2002_v53 = vunpack.c.l.s8.bf16 %v1570_v15  ;;  %v2006_v60 = vunpack.c.h.s8.bf16 %v1570_v15  ;;  %v2036_v12 = vunpack.c.l.s8.bf16 %v1588_v11 }
 0x25f   : > { %v2004_v17 = vunpack.c.l.s8.bf16 %v1572_v48  ;;  %v2008_v22 = vunpack.c.h.s8.bf16 %v1572_v48  ;;  %v2038_v48 = vunpack.c.h.s8.bf16 %v1586_v6 }
 0x261   : > { %2355 = vmatpush1.bf16.msra.mxu0 %v1961_v57  ;;  %2683 = vmatpush1.bf16.msra.mxu1 %v1963_v58  ;;  %v1569_v57 = vld [vmem:[%s4147_s19 + $0x580] sm:$0xff]  ;;  %v1571_v58 = vld [vmem:[%s4147_s19 + $0x590] sm:$0xff] }
 0x262   : > { %2356 = vmatprep.subr.bf16.mxu0 %v1966_v19  ;;  %2684 = vmatprep.subr.bf16.mxu1 %v1968_v20  ;;  %v2001_v19 = vunpack.c.l.s8.bf16 %v1569_v57  ;;  %v2003_v20 = vunpack.c.l.s8.bf16 %v1571_v58 }
 0x265   : > { %2357 = vmatpush1.bf16.msra.mxu0 %v1965_v21  ;;  %2685 = vmatpush1.bf16.msra.mxu1 %v1967_v1  ;;  %v1574_v21 = vld [vmem:[%s4147_s19 + $0x5a8] sm:$0xff]  ;;  %v1576_v1 = vld [vmem:[%s4147_s19 + $0x5b8] sm:$0xff] }
 0x266   : > { %2367 = vmatprep.subr.bf16.mxu0 %v1970_v34  ;;  %2695 = vmatprep.subr.bf16.mxu1 %v1972_v23  ;;  %v2005_v34 = vunpack.c.h.s8.bf16 %v1569_v57  ;;  %v2007_v23 = vunpack.c.h.s8.bf16 %v1571_v58  ;;  %v2010_v24 = vunpack.c.l.s8.bf16 %v1574_v21  ;;  %v2012_v2 = vunpack.c.l.s8.bf16 %v1576_v1 }
 0x267   : > { %v2037_v57 = vunpack.c.h.s8.bf16 %v1585_v8 }
 0x268   : > { %2359 = vmatmul.mubr.bf16.vlgmr.msra.gmra.mrb[0].mxu0 %v1385_v27  ;;  %2687 = vmatmul.mubr.bf16.vlgmr.msra.gmra.mrb[0].mxu1 %v1385_v27  ;;  %v1575_v27 = vld [vmem:[%s4147_s19 + $0x5b0] sm:$0xff] }
 0x269   : > { %2368 = vmatpush1.bf16.msra.mxu0 %v1969_v28  ;;  %2696 = vmatpush1.bf16.msra.mxu1 %v1971_v29  ;;  %v2009_v28 = vunpack.c.l.s8.bf16 %v1573_v26  ;;  %v2011_v29 = vunpack.c.l.s8.bf16 %v1575_v27 }
 0x26a   : > { %2369 = vmatprep.subr.bf16.mxu0 %v1974_v30  ;;  %2697 = vmatprep.subr.bf16.mxu1 %v1976_v31  ;;  %v2014_v30 = vunpack.c.h.s8.bf16 %v1574_v21  ;;  %v2016_v31 = vunpack.c.h.s8.bf16 %v1576_v1 }
 0x26b   : > { %2399 = vmatprep.mubr.bf16.mxu0 %v1388_v35  ;;  %2727 = vmatprep.mubr.bf16.mxu1 %v1388_v35  ;;  %v2013_v35 = vunpack.c.h.s8.bf16 %v1573_v26 }
 0x26d   : > { %2370 = vmatpush1.bf16.msra.mxu0 %v1973_v36  ;;  %2698 = vmatpush1.bf16.msra.mxu1 %v1975_v37  ;;  %v2015_v36 = vunpack.c.h.s8.bf16 %v1575_v27  ;;  %v2018_v37 = vunpack.c.l.s8.bf16 %v1578_v32 }
 0x26e   : > { %2371 = vmatprep.subr.bf16.mxu0 %v1978_v41  ;;  %2699 = vmatprep.subr.bf16.mxu1 %v1980_v39  ;;  %v2020_v41 = vunpack.c.l.s8.bf16 %v1580_v33  ;;  %v1577_v39 = vld [vmem:[%s4147_s19 + $0x5c0] sm:$0xff] }
 0x26f   : > { %v2017_v46 = vunpack.c.l.s8.bf16 %v1577_v39  ;;  %v2021_v44 = vunpack.c.h.s8.bf16 %v1577_v39 }
 0x271   : > { %2372 = vmatpush1.bf16.msra.mxu0 %v1977_v42  ;;  %2700 = vmatpush1.bf16.msra.mxu1 %v1979_v43  ;;  %v2019_v42 = vunpack.c.l.s8.bf16 %v1579_v40  ;;  %v2022_v43 = vunpack.c.h.s8.bf16 %v1578_v32 }
 0x272   : > { %2373 = vmatprep.subr.bf16.mxu0 %v1982_v45  ;;  %2701 = vmatprep.subr.bf16.mxu1 %v1984_v47  ;;  %v2024_v45 = vunpack.c.h.s8.bf16 %v1580_v33  ;;  %v1582_v47 = vld [vmem:[%s4147_s19 + $0x5e8] sm:$0xff] }
 0x275   : > { %2374 = vmatpush1.bf16.msra.mxu0 %v1981_v54  ;;  %2702 = vmatpush1.bf16.msra.mxu1 %v1983_v55  ;;  %v2023_v54 = vunpack.c.h.s8.bf16 %v1579_v40  ;;  %v2026_v55 = vunpack.c.l.s8.bf16 %v1582_v47 }
 0x276   : > { %2375 = vmatprep.subr.bf16.mxu0 %v1986_v56  ;;  %2703 = vmatprep.subr.bf16.mxu1 %v1988_v59  ;;  %v2028_v56 = vunpack.c.l.s8.bf16 %v1584_v49  ;;  %v1581_v59 = vld [vmem:[%s4147_s19 + $0x5e0] sm:$0xff] }
 0x279   : > { %2376 = vmatpush1.bf16.msra.mxu0 %v1985_v63  ;;  %2704 = vmatpush1.bf16.msra.mxu1 %v1987_v0  ;;  %v2025_v63 = vunpack.c.l.s8.bf16 %v1581_v59  ;;  %v2027_v0 = vunpack.c.l.s8.bf16 %v1583_v62 }
 0x27a   : > { %2377 = vmatprep.subr.bf16.mxu0 %v1990_v3  ;;  %2705 = vmatprep.subr.bf16.mxu1 %v1992_v4  ;;  %v2030_v3 = vunpack.c.h.s8.bf16 %v1582_v47  ;;  %v2032_v4 = vunpack.c.h.s8.bf16 %v1584_v49 }
 0x27d   : > { %2378 = vmatpush1.bf16.msra.mxu0 %v1989_v9  ;;  %2706 = vmatpush1.bf16.msra.mxu1 %v1991_v25  ;;  %v4698_v9 = vrot.slane %v4692_v5, %v4458_v50  ;;  %v2029_v25 = vunpack.c.h.s8.bf16 %v1581_v59 }
 0x27e   : > { %2379 = vmatprep.subr.bf16.mxu0 %v1994_v10  ;;  %2707 = vmatprep.subr.bf16.mxu1 %v1996_v51  ;;  %v2031_v10 = vunpack.c.h.s8.bf16 %v1583_v62  ;;  %v2034_v51 = vunpack.c.l.s8.bf16 %v1586_v6 }
 0x281   : > { %2380 = vmatpush1.bf16.msra.mxu0 %v1993_v18  ;;  %2708 = vmatpush1.bf16.msra.mxu1 %v1995_v7  ;;  %v1587_v18 = vld [vmem:[%s4147_s19 + $0x610] sm:$0xff]  ;;  %v1359_v7 = vcombine.high %v4698_v9, %v4698_v9 }
 0x282   : > { %2381 = vmatprep.subr.bf16.mxu0 %v1998_v13  ;;  %2709 = vmatprep.subr.bf16.mxu1 %v2000_v14  ;;  %v1387_v13 = vpack.c.bf16 %v4655_v61, %v4655_v61  ;;  %v2033_v14 = vunpack.c.l.s8.bf16 %v1585_v8  ;;  %v2035_v15 = vunpack.c.l.s8.bf16 %v1587_v18  ;;  %v2039_v58 = vunpack.c.h.s8.bf16 %v1587_v18 }
 0x285   : > { %2382 = vmatpush1.bf16.msra.mxu0 %v1997_v52  ;;  %2710 = vmatpush1.bf16.msra.mxu1 %v1999_v16  ;;  %v2040_v52 = vunpack.c.h.s8.bf16 %v1588_v11  ;;  %v1590_v16 = vld [vmem:[%s4147_s19 + $0x628] sm:$0xff] }
 0x286   : > { %2383 = vmatprep.subr.bf16.mxu0 %v2002_v53  ;;  %2711 = vmatprep.subr.bf16.mxu1 %v2004_v17  ;;  %v1592_v53 = vld [vmem:[%s4147_s19 + $0x638] sm:$0xff]  ;;  %v1390_v17 = vpack.c.bf16 %v1359_v7, %v1359_v7  ;;  %v2042_v61 = vunpack.c.l.s8.bf16 %v1590_v16  ;;  %v2046_v1 = vunpack.c.h.s8.bf16 %v1590_v16 }
 0x289   : > { %2384 = vmatpush1.bf16.msra.mxu0 %v2001_v19  ;;  %2712 = vmatpush1.bf16.msra.mxu1 %v2003_v20  ;;  %v2044_v19 = vunpack.c.l.s8.bf16 %v1592_v53  ;;  %v1589_v20 = vld [vmem:[%s4147_s19 + $0x620] sm:$0xff] }
 0x28a   : > { %2385 = vmatprep.subr.bf16.mxu0 %v2006_v60  ;;  %2713 = vmatprep.subr.bf16.mxu1 %v2008_v22  ;;  %v1591_v60 = vld [vmem:[%s4147_s19 + $0x630] sm:$0xff]  ;;  %v2041_v22 = vunpack.c.l.s8.bf16 %v1589_v20 }
 0x28b   : > { %v2043_v21 = vunpack.c.l.s8.bf16 %v1591_v60  ;;  %v2047_v26 = vunpack.c.h.s8.bf16 %v1591_v60  ;;  %v1611_v60 = vld [vmem:[%s4147_s19 + $0x6d0] sm:$0xff] }
 0x28d   : > { %2386 = vmatpush1.bf16.msra.mxu0 %v2005_v34  ;;  %2714 = vmatpush1.bf16.msra.mxu1 %v2007_v23  ;;  %v2048_v34 = vunpack.c.h.s8.bf16 %v1592_v53  ;;  %v1594_v23 = vld [vmem:[%s4147_s19 + $0x648] sm:$0xff] }
 0x28e   : > { %2387 = vmatprep.subr.bf16.mxu0 %v2010_v24  ;;  %2715 = vmatprep.subr.bf16.mxu1 %v2012_v2  ;;  %v1596_v24 = vld [vmem:[%s4147_s19 + $0x658] sm:$0xff]  ;;  %v2045_v2 = vunpack.c.h.s8.bf16 %v1589_v20  ;;  %v2050_v27 = vunpack.c.l.s8.bf16 %v1594_v23  ;;  %v2054_v33 = vunpack.c.h.s8.bf16 %v1594_v23  ;;  %v1610_v53 = vld [vmem:[%s4147_s19 + $0x6c8] sm:$0xff]  ;;  %v1609_v20 = vld [vmem:[%s4147_s19 + $0x6c0] sm:$0xff] }
 0x28f   : > { %v1614_v23 = vld [vmem:[%s4147_s19 + $0x6e8] sm:$0xff] }
 0x291   : > { %2388 = vmatpush1.bf16.msra.mxu0 %v2009_v28  ;;  %2716 = vmatpush1.bf16.msra.mxu1 %v2011_v29  ;;  %v2052_v28 = vunpack.c.l.s8.bf16 %v1596_v24  ;;  %v1593_v29 = vld [vmem:[%s4147_s19 + $0x640] sm:$0xff] }
 0x292   : > { %2389 = vmatprep.subr.bf16.mxu0 %v2014_v30  ;;  %2717 = vmatprep.subr.bf16.mxu1 %v2016_v31  ;;  %v1595_v30 = vld [vmem:[%s4147_s19 + $0x650] sm:$0xff]  ;;  %v2049_v31 = vunpack.c.l.s8.bf16 %v1593_v29 }
 0x293   : > { %v2051_v32 = vunpack.c.l.s8.bf16 %v1595_v30  ;;  %v2055_v39 = vunpack.c.h.s8.bf16 %v1595_v30  ;;  %v1615_v30 = vld [vmem:[%s4147_s19 + $0x6f0] sm:$0xff] }
 0x295   : > { %2390 = vmatpush1.bf16.msra.mxu0 %v2013_v35  ;;  %2718 = vmatpush1.bf16.msra.mxu1 %v2015_v36  ;;  %v2056_v35 = vunpack.c.h.s8.bf16 %v1596_v24  ;;  %v1598_v36 = vld [vmem:[%s4147_s19 + $0x668] sm:$0xff]  ;;  %v1616_v24 = vld [vmem:[%s4147_s19 + $0x6f8] sm:$0xff] }
 0x296   : > { %2391 = vmatprep.subr.bf16.mxu0 %v2018_v37  ;;  %2719 = vmatprep.subr.bf16.mxu1 %v2020_v41  ;;  %v1600_v37 = vld [vmem:[%s4147_s19 + $0x678] sm:$0xff]  ;;  %v2053_v41 = vunpack.c.h.s8.bf16 %v1593_v29  ;;  %v2058_v40 = vunpack.c.l.s8.bf16 %v1598_v36  ;;  %v2062_v49 = vunpack.c.h.s8.bf16 %v1598_v36  ;;  %v1613_v29 = vld [vmem:[%s4147_s19 + $0x6e0] sm:$0xff]  ;;  %v2096_v36 = vunpack.c.h.s8.bf16 %v1616_v24 }
 0x299   : > { %2392 = vmatpush1.bf16.msra.mxu0 %v2017_v46  ;;  %2720 = vmatpush1.bf16.msra.mxu1 %v2019_v42  ;;  %v2060_v46 = vunpack.c.l.s8.bf16 %v1600_v37  ;;  %v1597_v42 = vld [vmem:[%s4147_s19 + $0x660] sm:$0xff] }
 0x29a   : > { %2393 = vmatprep.subr.bf16.mxu0 %v2022_v43  ;;  %2721 = vmatprep.subr.bf16.mxu1 %v2024_v45  ;;  %v1599_v43 = vld [vmem:[%s4147_s19 + $0x670] sm:$0xff]  ;;  %v2057_v45 = vunpack.c.l.s8.bf16 %v1597_v42 }
 0x29b   : > { %v2059_v47 = vunpack.c.l.s8.bf16 %v1599_v43  ;;  %v2063_v59 = vunpack.c.h.s8.bf16 %v1599_v43  ;;  %v1617_v43 = vld [vmem:[%s4147_s19 + $0x700] sm:$0xff] }
 0x29d   : > { %2394 = vmatpush1.bf16.msra.mxu0 %v2021_v44  ;;  %2722 = vmatpush1.bf16.msra.mxu1 %v2023_v54  ;;  %v2064_v44 = vunpack.c.h.s8.bf16 %v1600_v37  ;;  %v1602_v54 = vld [vmem:[%s4147_s19 + $0x688] sm:$0xff] }
 0x29e   : > { %2395 = vmatprep.subr.bf16.mxu0 %v2026_v55  ;;  %2723 = vmatprep.subr.bf16.mxu1 %v2028_v56  ;;  %v1604_v55 = vld [vmem:[%s4147_s19 + $0x698] sm:$0xff]  ;;  %v2061_v56 = vunpack.c.h.s8.bf16 %v1597_v42  ;;  %v2066_v62 = vunpack.c.l.s8.bf16 %v1602_v54  ;;  %v2070_v11 = vunpack.c.h.s8.bf16 %v1602_v54  ;;  %v1618_v37 = vld [vmem:[%s4147_s19 + $0x708] sm:$0xff] }
 0x2a1   : > { %2396 = vmatpush1.bf16.msra.mxu0 %v2025_v63  ;;  %2724 = vmatpush1.bf16.msra.mxu1 %v2027_v0  ;;  %v2068_v63 = vunpack.c.l.s8.bf16 %v1604_v55  ;;  %v1601_v0 = vld [vmem:[%s4147_s19 + $0x680] sm:$0xff] }
 0x2a2   : > { %2397 = vmatprep.subr.bf16.mxu0 %v2030_v3  ;;  %2725 = vmatprep.subr.bf16.mxu1 %v2032_v4  ;;  %v1603_v3 = vld [vmem:[%s4147_s19 + $0x690] sm:$0xff]  ;;  %v2065_v4 = vunpack.c.l.s8.bf16 %v1601_v0 }
 0x2a3   : > { %v2067_v6 = vunpack.c.l.s8.bf16 %v1603_v3  ;;  %v2071_v8 = vunpack.c.h.s8.bf16 %v1603_v3 }
 0x2a5   : > { %2398 = vmatpush1.bf16.msra.mxu0 %v2029_v25  ;;  %2726 = vmatpush1.bf16.msra.mxu1 %v2031_v10  ;;  %v2072_v25 = vunpack.c.h.s8.bf16 %v1604_v55  ;;  %v1606_v10 = vld [vmem:[%s4147_s19 + $0x6a8] sm:$0xff]  ;;  %v2102_v55 = vunpack.c.h.s8.bf16 %v1618_v37 }
 0x2a6   : > { %2408 = vmatprep.subr.bf16.mxu0 %v2034_v51  ;;  %2736 = vmatprep.subr.bf16.mxu1 %v2036_v12  ;;  %v1608_v51 = vld [vmem:[%s4147_s19 + $0x6b8] sm:$0xff]  ;;  %v2069_v12 = vunpack.c.h.s8.bf16 %v1601_v0  ;;  %v2074_v18 = vunpack.c.l.s8.bf16 %v1606_v10  ;;  %v2101_v0 = vunpack.c.h.s8.bf16 %v1617_v43 }
 0x2a7   : > { %v2076_v7 = vunpack.c.l.s8.bf16 %v1608_v51  ;;  %v2080_v16 = vunpack.c.h.s8.bf16 %v1608_v51 }
 0x2a8   : > { %2400 = vmatmul.mubr.bf16.vlgmr.msra.gmra.mrb[0].mxu0 %v1387_v13  ;;  %2728 = vmatmul.mubr.bf16.vlgmr.msra.gmra.mrb[0].mxu1 %v1387_v13  ;;  %v1605_v13 = vld [vmem:[%s4147_s19 + $0x6a0] sm:$0xff] }
 0x2a9   : > { %2409 = vmatpush1.bf16.msra.mxu0 %v2033_v14  ;;  %2737 = vmatpush1.bf16.msra.mxu1 %v2035_v15  ;;  %v1607_v14 = vld [vmem:[%s4147_s19 + $0x6b0] sm:$0xff]  ;;  %v2073_v15 = vunpack.c.l.s8.bf16 %v1605_v13 }
 0x2aa   : > { %2410 = vmatprep.subr.bf16.mxu0 %v2038_v48  ;;  %2738 = vmatprep.subr.bf16.mxu1 %v2040_v52  ;;  %v2075_v48 = vunpack.c.l.s8.bf16 %v1607_v14  ;;  %v2078_v52 = vunpack.c.h.s8.bf16 %v1606_v10 }
 0x2ab   : > { %2440 = vmatprep.mubr.bf16.mxu0 %v1390_v17  ;;  %2768 = vmatprep.mubr.bf16.mxu1 %v1390_v17  ;;  %v1612_v17 = vld [vmem:[%s4147_s19 + $0x6d8] sm:$0xff] }
 0x2ad   : > { %2411 = vmatpush1.bf16.msra.mxu0 %v2037_v57  ;;  %2739 = vmatpush1.bf16.msra.mxu1 %v2039_v58  ;;  %v2077_v57 = vunpack.c.h.s8.bf16 %v1605_v13  ;;  %v2079_v58 = vunpack.c.h.s8.bf16 %v1607_v14 }
 0x2ae   : > { %2412 = vmatprep.subr.bf16.mxu0 %v2042_v61  ;;  %2740 = vmatprep.subr.bf16.mxu1 %v2044_v19  ;;  %v2082_v61 = vunpack.c.l.s8.bf16 %v1610_v53  ;;  %v2084_v19 = vunpack.c.l.s8.bf16 %v1612_v17 }
 0x2b1   : > { %2413 = vmatpush1.bf16.msra.mxu0 %v2041_v22  ;;  %2741 = vmatpush1.bf16.msra.mxu1 %v2043_v21  ;;  %v2081_v22 = vunpack.c.l.s8.bf16 %v1609_v20  ;;  %v2083_v21 = vunpack.c.l.s8.bf16 %v1611_v60 }
 0x2b2   : > { %2414 = vmatprep.subr.bf16.mxu0 %v2046_v1  ;;  %2742 = vmatprep.subr.bf16.mxu1 %v2048_v34  ;;  %v2086_v1 = vunpack.c.h.s8.bf16 %v1610_v53  ;;  %v2088_v34 = vunpack.c.h.s8.bf16 %v1612_v17 }
 0x2b5   : > { %2415 = vmatpush1.bf16.msra.mxu0 %v2045_v2  ;;  %2743 = vmatpush1.bf16.msra.mxu1 %v2047_v26  ;;  %v2085_v2 = vunpack.c.h.s8.bf16 %v1609_v20  ;;  %v2087_v26 = vunpack.c.h.s8.bf16 %v1611_v60 }
 0x2b6   : > { %2416 = vmatprep.subr.bf16.mxu0 %v2050_v27  ;;  %2744 = vmatprep.subr.bf16.mxu1 %v2052_v28  ;;  %v2090_v27 = vunpack.c.l.s8.bf16 %v1614_v23  ;;  %v2092_v28 = vunpack.c.l.s8.bf16 %v1616_v24 }
 0x2b9   : > { %2417 = vmatpush1.bf16.msra.mxu0 %v2049_v31  ;;  %2745 = vmatpush1.bf16.msra.mxu1 %v2051_v32  ;;  %v1344_v31 = vcombine.high %v4692_v5, %v4692_v5  ;;  %v2089_v32 = vunpack.c.l.s8.bf16 %v1613_v29  ;;  %v2098_v5 = vunpack.c.l.s8.bf16 %v1618_v37 }
 0x2ba   : > { %2418 = vmatprep.subr.bf16.mxu0 %v2054_v33  ;;  %2746 = vmatprep.subr.bf16.mxu1 %v2056_v35  ;;  %v2091_v33 = vunpack.c.l.s8.bf16 %v1615_v30  ;;  %v2094_v35 = vunpack.c.h.s8.bf16 %v1614_v23 }
 0x2bd   : > { %2419 = vmatpush1.bf16.msra.mxu0 %v2053_v41  ;;  %2747 = vmatpush1.bf16.msra.mxu1 %v2055_v39  ;;  %v1620_v41 = vld [vmem:[%s4147_s19 + $0x718] sm:$0xff]  ;;  %v4739_v39 = vrot.slane %v1344_v31, %v4458_v50 }
 0x2be   : > { %2420 = vmatprep.subr.bf16.mxu0 %v2058_v40  ;;  %2748 = vmatprep.subr.bf16.mxu1 %v2060_v46  ;;  %v2093_v40 = vunpack.c.h.s8.bf16 %v1613_v29  ;;  %v2095_v46 = vunpack.c.h.s8.bf16 %v1615_v30  ;;  %v2100_v42 = vunpack.c.l.s8.bf16 %v1620_v41 }
 0x2c1   : > { %2421 = vmatpush1.bf16.msra.mxu0 %v2057_v45  ;;  %2749 = vmatpush1.bf16.msra.mxu1 %v2059_v47  ;;  %v1619_v45 = vld [vmem:[%s4147_s19 + $0x710] sm:$0xff]  ;;  %v1360_v47 = vcombine.high %v4739_v39, %v4739_v39 }
 0x2c2   : > { %2422 = vmatprep.subr.bf16.mxu0 %v2062_v49  ;;  %2750 = vmatprep.subr.bf16.mxu1 %v2064_v44  ;;  %v1389_v49 = vpack.c.bf16 %v4698_v9, %v4698_v9  ;;  %v2097_v44 = vunpack.c.l.s8.bf16 %v1617_v43  ;;  %v2099_v54 = vunpack.c.l.s8.bf16 %v1619_v45  ;;  %v2103_v3 = vunpack.c.h.s8.bf16 %v1619_v45 }
 0x2c5   : > { %2423 = vmatpush1.bf16.msra.mxu0 %v2061_v56  ;;  %2751 = vmatpush1.bf16.msra.mxu1 %v2063_v59  ;;  %v2104_v56 = vunpack.c.h.s8.bf16 %v1620_v41  ;;  %v1622_v59 = vld [vmem:[%s4147_s19 + $0x728] sm:$0xff] }
 0x2c6   : > { %2424 = vmatprep.subr.bf16.mxu0 %v2066_v62  ;;  %2752 = vmatprep.subr.bf16.mxu1 %v2068_v63  ;;  %v1624_v62 = vld [vmem:[%s4147_s19 + $0x738] sm:$0xff]  ;;  %v1392_v63 = vpack.c.bf16 %v1360_v47, %v1360_v47  ;;  %v2106_v9 = vunpack.c.l.s8.bf16 %v1622_v59  ;;  %v2110_v51 = vunpack.c.h.s8.bf16 %v1622_v59  ;;  %v1637_v47 = vld [vmem:[%s4147_s19 + $0x7a0] sm:$0xff]  ;;  %v1642_v59 = vld [vmem:[%s4147_s19 + $0x7c8] sm:$0xff] }
 0x2c9   : > { %2425 = vmatpush1.bf16.msra.mxu0 %v2065_v4  ;;  %2753 = vmatpush1.bf16.msra.mxu1 %v2067_v6  ;;  %v2108_v4 = vunpack.c.l.s8.bf16 %v1624_v62  ;;  %v1621_v6 = vld [vmem:[%s4147_s19 + $0x720] sm:$0xff] }
 0x2ca   : > { %2426 = vmatprep.subr.bf16.mxu0 %v2070_v11  ;;  %2754 = vmatprep.subr.bf16.mxu1 %v2072_v25  ;;  %v1623_v11 = vld [vmem:[%s4147_s19 + $0x730] sm:$0xff]  ;;  %v2105_v25 = vunpack.c.l.s8.bf16 %v1621_v6 }
 0x2cb   : > { %v2107_v10 = vunpack.c.l.s8.bf16 %v1623_v11  ;;  %v2111_v13 = vunpack.c.h.s8.bf16 %v1623_v11 }
 0x2cd   : > { %2427 = vmatpush1.bf16.msra.mxu0 %v2069_v12  ;;  %2755 = vmatpush1.bf16.msra.mxu1 %v2071_v8  ;;  %v2112_v12 = vunpack.c.h.s8.bf16 %v1624_v62  ;;  %v1626_v8 = vld [vmem:[%s4147_s19 + $0x748] sm:$0xff]  ;;  %v1644_v62 = vld [vmem:[%s4147_s19 + $0x7d8] sm:$0xff] }
 0x2ce   : > { %2428 = vmatprep.subr.bf16.mxu0 %v2074_v18  ;;  %2756 = vmatprep.subr.bf16.mxu1 %v2076_v7  ;;  %v1628_v18 = vld [vmem:[%s4147_s19 + $0x758] sm:$0xff]  ;;  %v2109_v7 = vunpack.c.h.s8.bf16 %v1621_v6  ;;  %v2114_v14 = vunpack.c.l.s8.bf16 %v1626_v8  ;;  %v2118_v17 = vunpack.c.h.s8.bf16 %v1626_v8  ;;  %v1643_v6 = vld [vmem:[%s4147_s19 + $0x7d0] sm:$0xff] }
 0x2cf   : > { %v1648_v8 = vld [vmem:[%s4147_s19 + $0x7f8] sm:$0xff] }
 0x2d1   : > { %2429 = vmatpush1.bf16.msra.mxu0 %v2073_v15  ;;  %2757 = vmatpush1.bf16.msra.mxu1 %v2075_v48  ;;  %v2116_v15 = vunpack.c.l.s8.bf16 %v1628_v18  ;;  %v1625_v48 = vld [vmem:[%s4147_s19 + $0x740] sm:$0xff] }
 0x2d2   : > { %2430 = vmatprep.subr.bf16.mxu0 %v2078_v52  ;;  %2758 = vmatprep.subr.bf16.mxu1 %v2080_v16  ;;  %v1627_v52 = vld [vmem:[%s4147_s19 + $0x750] sm:$0xff]  ;;  %v2113_v16 = vunpack.c.l.s8.bf16 %v1625_v48 }
 0x2d3   : > { %v2115_v53 = vunpack.c.l.s8.bf16 %v1627_v52  ;;  %v2119_v20 = vunpack.c.h.s8.bf16 %v1627_v52 }
 0x2d5   : > { %2431 = vmatpush1.bf16.msra.mxu0 %v2077_v57  ;;  %2759 = vmatpush1.bf16.msra.mxu1 %v2079_v58  ;;  %v2120_v57 = vunpack.c.h.s8.bf16 %v1628_v18  ;;  %v1630_v58 = vld [vmem:[%s4147_s19 + $0x768] sm:$0xff] }
 0x2d6   : > { %2432 = vmatprep.subr.bf16.mxu0 %v2082_v61  ;;  %2760 = vmatprep.subr.bf16.mxu1 %v2084_v19  ;;  %v1632_v61 = vld [vmem:[%s4147_s19 + $0x778] sm:$0xff]  ;;  %v2117_v19 = vunpack.c.h.s8.bf16 %v1625_v48  ;;  %v2122_v60 = vunpack.c.l.s8.bf16 %v1630_v58  ;;  %v2126_v24 = vunpack.c.h.s8.bf16 %v1630_v58  ;;  %v1647_v48 = vld [vmem:[%s4147_s19 + $0x7f0] sm:$0xff] }
 0x2d7   : > { %v2159_v58 = vunpack.c.h.s8.bf16 %v1647_v48 }
 0x2d9   : > { %2433 = vmatpush1.bf16.msra.mxu0 %v2081_v22  ;;  %2761 = vmatpush1.bf16.msra.mxu1 %v2083_v21  ;;  %v2124_v22 = vunpack.c.l.s8.bf16 %v1632_v61  ;;  %v1629_v21 = vld [vmem:[%s4147_s19 + $0x760] sm:$0xff] }
 0x2da   : > { %2434 = vmatprep.subr.bf16.mxu0 %v2086_v1  ;;  %2762 = vmatprep.subr.bf16.mxu1 %v2088_v34  ;;  %v1631_v1 = vld [vmem:[%s4147_s19 + $0x770] sm:$0xff]  ;;  %v2121_v34 = vunpack.c.l.s8.bf16 %v1629_v21 }
 0x2db   : > { %v2123_v23 = vunpack.c.l.s8.bf16 %v1631_v1  ;;  %v2127_v29 = vunpack.c.h.s8.bf16 %v1631_v1 }
 0x2dd   : > { %2435 = vmatpush1.bf16.msra.mxu0 %v2085_v2  ;;  %2763 = vmatpush1.bf16.msra.mxu1 %v2087_v26  ;;  %v2128_v2 = vunpack.c.h.s8.bf16 %v1632_v61  ;;  %v1634_v26 = vld [vmem:[%s4147_s19 + $0x788] sm:$0xff]  ;;  %v1391_v61 = vpack.c.bf16 %v4739_v39, %v4739_v39 }
 0x2de   : > { %2436 = vmatprep.subr.bf16.mxu0 %v2090_v27  ;;  %2764 = vmatprep.subr.bf16.mxu1 %v2092_v28  ;;  %v1636_v27 = vld [vmem:[%s4147_s19 + $0x798] sm:$0xff]  ;;  %v2125_v28 = vunpack.c.h.s8.bf16 %v1629_v21  ;;  %v2130_v30 = vunpack.c.l.s8.bf16 %v1634_v26  ;;  %v2134_v37 = vunpack.c.h.s8.bf16 %v1634_v26 }
 0x2df   : > { %v2132_v31 = vunpack.c.l.s8.bf16 %v1636_v27  ;;  %v2136_v41 = vunpack.c.h.s8.bf16 %v1636_v27 }
 0x2e1   : > { %2437 = vmatpush1.bf16.msra.mxu0 %v2089_v32  ;;  %2765 = vmatpush1.bf16.msra.mxu1 %v2091_v33  ;;  %v1633_v32 = vld [vmem:[%s4147_s19 + $0x780] sm:$0xff]  ;;  %v1635_v33 = vld [vmem:[%s4147_s19 + $0x790] sm:$0xff] }
 0x2e2   : > { %2438 = vmatprep.subr.bf16.mxu0 %v2094_v35  ;;  %2766 = vmatprep.subr.bf16.mxu1 %v2096_v36  ;;  %v2129_v35 = vunpack.c.l.s8.bf16 %v1633_v32  ;;  %v2131_v36 = vunpack.c.l.s8.bf16 %v1635_v33 }
 0x2e5   : > { %2439 = vmatpush1.bf16.msra.mxu0 %v2093_v40  ;;  %2767 = vmatpush1.bf16.msra.mxu1 %v2095_v46  ;;  %v1638_v40 = vld [vmem:[%s4147_s19 + $0x7a8] sm:$0xff]  ;;  %v1640_v46 = vld [vmem:[%s4147_s19 + $0x7b8] sm:$0xff] }
 0x2e6   : > { %2449 = vmatprep.subr.bf16.mxu0 %v2098_v5  ;;  %2777 = vmatprep.subr.bf16.mxu1 %v2100_v42  ;;  %v2133_v5 = vunpack.c.h.s8.bf16 %v1633_v32  ;;  %v2135_v42 = vunpack.c.h.s8.bf16 %v1635_v33  ;;  %v2138_v43 = vunpack.c.l.s8.bf16 %v1638_v40  ;;  %v2140_v45 = vunpack.c.l.s8.bf16 %v1640_v46  ;;  %v3927_v32 = vld [vmem:[%s5084_s6] ss:$8 sps:$4 sm:$0xff] (!%p3713_p5)  }
 0x2e7   : > { %v3928_v33 = vld [vmem:[%s5084_s6 + $0x100] ss:$8 sps:$4 sm:$0xff] (!%p3713_p5)  }
 0x2e8   : > { %2441 = vmatmul.mubr.bf16.vlgmr.msra.gmra.mrb[0].mxu0 %v1389_v49  ;;  %2769 = vmatmul.mubr.bf16.vlgmr.msra.gmra.mrb[0].mxu1 %v1389_v49  ;;  %v1639_v49 = vld [vmem:[%s4147_s19 + $0x7b0] sm:$0xff] }
 0x2e9   : > { %2450 = vmatpush1.bf16.msra.mxu0 %v2097_v44  ;;  %2778 = vmatpush1.bf16.msra.mxu1 %v2099_v54  ;;  %v2137_v44 = vunpack.c.l.s8.bf16 %v1637_v47  ;;  %v2139_v54 = vunpack.c.l.s8.bf16 %v1639_v49 }
 0x2ea   : > { %2451 = vmatprep.subr.bf16.mxu0 %v2102_v55  ;;  %2779 = vmatprep.subr.bf16.mxu1 %v2104_v56  ;;  %v2142_v55 = vunpack.c.h.s8.bf16 %v1638_v40  ;;  %v2144_v56 = vunpack.c.h.s8.bf16 %v1640_v46  ;;  %v3935_v40 = vld [vmem:[%s5084_s6 + $0x24] ss:$8 sps:$4 sm:$0xff] (!%p3713_p5)  }
 0x2eb   : > { %2481 = vmatprep.mubr.bf16.mxu0 %v1392_v63  ;;  %2809 = vmatprep.mubr.bf16.mxu1 %v1392_v63  ;;  %v2141_v63 = vunpack.c.h.s8.bf16 %v1637_v47  ;;  %v3937_v46 = vld [vmem:[%s5084_s6 + $0x124] ss:$8 sps:$4 sm:$0xff] (!%p3713_p5)   ;;  %v3945_v47 = vld [vmem:[%s5084_s6 + $0x30] ss:$8 sps:$4 sm:$0xff] (!%p3713_p5)  }
 0x2ed   : > { %2452 = vmatpush1.bf16.msra.mxu0 %v2101_v0  ;;  %2780 = vmatpush1.bf16.msra.mxu1 %v2103_v3  ;;  %v2143_v0 = vunpack.c.h.s8.bf16 %v1639_v49  ;;  %v2146_v3 = vunpack.c.l.s8.bf16 %v1642_v59  ;;  %v3946_v49 = vld [vmem:[%s5084_s6 + $0x130] ss:$8 sps:$4 sm:$0xff] (!%p3713_p5)  }
 0x2ee   : > { %2453 = vmatprep.subr.bf16.mxu0 %v2106_v9  ;;  %2781 = vmatprep.subr.bf16.mxu1 %v2108_v4  ;;  %v2148_v9 = vunpack.c.l.s8.bf16 %v1644_v62  ;;  %v1641_v4 = vld [vmem:[%s4147_s19 + $0x7c0] sm:$0xff] }
 0x2ef   : > { %v2145_v11 = vunpack.c.l.s8.bf16 %v1641_v4  ;;  %v2149_v18 = vunpack.c.h.s8.bf16 %v1641_v4  ;;  %v3963_v4 = vld [vmem:[%s5084_s6 + $0x60] ss:$8 sps:$4 sm:$0xff] (!%p3713_p5)  }
 0x2f1   : > { %2454 = vmatpush1.bf16.msra.mxu0 %v2105_v25  ;;  %2782 = vmatpush1.bf16.msra.mxu1 %v2107_v10  ;;  %v2147_v25 = vunpack.c.l.s8.bf16 %v1643_v6  ;;  %v2150_v10 = vunpack.c.h.s8.bf16 %v1642_v59  ;;  %v3953_v59 = vld [vmem:[%s5084_s6 + $0x54] ss:$8 sps:$4 sm:$0xff] (!%p3713_p5)  }
 0x2f2   : > { %2455 = vmatprep.subr.bf16.mxu0 %v2110_v51  ;;  %2783 = vmatprep.subr.bf16.mxu1 %v2112_v12  ;;  %v2152_v51 = vunpack.c.h.s8.bf16 %v1644_v62  ;;  %v1646_v12 = vld [vmem:[%s4147_s19 + $0x7e8] sm:$0xff]  ;;  %v3955_v62 = vld [vmem:[%s5084_s6 + $0x154] ss:$8 sps:$4 sm:$0xff] (!%p3713_p5)  }
 0x2f5   : > { %2456 = vmatpush1.bf16.msra.mxu0 %v2109_v7  ;;  %2784 = vmatpush1.bf16.msra.mxu1 %v2111_v13  ;;  %v2151_v7 = vunpack.c.h.s8.bf16 %v1643_v6  ;;  %v2154_v13 = vunpack.c.l.s8.bf16 %v1646_v12  ;;  %v3964_v6 = vld [vmem:[%s5084_s6 + $0x160] ss:$8 sps:$4 sm:$0xff] (!%p3713_p5)  }
 0x2f6   : > { %2457 = vmatprep.subr.bf16.mxu0 %v2114_v14  ;;  %2785 = vmatprep.subr.bf16.mxu1 %v2116_v15  ;;  %v2156_v14 = vunpack.c.l.s8.bf16 %v1648_v8  ;;  %v1645_v15 = vld [vmem:[%s4147_s19 + $0x7e0] sm:$0xff] }
 0x2f7   : > { %v2153_v52 = vunpack.c.l.s8.bf16 %v1645_v15 }
 0x2f9   : > { %2458 = vmatpush1.bf16.msra.mxu0 %v2113_v16  ;;  %2786 = vmatpush1.bf16.msra.mxu1 %v2115_v53  ;;  %v2155_v16 = vunpack.c.l.s8.bf16 %v1647_v48  ;;  %v2158_v53 = vunpack.c.h.s8.bf16 %v1646_v12  ;;  %v3971_v12 = vld [vmem:[%s5084_s6 + $0x84] ss:$8 sps:$4 sm:$0xff] (!%p3713_p5)   ;;  %v3982_v48 = vld [vmem:[%s5084_s6 + $0x190] ss:$8 sps:$4 sm:$0xff] (!%p3713_p5)  }
 0x2fa   : > { %2459 = vmatprep.subr.bf16.mxu0 %v2118_v17  ;;  %2787 = vmatprep.subr.bf16.mxu1 %v2120_v57  ;;  %v2160_v17 = vunpack.c.h.s8.bf16 %v1648_v8  ;;  %v2157_v57 = vunpack.c.h.s8.bf16 %v1645_v15  ;;  %v3973_v8 = vld [vmem:[%s5084_s6 + $0x184] ss:$8 sps:$4 sm:$0xff] (!%p3713_p5)   ;;  %v3981_v15 = vld [vmem:[%s5084_s6 + $0x90] ss:$8 sps:$4 sm:$0xff] (!%p3713_p5)  }
 0x2fd   : > { %2460 = vmatpush1.bf16.msra.mxu0 %v2117_v19  ;;  %2788 = vmatpush1.bf16.msra.mxu1 %v2119_v20 }
 0x2fe   : > { %2461 = vmatprep.subr.bf16.mxu0 %v2122_v60  ;;  %2789 = vmatprep.subr.bf16.mxu1 %v2124_v22 }
 0x301   : > { %2462 = vmatpush1.bf16.msra.mxu0 %v2121_v34  ;;  %2790 = vmatpush1.bf16.msra.mxu1 %v2123_v23 }
 0x302   : > { %2463 = vmatprep.subr.bf16.mxu0 %v2126_v24  ;;  %2791 = vmatprep.subr.bf16.mxu1 %v2128_v2 }
 0x305   : > { %2464 = vmatpush1.bf16.msra.mxu0 %v2125_v28  ;;  %2792 = vmatpush1.bf16.msra.mxu1 %v2127_v29  ;;  %v2161_v28 = vld [vmem:[#allocation3] sm:$0xff] }
 0x306   : > { %2465 = vmatprep.subr.bf16.mxu0 %v2130_v30  ;;  %2793 = vmatprep.subr.bf16.mxu1 %v2132_v31  ;;  %v3923_v30 = vld [vmem:[%s5084_s6 + $0x4] ss:$8 sps:$4 sm:$0xff] (!%p3713_p5)  }
 0x307   : > { %v3925_v31 = vld [vmem:[%s5084_s6 + $0x104] ss:$8 sps:$4 sm:$0xff] (!%p3713_p5)  }
 0x309   : > { %2466 = vmatpush1.bf16.msra.mxu0 %v2129_v35  ;;  %2794 = vmatpush1.bf16.msra.mxu1 %v2131_v36  ;;  %v3929_v35 = vld [vmem:[%s5084_s6 + $0x14] ss:$8 sps:$4 sm:$0xff] (!%p3713_p5)  }
 0x30a   : > { %2467 = vmatprep.subr.bf16.mxu0 %v2134_v37  ;;  %2795 = vmatprep.subr.bf16.mxu1 %v2136_v41  ;;  %v3931_v36 = vld [vmem:[%s5084_s6 + $0x114] ss:$8 sps:$4 sm:$0xff] (!%p3713_p5)   ;;  %v3933_v37 = vld [vmem:[%s5084_s6 + $0x10] ss:$8 sps:$4 sm:$0xff] (!%p3713_p5)  }
 0x30b   : > { %v3934_v41 = vld [vmem:[%s5084_s6 + $0x110] ss:$8 sps:$4 sm:$0xff] (!%p3713_p5)  }
 0x30d   : > { %2468 = vmatpush1.bf16.msra.mxu0 %v2133_v5  ;;  %2796 = vmatpush1.bf16.msra.mxu1 %v2135_v42  ;;  %v3939_v5 = vld [vmem:[%s5084_s6 + $0x20] ss:$8 sps:$4 sm:$0xff] (!%p3713_p5)  }
 0x30e   : > { %2469 = vmatprep.subr.bf16.mxu0 %v2138_v43  ;;  %2797 = vmatprep.subr.bf16.mxu1 %v2140_v45  ;;  %v3940_v42 = vld [vmem:[%s5084_s6 + $0x120] ss:$8 sps:$4 sm:$0xff] (!%p3713_p5)   ;;  %v3941_v43 = vld [vmem:[%s5084_s6 + $0x34] ss:$8 sps:$4 sm:$0xff] (!%p3713_p5)  }
 0x30f   : > { %v3943_v45 = vld [vmem:[%s5084_s6 + $0x134] ss:$8 sps:$4 sm:$0xff] (!%p3713_p5)  }
 0x311   : > { %2470 = vmatpush1.bf16.msra.mxu0 %v2137_v44  ;;  %2798 = vmatpush1.bf16.msra.mxu1 %v2139_v54  ;;  %v3947_v44 = vld [vmem:[%s5084_s6 + $0x44] ss:$8 sps:$4 sm:$0xff] (!%p3713_p5)  }
 0x312   : > { %2471 = vmatprep.subr.bf16.mxu0 %v2142_v55  ;;  %2799 = vmatprep.subr.bf16.mxu1 %v2144_v56  ;;  %v3949_v54 = vld [vmem:[%s5084_s6 + $0x144] ss:$8 sps:$4 sm:$0xff] (!%p3713_p5)   ;;  %v3951_v55 = vld [vmem:[%s5084_s6 + $0x40] ss:$8 sps:$4 sm:$0xff] (!%p3713_p5)  }
 0x313   : > { %v3952_v56 = vld [vmem:[%s5084_s6 + $0x140] ss:$8 sps:$4 sm:$0xff] (!%p3713_p5)  }
 0x315   : > { %2472 = vmatpush1.bf16.msra.mxu0 %v2141_v63  ;;  %2800 = vmatpush1.bf16.msra.mxu1 %v2143_v0  ;;  %v3957_v63 = vld [vmem:[%s5084_s6 + $0x50] ss:$8 sps:$4 sm:$0xff] (!%p3713_p5)  }
 0x316   : > { %2473 = vmatprep.subr.bf16.mxu0 %v2146_v3  ;;  %2801 = vmatprep.subr.bf16.mxu1 %v2148_v9  ;;  %v3958_v0 = vld [vmem:[%s5084_s6 + $0x150] ss:$8 sps:$4 sm:$0xff] (!%p3713_p5)   ;;  %v3959_v3 = vld [vmem:[%s5084_s6 + $0x64] ss:$8 sps:$4 sm:$0xff] (!%p3713_p5)  }
 0x317   : > { %v3961_v9 = vld [vmem:[%s5084_s6 + $0x164] ss:$8 sps:$4 sm:$0xff] (!%p3713_p5)  }
 0x319   : > { %2474 = vmatpush1.bf16.msra.mxu0 %v2145_v11  ;;  %2802 = vmatpush1.bf16.msra.mxu1 %v2147_v25  ;;  %v3965_v11 = vld [vmem:[%s5084_s6 + $0x74] ss:$8 sps:$4 sm:$0xff] (!%p3713_p5)  }
 0x31a   : > { %2475 = vmatprep.subr.bf16.mxu0 %v2150_v10  ;;  %2803 = vmatprep.subr.bf16.mxu1 %v2152_v51  ;;  %v3967_v25 = vld [vmem:[%s5084_s6 + $0x174] ss:$8 sps:$4 sm:$0xff] (!%p3713_p5)   ;;  %v3969_v10 = vld [vmem:[%s5084_s6 + $0x70] ss:$8 sps:$4 sm:$0xff] (!%p3713_p5)  }
 0x31b   : > { %v3970_v51 = vld [vmem:[%s5084_s6 + $0x170] ss:$8 sps:$4 sm:$0xff] (!%p3713_p5)  }
 0x31d   : > { %2476 = vmatpush1.bf16.msra.mxu0 %v2149_v18  ;;  %2804 = vmatpush1.bf16.msra.mxu1 %v2151_v7  ;;  %v3975_v18 = vld [vmem:[%s5084_s6 + $0x80] ss:$8 sps:$4 sm:$0xff] (!%p3713_p5)  }
 0x31e   : > { %2477 = vmatprep.subr.bf16.mxu0 %v2154_v13  ;;  %2805 = vmatprep.subr.bf16.mxu1 %v2156_v14  ;;  %v3976_v7 = vld [vmem:[%s5084_s6 + $0x180] ss:$8 sps:$4 sm:$0xff] (!%p3713_p5)   ;;  %v3977_v13 = vld [vmem:[%s5084_s6 + $0x94] ss:$8 sps:$4 sm:$0xff] (!%p3713_p5)  }
 0x31f   : > { %v3979_v14 = vld [vmem:[%s5084_s6 + $0x194] ss:$8 sps:$4 sm:$0xff] (!%p3713_p5)  }
 0x321   : > { %2478 = vmatpush1.bf16.msra.mxu0 %v2153_v52  ;;  %2806 = vmatpush1.bf16.msra.mxu1 %v2155_v16  ;;  %v3983_v52 = vld [vmem:[%s5084_s6 + $0xa4] ss:$8 sps:$4 sm:$0xff] (!%p3713_p5)  }
 0x322   : > { %2479 = vmatprep.subr.bf16.mxu0 %v2158_v53  ;;  %2807 = vmatprep.subr.bf16.mxu1 %v2160_v17  ;;  %v3985_v16 = vld [vmem:[%s5084_s6 + $0x1a4] ss:$8 sps:$4 sm:$0xff] (!%p3713_p5)   ;;  %v3987_v53 = vld [vmem:[%s5084_s6 + $0xa0] ss:$8 sps:$4 sm:$0xff] (!%p3713_p5)  }
 0x323   : > { %v3988_v17 = vld [vmem:[%s5084_s6 + $0x1a0] ss:$8 sps:$4 sm:$0xff] (!%p3713_p5)  }
 0x325   : > { %2480 = vmatpush1.bf16.msra.mxu0 %v2157_v57  ;;  %2808 = vmatpush1.bf16.msra.mxu1 %v2159_v58  ;;  %v4913_v57 = vsub.s32 (!%p3713_p5), 0, %v4446_v38  ;;  %v3989_v58 = vld [vmem:[%s5084_s6 + $0xb4] ss:$8 sps:$4 sm:$0xff] (!%p3713_p5)  }
 0x326   : > { %3344 = vmatprep.subr.bf16.mxu1 (!%p3713_p5), %v3923_v30  ;;  %3385 = vmatprep.subr.bf16.mxu0 (!%p3713_p5), %v3925_v31 }
 0x328   : > { %2482 = vmatmul.mubr.bf16.vlgmr.msra.gmra.mrb[0].mxu0 %v1391_v61  ;;  %2810 = vmatmul.mubr.bf16.vlgmr.msra.gmra.mrb[0].mxu1 %v1391_v61  ;;  %v4919_v61 = vsub.s32 (!%p3713_p5), 1, %v4446_v38 }
 0x329   : > { %3345 = vmatpush1.bf16.msra.mxu1 (!%p3713_p5), %v3927_v32  ;;  %3386 = vmatpush1.bf16.msra.mxu0 (!%p3713_p5), %v3928_v33  ;;  %v4000_v33 = vld [vmem:[%s5084_s6 + $0x1c0] ss:$8 sps:$4 sm:$0xff] (!%p3713_p5)  }
 0x32a   : > { %3346 = vmatprep.subr.bf16.mxu1 (!%p3713_p5), %v3929_v35  ;;  %3387 = vmatprep.subr.bf16.mxu0 (!%p3713_p5), %v3931_v36 }
 0x32d   : > { %3347 = vmatpush1.bf16.msra.mxu1 (!%p3713_p5), %v3933_v37  ;;  %3388 = vmatpush1.bf16.msra.mxu0 (!%p3713_p5), %v3934_v41  ;;  %v4001_v37 = vld [vmem:[%s5084_s6 + $0xd4] ss:$8 sps:$4 sm:$0xff] (!%p3713_p5)  }
 0x32e   : > { %3348 = vmatprep.subr.bf16.mxu1 (!%p3713_p5), %v3935_v40  ;;  %3389 = vmatprep.subr.bf16.mxu0 (!%p3713_p5), %v3937_v46  ;;  %v4003_v46 = vld [vmem:[%s5084_s6 + $0x1d4] ss:$8 sps:$4 sm:$0xff] (!%p3713_p5)  }
 0x331   : > { %3349 = vmatpush1.bf16.msra.mxu1 (!%p3713_p5), %v3939_v5  ;;  %3390 = vmatpush1.bf16.msra.mxu0 (!%p3713_p5), %v3940_v42 }
 0x332   : > { %3350 = vmatprep.subr.bf16.mxu1 (!%p3713_p5), %v3941_v43  ;;  %3391 = vmatprep.subr.bf16.mxu0 (!%p3713_p5), %v3943_v45  ;;  %v4005_v43 = vld [vmem:[%s5084_s6 + $0xd0] ss:$8 sps:$4 sm:$0xff] (!%p3713_p5)  }
 0x335   : > { %3351 = vmatpush1.bf16.msra.mxu1 (!%p3713_p5), %v3945_v47  ;;  %3392 = vmatpush1.bf16.msra.mxu0 (!%p3713_p5), %v3946_v49  ;;  %v4006_v49 = vld [vmem:[%s5084_s6 + $0x1d0] ss:$8 sps:$4 sm:$0xff] (!%p3713_p5)  }
 0x336   : > { %3352 = vmatprep.subr.bf16.mxu1 (!%p3713_p5), %v3947_v44  ;;  %3393 = vmatprep.subr.bf16.mxu0 (!%p3713_p5), %v3949_v54  ;;  %v4007_v54 = vld [vmem:[%s5084_s6 + $0xe4] ss:$8 sps:$4 sm:$0xff] (!%p3713_p5)  }
 0x339   : > { %3353 = vmatpush1.bf16.msra.mxu1 (!%p3713_p5), %v3951_v55  ;;  %3394 = vmatpush1.bf16.msra.mxu0 (!%p3713_p5), %v3952_v56  ;;  %v4009_v56 = vld [vmem:[%s5084_s6 + $0x1e4] ss:$8 sps:$4 sm:$0xff] (!%p3713_p5)  }
 0x33a   : > { %3354 = vmatprep.subr.bf16.mxu1 (!%p3713_p5), %v3953_v59  ;;  %3395 = vmatprep.subr.bf16.mxu0 (!%p3713_p5), %v3955_v62  ;;  %v4011_v62 = vld [vmem:[%s5084_s6 + $0xe0] ss:$8 sps:$4 sm:$0xff] (!%p3713_p5)  }
 0x33d   : > { %3355 = vmatpush1.bf16.msra.mxu1 (!%p3713_p5), %v3957_v63  ;;  %3396 = vmatpush1.bf16.msra.mxu0 (!%p3713_p5), %v3958_v0  ;;  %v4012_v63 = vld [vmem:[%s5084_s6 + $0x1e0] ss:$8 sps:$4 sm:$0xff] (!%p3713_p5)   ;;  %v4013_v0 = vld [vmem:[%s5084_s6 + $0xf4] ss:$8 sps:$4 sm:$0xff] (!%p3713_p5)  }
 0x33e   : > { %3356 = vmatprep.subr.bf16.mxu1 (!%p3713_p5), %v3959_v3  ;;  %3397 = vmatprep.subr.bf16.mxu0 (!%p3713_p5), %v3961_v9  ;;  %v4015_v3 = vld [vmem:[%s5084_s6 + $0x1f4] ss:$8 sps:$4 sm:$0xff] (!%p3713_p5)  }
 0x341   : > { %3357 = vmatpush1.bf16.msra.mxu1 (!%p3713_p5), %v3963_v4  ;;  %3398 = vmatpush1.bf16.msra.mxu0 (!%p3713_p5), %v3964_v6 }
 0x342   : > { %3358 = vmatprep.subr.bf16.mxu1 (!%p3713_p5), %v3965_v11  ;;  %3399 = vmatprep.subr.bf16.mxu0 (!%p3713_p5), %v3967_v25  ;;  %v4017_v25 = vld [vmem:[%s5084_s6 + $0xf0] ss:$8 sps:$4 sm:$0xff] (!%p3713_p5)  }
 0x345   : > { %3359 = vmatpush1.bf16.msra.mxu1 (!%p3713_p5), %v3969_v10  ;;  %3400 = vmatpush1.bf16.msra.mxu0 (!%p3713_p5), %v3970_v51  ;;  %v4018_v10 = vld [vmem:[%s5084_s6 + $0x1f0] ss:$8 sps:$4 sm:$0xff] (!%p3713_p5)  }
 0x346   : > { %3360 = vmatprep.subr.bf16.mxu1 (!%p3713_p5), %v3971_v12  ;;  %3401 = vmatprep.subr.bf16.mxu0 (!%p3713_p5), %v3973_v8  ;;  %v4019_v8 = vld [vmem:[%s5086_s8 + $0x40] sm:$0xff] (!%p3713_p5)  }
 0x349   : > { %3361 = vmatpush1.bf16.msra.mxu1 (!%p3713_p5), %v3975_v18  ;;  %3402 = vmatpush1.bf16.msra.mxu0 (!%p3713_p5), %v3976_v7 }
 0x34a   : > { %3362 = vmatprep.subr.bf16.mxu1 (!%p3713_p5), %v3977_v13  ;;  %3403 = vmatprep.subr.bf16.mxu0 (!%p3713_p5), %v3979_v14 }
 0x34d   : > { %3363 = vmatpush1.bf16.msra.mxu1 (!%p3713_p5), %v3981_v15  ;;  %3404 = vmatpush1.bf16.msra.mxu0 (!%p3713_p5), %v3982_v48  ;;  %v4020_v15 = vld [vmem:[%s5086_s8] sm:$0xff] (!%p3713_p5)  }
 0x34e   : > { %3364 = vmatprep.subr.bf16.mxu1 (!%p3713_p5), %v3983_v52  ;;  %3405 = vmatprep.subr.bf16.mxu0 (!%p3713_p5), %v3985_v16  ;;  %v4022_v52 = vld [vmem:[%s5086_s8 + $0x8] sm:$0xff] (!%p3713_p5)   ;;  %v4023_v16 = vld [vmem:[%s5086_s8 + $0x50] sm:$0xff] (!%p3713_p5)  }
 0x351   : > { %3365 = vmatpush1.bf16.msra.mxu1 (!%p3713_p5), %v3987_v53  ;;  %3406 = vmatpush1.bf16.msra.mxu0 (!%p3713_p5), %v3988_v17  ;;  %v4024_v53 = vld [vmem:[%s5086_s8 + $0x10] sm:$0xff] (!%p3713_p5)   ;;  %v4025_v17 = vld [vmem:[%s5086_s8 + $0x58] sm:$0xff] (!%p3713_p5)  }
 0x352   : > { %3366 = vmatprep.subr.bf16.mxu1 (!%p3713_p5), %v3989_v58  ;;  %v4026_v58 = vld [vmem:[%s5086_s8 + $0x18] sm:$0xff] (!%p3713_p5)  }
 0x3fb   : > { %v2483_v19 = vpop.f32.mrb[0].mxu0  ;;  %v2811_v20 = vpop.f32.mrb[0].mxu1 }
 0x3fc   : > { %v2485_v60 = vpop.f32.mrb[1].mxu0  ;;  %v2813_v22 = vpop.f32.mrb[1].mxu1 }
 0x3fd   : > { %v2822_v21 = vcombine.low %v2483_v19, %v2485_v60  ;;  %v2823_v1 = vcombine.low %v2811_v20, %v2813_v22  ;;  %v2487_v34 = vpop.f32.mrb[2].mxu0  ;;  %v2815_v23 = vpop.f32.mrb[2].mxu1  ;;  %v2859_v19 = vsub.s32 (!%p3713_p5), 2, %v4446_v38  ;;  %v3991_v20 = vld [vmem:[%s5084_s6 + $0x1b4] ss:$8 sps:$4 sm:$0xff] (!%p3713_p5)   ;;  %v2863_v60 = vsub.s32 (!%p3713_p5), 3, %v4446_v38 }
 0x3fe   : > { %v2488_v24 = vpop.f32.mrb[3].mxu0  ;;  %v2816_v2 = vpop.f32.mrb[3].mxu1  ;;  %v3993_v22 = vld [vmem:[%s5084_s6 + $0xb0] ss:$8 sps:$4 sm:$0xff] (!%p3713_p5)   ;;  %v2884_v34 = vld [vmem:[%s5083_s5] sm:$0xf] (!%p3713_p5)  ;;  %3407 = vmatprep.subr.bf16.mxu0 (!%p3713_p5), %v3991_v20 }
 0x3ff   : > { %v2830_v26 = vrot.slane %v2822_v21, %v4458_v50  ;;  %v2837_v27 = vrot.slane %v2823_v1, %v4458_v50  ;;  %2845 = sbr.rel (%p3713_p5) target bundleno = 1490 (0x5d2), region = 68  ;;  %v3994_v21 = vld [vmem:[%s5084_s6 + $0x1b0] ss:$8 sps:$4 sm:$0xff] (!%p3713_p5)   ;;  %v2847_v1 = vld [vmem:[%s5082_s4] sm:$0xf] (!%p3713_p5)  ;;  %v2897_v31 = vrot.slane (!%p3713_p5), %v2884_v34, %v2859_v19  ;;  %v2901_v32 = vrot.slane (!%p3713_p5), %v2884_v34, %v2863_v60  ;;  %3367 = vmatpush1.bf16.msra.mxu1 (!%p3713_p5), %v3993_v22  ;;  %v4030_v22 = vld [vmem:[%s5086_s8 + $0x28] sm:$0xff] (!%p3713_p5)  }
 0x400   : > { %v3995_v38 = vld [vmem:[%s5084_s6 + $0xc4] ss:$8 sps:$4 sm:$0xff] (!%p3713_p5)   ;;  %v2852_v23 = vrot.slane (!%p3713_p5), %v2847_v1, %v4913_v57  ;;  %v2856_v24 = vrot.slane (!%p3713_p5), %v2847_v1, %v4919_v61  ;;  %v2860_v2 = vrot.slane (!%p3713_p5), %v2847_v1, %v2859_v19  ;;  %3408 = vmatpush1.bf16.msra.mxu0 (!%p3713_p5), %v3994_v21  ;;  %v4031_v21 = vld [vmem:[%s5086_s8 + $0x70] sm:$0xff] (!%p3713_p5)  }
 0x401   : > { %v2838_v39 = vcombine.low %v2830_v26, %v2837_v27  ;;  %v3997_v26 = vld [vmem:[%s5084_s6 + $0x1c4] ss:$8 sps:$4 sm:$0xff] (!%p3713_p5)   ;;  %v2864_v27 = vrot.slane (!%p3713_p5), %v2847_v1, %v2863_v60  ;;  %v2903_v40 = vcombine.low (!%p3713_p5), %v2897_v31, %v2901_v32  ;;  %3368 = vmatprep.subr.bf16.mxu1 (!%p3713_p5), %v3995_v38  ;;  %v4032_v1 = vld [vmem:[%s5086_s8 + $0x30] sm:$0xff] (!%p3713_p5)   ;;  %v4034_v38 = vld [vmem:[%s5086_s8 + $0x38] sm:$0xff] (!%p3713_p5)  }
 0x402   : > { %v2865_v30 = vcombine.low (!%p3713_p5), %v2852_v23, %v2856_v24  ;;  %3409 = vmatprep.subr.bf16.mxu0 (!%p3713_p5), %v3997_v26  ;;  %v4027_v19 = vld [vmem:[%s5086_s8 + $0x60] sm:$0xff] (!%p3713_p5)   ;;  %v4029_v60 = vld [vmem:[%s5086_s8 + $0x68] sm:$0xff] (!%p3713_p5)  }
 0x403   : > { %v2840_v29 = vadd.f32 %v2838_v39, %v2161_v28  ;;  %v2889_v28 = vrot.slane (!%p3713_p5), %v2884_v34, %v4913_v57  ;;  %v2893_v39 = vrot.slane (!%p3713_p5), %v2884_v34, %v4919_v61  ;;  %v2866_v35 = vcombine.low (!%p3713_p5), %v2860_v2, %v2864_v27  ;;  %v4028_v20 = vld [vmem:[%s5086_s8 + $0x20] sm:$0xff] (!%p3713_p5)   ;;  %v4033_v34 = vld [vmem:[%s5086_s8 + $0x78] sm:$0xff] (!%p3713_p5)  }
 0x404   : > { %v2873_v41 = vrot.slane (!%p3713_p5), %v2865_v30, %v4458_v50  ;;  %v2917_v47 = vrot.slane (!%p3713_p5), %v2903_v40, %v4458_v50  ;;  %3410 = vmatpush1.bf16.msra.mxu0 (!%p3713_p5), %v4000_v33  ;;  %v3012_v23 = vld [vmem:[%s5085_s7] sm:$0x3] (!%p3713_p5) }
 0x405   : > { %2841 = vst [vmem:[#allocation3] sm:$0xff] %v2840_v29  ;;  %v3999_v29 = vld [vmem:[%s5084_s6 + $0xc0] ss:$8 sps:$4 sm:$0xff] (!%p3713_p5)   ;;  %v2902_v36 = vcombine.low (!%p3713_p5), %v2889_v28, %v2893_v39  ;;  %v2880_v5 = vrot.slane (!%p3713_p5), %v2866_v35, %v4458_v50  ;;  %3411 = vmatprep.subr.bf16.mxu0 (!%p3713_p5), %v4003_v46  ;;  %v3017_v24 = vrot.slane (!%p3713_p5), %v3012_v23, %v4913_v57 }
 0x406   : > { %3369 = vmatpush1.bf16.msra.mxu1 %v3999_v29  ;;  %v3021_v2 = vrot.slane %v3012_v23, %v4919_v61  ;;  %v3778_v61 = vld [vmem:[%s5087_s9] ss:$0 sm:$0xff] }
 0x407   : > { %v2910_v42 = vrot.slane %v2902_v36, %v4458_v50  ;;  %v2881_v44 = vcombine.low %v2873_v41, %v2880_v5  ;;  %3370 = vmatprep.subr.bf16.mxu1 %v4001_v37 }
 0x408   : > { %3412 = vmatpush1.bf16.msra.mxu0 %v4006_v49 }
 0x409   : > { %v2918_v55 = vcombine.low %v2910_v42, %v2917_v47  ;;  %3413 = vmatprep.subr.bf16.mxu0 %v4009_v56 }
 0x40a   : > { %3371 = vmatpush1.bf16.msra.mxu1 %v4005_v43 }
 0x40b   : > { %3372 = vmatprep.subr.bf16.mxu1 %v4007_v54 }
 0x40c   : > { %v2846_v45 = vld [vmem:[#allocation3] sm:$0xff]  ;;  %3414 = vmatpush1.bf16.msra.mxu0 %v4012_v63 }
 0x40d   : > { %v2883_v59 = vmul.f32 %v2881_v44, %v2846_v45  ;;  %3415 = vmatprep.subr.bf16.mxu0 %v4015_v3 }
 0x40e   : > { %3373 = vmatpush1.bf16.msra.mxu1 %v4011_v62 }
 0x40f   : > { %v2920_v9 = vadd.f32 %v2918_v55, %v2883_v59  ;;  %3374 = vmatprep.subr.bf16.mxu1 %v4013_v0 }
 0x410   : > { %3416 = vmatpush1.bf16.msra.mxu0 %v4018_v10 }
 0x411   : > { %v2921_v4 = vmax.f32 %v2920_v9, 0.0 }
 0x412   : > { %3375 = vmatpush1.bf16.msra.mxu1 %v4017_v25 }
 0x413   : > { %v2930_v6 = vrot.slane %v2921_v4, %v4458_v50  ;;  %v2923_v11 = vcombine.high %v2921_v4, %v2921_v4  ;;  %3800 = vmatprep.subr.bf16.mxu1 %v4019_v8 }
 0x415   : > { %v2938_v51 = vcombine.high %v2930_v6, %v2930_v6  ;;  %v2937_v12 = vrot.slane %v2923_v11, %v4458_v50  ;;  %v2944_v13 = vpack.c.bf16 %v2930_v6, %v2930_v6  ;;  %v4021_v50 = vld [vmem:[%s5086_s8 + $0x48] sm:$0xff]  }
 0x417   : > { %v2945_v18 = vpack.c.bf16 %v2938_v51, %v2938_v51  ;;  %v2939_v7 = vcombine.high %v2937_v12, %v2937_v12  ;;  %v2946_v14 = vpack.c.bf16 %v2937_v12, %v2937_v12 }
 0x419   : > { %3376 = vmatprep.mubr.bf16.mxu1 %v2945_v18  ;;  %v2947_v48 = vpack.c.bf16 %v2939_v7, %v2939_v7 }
 0x41a   : > { %3377 = vmatmul.mubr.bf16.vlgmr.msra.gmra.mrb[0].mxu1 %v2944_v13 }
 0x41b   : > { %3417 = vmatprep.mubr.bf16.mxu0 %v2947_v48  ;;  %3801 = vmatpush3.bf16.msra.mxu1 %v4020_v15 }
 0x41c   : > { %3418 = vmatmul.mubr.bf16.vlgmr.msra.gmra.mrb[0].mxu0 %v2946_v14  ;;  %3802 = vmatprep.subr.bf16.mxu1 %v4021_v50 }
 0x41f   : > { %3803 = vmatpush3.bf16.msra.mxu1 %v4022_v52 }
 0x420   : > { %3804 = vmatprep.subr.bf16.mxu1 %v4023_v16 }
 0x423   : > { %3805 = vmatpush3.bf16.msra.mxu1 %v4024_v53 }
 0x424   : > { %3806 = vmatprep.subr.bf16.mxu1 %v4025_v17 }
 0x427   : > { %3807 = vmatpush3.bf16.msra.mxu1 %v4026_v58 }
 0x428   : > { %3808 = vmatprep.subr.bf16.mxu1 %v4027_v19 }
 0x42b   : > { %3809 = vmatpush3.bf16.msra.mxu1 %v4028_v20 }
 0x42c   : > { %3810 = vmatprep.subr.bf16.mxu1 %v4029_v60 }
 0x42f   : > { %3811 = vmatpush3.bf16.msra.mxu1 %v4030_v22 }
 0x430   : > { %3812 = vmatprep.subr.bf16.mxu1 %v4031_v21 }
 0x433   : > { %3813 = vmatpush3.bf16.msra.mxu1 %v4032_v1 }
 0x434   : > { %3814 = vmatprep.subr.bf16.mxu1 %v4033_v34 }
 0x437   : > { %3815 = vmatpush3.bf16.msra.mxu1 %v4034_v38 }
 0x4ed   : > { %v3378_v26 = vpop.f32.mrb[0].mxu1 }
 0x4ee   : > { %v3379_v27 = vadd.f32 %v3378_v26, %v3017_v24  ;;  %v3380_v39 = vpop.f32.mrb[1].mxu1 }
 0x4ef   : > { %v3419_v28 = vpop.f32.mrb[0].mxu0  ;;  %v3381_v29 = vadd.f32 %v3380_v39, %v3021_v2  ;;  %v3382_v31 = vpop.f32.mrb[2].mxu1 }
 0x4f0   : > { %v3421_v30 = vpop.f32.mrb[1].mxu0  ;;  %v3420_v32 = vadd.f32 %v3419_v28, %v3379_v27  ;;  %v3383_v35 = vpop.f32.mrb[3].mxu1 }
 0x4f1   : > { %v3423_v33 = vpop.f32.mrb[2].mxu0  ;;  %v3422_v36 = vadd.f32 %v3421_v30, %v3381_v29 }
 0x4f2   : > { %v3424_v37 = vpop.f32.mrb[3].mxu0  ;;  %v3426_v41 = vmax.f32 %v3420_v32, 0.0 }
 0x4f3   : > { %v3427_v40 = vmax.f32 %v3422_v36, 0.0 }
 0x4f4   : > { %v3428_v5 = vpack.c.bf16 %v3426_v41, %v3426_v41 }
 0x4f5   : > { %v3429_v46 = vpack.c.bf16 %v3427_v40, %v3427_v40 }
 0x4f7   : > { %3597 = vmatprep.mubr.bf16.mxu1 %v3429_v46 }
 0x4f8   : > { %3598 = vmatmul.mubr.bf16.vlgmr.msra.gmra.mrb[4].mxu1 %v3428_v5 }
 0x5cb   : > { %v3816_v57 = vpop.f32.mrb[4].mxu1 }
 0x5cc   : > { %v3817_v42 = vpop.f32.mrb[5].mxu1 }
 0x5cd   : > { %v3818_v43 = vadd.f32 %v3817_v42, %v3816_v57  ;;  %v3819_v45 = vpop.f32.mrb[6].mxu1 }
 0x5ce   : > { %v3820_v47 = vpop.f32.mrb[7].mxu1 }
 0x5cf   : > { %v3600_v49 = vadd.f32 %v3818_v43, %v3778_v61 }
 0x5d1   : > { %3605 = vst [vmem:[#allocation4] sm:$0x3] %v3600_v49 }
 0x5d2 PF: > { %p3886_p6 = scmp.eq.s32.totalorder %s4139_s14, 1  ;;  %s4077_s12 = smov [#allocation4]  }
 0x5d3   : > { %s3613_s15 = sshll.u32 %s4077_s12, 4  ;;  %s3614_s15 = int_to_ptr.vmem [resolvable:$true] %s3613_s15 }
 0x5d4   : > { %s4035_s16 = scalar_lea.vmem %s3614_s15, 32  ;;  %p4042_p10 = scmp.lt.s32.totalorder %s3614_s15, %s3614_s15 }
 0x5d5   : > { %p4036_p7 = scmp.ne.s32.totalorder %s3614_s15, %s4035_s16  ;;  %p4043_p11 = scmp.lt.s32.totalorder %s4035_s16, %s4035_s16 }
 0x5d7   : > { %p4037_p8 = pnand %p4036_p7, %p3886_p6  ;;  %p4044_p12 = por %p4043_p11, %p4042_p10 }
 0x5d9   : > { %p4038_p9 = pneg %p4037_p8 }
 0x5db   : > { %p4045_p13 = pnand %p4044_p12, %p4038_p9 }
 0x5dd   : > { %4048 = shalt.err (!%p4045_p13)
}
 0x5de   : > { %s4049_s20 = scalar_lea.hbm %s5088_s10, 32 }
 0x5df   : > { %p4050_p0 = scmp.ne.s32.totalorder %s5088_s10, %s4049_s20  ;;  %p4055_p3 = scmp.lt.u32.totalorder %s4049_s20, %s5088_s10 }
 0x5e1   : > { %p4051_p1 = pnand %p4050_p0, %p3886_p6 }
 0x5e3   : > { %p4052_p2 = pneg %p4051_p1 }
 0x5e5   : > { %p4057_p4 = pnand %p4055_p3, %p4052_p2 }
 0x5e7   : > { %4060 = shalt.err (!%p4057_p4)
}
 0x5e8   : > { %3883 = dma.vmem_to_hbm [thread:$0]  (%p3886_p6), %s3614_s15, 32, %s5088_s10, [#allocation5]  }
 0x5e9   : > { %4066 = dma.done.wait (%p3886_p6), [#allocation5], 32  }
 0x5ea   : > { %4068 = vsyncadd (%p3886_p6), [#allocation5], 4294967264 }
 0x5eb PF: > { %s21_s13 = sadd.s32 1, %s4071_s13  }
 0x5ec   : > { %p18_p5 = scmp.ge.s32.totalorder %s21_s13, 4  }
 0x5ee   :  { %20 = sbr.rel (!%p18_p5) target bundleno = 1 (0x1), region = 127 }
 0x5f5   :  { %3626 = vsyncpa [#allocation5], 1 }
 0x5f6   :  { %3628 = vsyncpa [#allocation5 + $0x1], 1 }

</bundles_post_ra>
